<compile_context>
chip_gen: v7x
topology: tpu7x:2x2x1
jax: 0.10.0
libtpu: 0.0.40
codegen_flags: <defaults>
</compile_context>

<pallas_src>
import functools

import jax
import jax.numpy as jnp
from jax.experimental import pallas as pl
from jax.experimental.pallas import tpu as pltpu


VMEM_LIMIT_BYTES = 48 * 1024 * 1024  # stays under v7x's 64 MiB physical VMEM


# ----------------------------------------------------------------------------
# Kernel 1: encoder  -> theta (softmax of mu), per-document KLD
#   normalized bows -> Linear(V,D)+ReLU -> Linear(D,D)+ReLU -> [mu|logsigma]
#   Tiled over (batch, V); V is a reduction with a VMEM f32 accumulator.
# ----------------------------------------------------------------------------
def encode_kernel(bows_ref, inv_ref, w1_ref, b1_ref, w2_ref, b2_ref,
                  wcat_ref, bcat_ref, theta_ref, kld_ref, acc_ref,
                  *, num_topics):
    v = pl.program_id(1)

    @pl.when(v == 0)
    def _():
        acc_ref[...] = jnp.zeros_like(acc_ref)

    # Normalize in f32 *before* the bf16 cast (raw counts > 256 are not exactly
    # representable in bf16; normalized values are <= 1), then accumulate the
    # V-tiled matmul against the pre-cast bf16 W1 tile.
    bows_n = (bows_ref[...] * inv_ref[...]).astype(jnp.bfloat16)
    acc_ref[...] += jnp.dot(bows_n, w1_ref[...],
                            preferred_element_type=jnp.float32)

    @pl.when(v == pl.num_programs(1) - 1)
    def _():
        h = jnp.maximum(acc_ref[...] + b1_ref[...], 0.0)
        h = jnp.dot(h.astype(jnp.bfloat16), w2_ref[...],
                    preferred_element_type=jnp.float32) + b2_ref[...]
        h = jnp.maximum(h, 0.0)
        # (enc_drop dropout: identity in eval mode)

        # Fused [mu | logsigma] projection: one (D, 2K) matmul, then slice.
        mls = jnp.dot(h.astype(jnp.bfloat16), wcat_ref[...],
                      preferred_element_type=jnp.float32) + bcat_ref[...]
        mu = mls[:, :num_topics]
        ls = mls[:, num_topics:]

        # KLD per document: -0.5 * sum(1 + logsigma - mu^2 - exp(logsigma))
        kld_ref[...] = -0.5 * jnp.sum(1.0 + ls - mu * mu - jnp.exp(ls),
                                      axis=-1, keepdims=True)

        # eval-mode reparameterize -> z = mu ; theta = softmax(z, axis=-1)
        m = jnp.max(mu, axis=-1, keepdims=True)
        e = jnp.exp(mu - m)
        theta_ref[...] = e * pl.reciprocal(
            jnp.sum(e, axis=-1, keepdims=True), approx=True)


# ----------------------------------------------------------------------------
# Kernel 2a: streaming softmax statistics for beta over the vocab axis
#   logits_kv_tile = wt (K,E) @ rho (E, V_tile); running per-topic max m and
#   denominator l.
# ----------------------------------------------------------------------------
def beta_stats_kernel(wt_ref, rho_ref, m_ref, l_ref):
    v = pl.program_id(0)

    @pl.when(v == 0)
    def _():
        m_ref[...] = jnp.full_like(m_ref, -jnp.inf)
        l_ref[...] = jnp.zeros_like(l_ref)

    logits = jnp.dot(wt_ref[...], rho_ref[...],
                     preferred_element_type=jnp.float32)      # (K, TV)
    m_new = jnp.maximum(m_ref[...], jnp.max(logits, axis=-1, keepdims=True))
    l_ref[...] = (l_ref[...] * jnp.exp(m_ref[...] - m_new)
                  + jnp.sum(jnp.exp(logits - m_new), axis=-1, keepdims=True))
    m_ref[...] = m_new


# ----------------------------------------------------------------------------
# Kernel 2b: materialize normalized beta (K, V) in f32, tiled over V.
#   beta_tile = exp(logits - m) / l ; computed exactly once (not per batch tile)
# ----------------------------------------------------------------------------
def beta_write_kernel(wt_ref, rho_ref, m_ref, l_ref, beta_ref):
    logits = jnp.dot(wt_ref[...], rho_ref[...],
                     preferred_element_type=jnp.float32)      # (K, TV)
    inv_l = pl.reciprocal(l_ref[...], approx=True)
    beta_ref[...] = jnp.exp(logits - m_ref[...]) * inv_l


# ----------------------------------------------------------------------------
# Kernel 3: decode + reconstruction loss
#   res_tile = theta (TB,K) @ beta_tile (K,TV)  [f32 — K is tiny]
#   recon += -(log(res + 1e-6) * bows).sum(V)   (resident (TB,1) accumulator)
# ----------------------------------------------------------------------------
def decode_kernel(theta_ref, bows_ref, beta_ref, recon_ref):
    v = pl.program_id(1)

    @pl.when(v == 0)
    def _():
        recon_ref[...] = jnp.zeros_like(recon_ref)

    res = jnp.dot(theta_ref[...], beta_ref[...],
                  preferred_element_type=jnp.float32)         # (TB, TV)
    preds = jnp.log(res + 1e-6)
    recon_ref[...] += -jnp.sum(preds * bows_ref[...], axis=-1, keepdims=True)


# ----------------------------------------------------------------------------
# Wrapper
# ----------------------------------------------------------------------------
def etm_forward(bows, params, *, tb=128, tv=2048, tv_beta=4096):
    """Returns (recon_loss, kld_theta), matching ETM.forward(bows) in eval mode."""
    B, V = bows.shape
    D = params["w1"].shape[1]
    E = params["rho_ev"].shape[0]
    K = params["wmu"].shape[1]
    f32, bf16 = jnp.float32, jnp.bfloat16

    tb = min(tb, B)
    tv = min(tv, V)
    tv_beta = min(tv_beta, V)
    assert B % tb == 0 and V % tv == 0 and V % tv_beta == 0
    nb, nv, nvb = B // tb, V // tv, V // tv_beta

    # Tiny per-document scale precomputed outside the V-tiled loop.
    inv_rowsum = (1.0 / jnp.sum(bows, axis=1, keepdims=True)).astype(f32)

    # Pre-cast the streamed / MXU-side weights to bf16 once (HBM bytes and
    # double-buffered VMEM tile footprint halved, no per-tile VPU cast).
    w1_bf = params["w1"].astype(bf16)                               # (V, D)
    w2_bf = params["w2"].astype(bf16)                               # (D, D)
    rho_bf = params["rho_ev"].astype(bf16)                          # (E, V)
    wt_bf = params["wt_ke"].astype(bf16)                            # (K, E)
    wcat_bf = jnp.concatenate([params["wmu"], params["wls"]],
                              axis=1).astype(bf16)                  # (D, 2K)
    bcat = jnp.concatenate([params["bmu"], params["bls"]], axis=1)  # (1, 2K)

    # ---------------- encoder ----------------
    theta, kld_row = pl.pallas_call(
        functools.partial(encode_kernel, num_topics=K),
        out_shape=(jax.ShapeDtypeStruct((B, K), f32),
                   jax.ShapeDtypeStruct((B, 1), f32)),
        grid=(nb, nv),
        in_specs=[
            pl.BlockSpec((tb, tv), lambda b, v: (b, v)),    # bows tile (f32)
            pl.BlockSpec((tb, 1), lambda b, v: (b, 0)),     # 1/rowsum
            pl.BlockSpec((tv, D), lambda b, v: (v, 0)),     # W1 tile (bf16)
            pl.BlockSpec((1, D), lambda b, v: (0, 0)),      # b1
            pl.BlockSpec((D, D), lambda b, v: (0, 0)),      # W2 (bf16)
            pl.BlockSpec((1, D), lambda b, v: (0, 0)),      # b2
            pl.BlockSpec((D, 2 * K), lambda b, v: (0, 0)),  # [Wmu|Wls] (bf16)
            pl.BlockSpec((1, 2 * K), lambda b, v: (0, 0)),  # [bmu|bls]
        ],
        out_specs=(pl.BlockSpec((tb, K), lambda b, v: (b, 0)),
                   pl.BlockSpec((tb, 1), lambda b, v: (b, 0))),
        scratch_shapes=[pltpu.VMEM((tb, D), f32)],
        compiler_params=pltpu.CompilerParams(
            dimension_semantics=("parallel", "arbitrary"),
            vmem_limit_bytes=VMEM_LIMIT_BYTES),
        cost_estimate=pl.CostEstimate(
            flops=2 * B * V * D + 2 * B * D * D + 4 * B * D * K,
            transcendentals=2 * B * K,
            bytes_accessed=(4 * B * V + 4 * B + 2 * nb * V * D
                            + 2 * D * D + 2 * 2 * D * K
                            + 4 * (2 * D + 2 * K) + 4 * B * K + 4 * B)),
    )(bows, inv_rowsum, w1_bf, params["b1"], w2_bf, params["b2"],
      wcat_bf, bcat)

    # ---------------- beta softmax statistics ----------------
    m_k, l_k = pl.pallas_call(
        beta_stats_kernel,
        out_shape=(jax.ShapeDtypeStruct((K, 1), f32),
                   jax.ShapeDtypeStruct((K, 1), f32)),
        grid=(nvb,),
        in_specs=[
            pl.BlockSpec((K, E), lambda v: (0, 0)),         # wt (bf16)
            pl.BlockSpec((E, tv_beta), lambda v: (0, v)),   # rho tile (bf16)
        ],
        out_specs=(pl.BlockSpec((K, 1), lambda v: (0, 0)),
                   pl.BlockSpec((K, 1), lambda v: (0, 0))),
        compiler_params=pltpu.CompilerParams(
            dimension_semantics=("arbitrary",),
            vmem_limit_bytes=VMEM_LIMIT_BYTES),
        cost_estimate=pl.CostEstimate(
            flops=2 * K * E * V,
            transcendentals=K * V,
            bytes_accessed=2 * K * E + 2 * E * V + 8 * K),
    )(wt_bf, rho_bf)

    # ---------------- beta materialization (once, not per batch tile) --------
    beta = pl.pallas_call(
        beta_write_kernel,
        out_shape=jax.ShapeDtypeStruct((K, V), f32),
        grid=(nvb,),
        in_specs=[
            pl.BlockSpec((K, E), lambda v: (0, 0)),         # wt (bf16)
            pl.BlockSpec((E, tv_beta), lambda v: (0, v)),   # rho tile (bf16)
            pl.BlockSpec((K, 1), lambda v: (0, 0)),         # softmax max
            pl.BlockSpec((K, 1), lambda v: (0, 0)),         # softmax denom
        ],
        out_specs=pl.BlockSpec((K, tv_beta), lambda v: (0, v)),
        compiler_params=pltpu.CompilerParams(
            dimension_semantics=("parallel",),
            vmem_limit_bytes=VMEM_LIMIT_BYTES),
        cost_estimate=pl.CostEstimate(
            flops=2 * K * E * V,
            transcendentals=K * V,
            bytes_accessed=2 * K * E + 2 * E * V + 8 * K + 4 * K * V),
    )(wt_bf, rho_bf, m_k, l_k)

    # ---------------- decode + reconstruction loss ----------------
    recon_row = pl.pallas_call(
        decode_kernel,
        out_shape=jax.ShapeDtypeStruct((B, 1), f32),
        grid=(nb, nv),
        in_specs=[
            pl.BlockSpec((tb, K), lambda b, v: (b, 0)),     # theta (f32)
            pl.BlockSpec((tb, tv), lambda b, v: (b, v)),    # bows tile (f32)
            pl.BlockSpec((K, tv), lambda b, v: (0, v)),     # beta tile (f32)
        ],
        out_specs=pl.BlockSpec((tb, 1), lambda b, v: (b, 0)),
        compiler_params=pltpu.CompilerParams(
            dimension_semantics=("parallel", "arbitrary"),
            vmem_limit_bytes=VMEM_LIMIT_BYTES),
        cost_estimate=pl.CostEstimate(
            flops=2 * B * K * V + 2 * B * V,
            transcendentals=B * V,
            bytes_accessed=4 * B * K + 4 * B * V + 4 * nb * K * V + 4 * B),
    )(theta, bows, beta)

    recon_loss = jnp.mean(recon_row[:, 0])   # aggregate=True
    kld_theta = jnp.mean(kld_row[:, 0])
    return recon_loss, kld_theta


# ----------------------------------------------------------------------------
# Pure-JAX reference (mirrors the PyTorch module, eval mode)
# ----------------------------------------------------------------------------
def etm_reference(bows, p):
    norm = bows / jnp.sum(bows, axis=1, keepdims=True)
    h = jnp.maximum(norm @ p["w1"] + p["b1"], 0.0)
    h = jnp.maximum(h @ p["w2"] + p["b2"], 0.0)
    mu = h @ p["wmu"] + p["bmu"]
    ls = h @ p["wls"] + p["bls"]
    kld = jnp.mean(-0.5 * jnp.sum(1.0 + ls - mu**2 - jnp.exp(ls), axis=-1))
    theta = jax.nn.softmax(mu, axis=-1)
    logits_vk = p["rho_ev"].T @ p["wt_ke"].T        # topic_embed(word_embed): (V, K)
    beta_kv = jax.nn.softmax(logits_vk, axis=0).T   # word_topic_matrix: (K, V)
    res = theta @ beta_kv                           # (B, V)
    preds = jnp.log(res + 1e-6)
    recon = jnp.mean(-jnp.sum(preds * bows, axis=1))
    return recon, kld


# ----------------------------------------------------------------------------
if __name__ == "__main__":
    # Small-but-multi-tile shapes consistent with the module's constructor args.
    B = 256        # batch of documents
    V = 4096       # vocab_size
    D = 256        # doc_encoder_dim
    E = 128        # word_embed_dim
    K = 64         # num_topics
    TB, TV, TVB = 128, 1024, 2048   # 2x4 encoder/decode grid, 2-step beta grid

    key = jax.random.PRNGKey(0)
    keys = jax.random.split(key, 11)

    def init(k, shape, scale):
        return (scale * jax.random.normal(k, shape)).astype(jnp.float32)

    params = {
        "w1":  init(keys[0], (V, D), 0.05),
        "b1":  init(keys[1], (1, D), 0.01),
        "w2":  init(keys[2], (D, D), 0.05),
        "b2":  init(keys[3], (1, D), 0.01),
        "wmu": init(keys[4], (D, K), 0.05),
        "bmu": init(keys[5], (1, K), 0.01),
        "wls": init(keys[6], (D, K), 0.05),
        "bls": init(keys[7], (1, K), 0.01),
        "rho_ev": init(keys[8], (E, V), 0.1),  # word embedding matrix, stored (E, V)
        "wt_ke":  init(keys[9], (K, E), 0.1),  # topic_embed.weight, PyTorch (K, E)
    }

    # Bag-of-words counts: strictly positive so row sums are non-zero.
    bows = jax.random.uniform(keys[10], (B, V), minval=0.5, maxval=5.0,
                              dtype=jnp.float32)

    recon_loss, kld_theta = etm_forward(bows, params, tb=TB, tv=TV, tv_beta=TVB)
    recon_loss, kld_theta = jax.block_until_ready((recon_loss, kld_theta))

    ref_recon, ref_kld = etm_reference(bows, params)
    assert jnp.allclose(recon_loss, ref_recon, rtol=2e-2, atol=2e-2), (
        recon_loss, ref_recon)
    assert jnp.allclose(kld_theta, ref_kld, rtol=2e-2, atol=2e-2), (
        kld_theta, ref_kld)

    print("KERNEL_OK")
</pallas_src>

<mosaic_0001>
module attributes {stable_mosaic.version = 11 : i64} {
  func.func @encode_kernel(%arg0: i32, %arg1: i32, %arg2: memref<128x1024xf32, #tpu.memory_space<vmem>>, %arg3: memref<128x1xf32, #tpu.memory_space<vmem>>, %arg4: memref<1024x256xbf16, #tpu.memory_space<vmem>>, %arg5: memref<1x256xf32, #tpu.memory_space<vmem>>, %arg6: memref<256x256xbf16, #tpu.memory_space<vmem>>, %arg7: memref<1x256xf32, #tpu.memory_space<vmem>>, %arg8: memref<256x128xbf16, #tpu.memory_space<vmem>>, %arg9: memref<1x128xf32, #tpu.memory_space<vmem>>, %arg10: memref<128x64xf32, #tpu.memory_space<vmem>>, %arg11: memref<128x1xf32, #tpu.memory_space<vmem>>, %arg12: memref<128x256xf32, #tpu.memory_space<vmem>>) attributes {dimension_semantics = [#tpu.dimension_semantics<parallel>, #tpu.dimension_semantics<arbitrary>], iteration_bounds = array<i64: 2, 4>, scalar_prefetch = 0 : i64, scratch_operands = 1 : i64, tpu.core_type = #tpu.core_type<tc>, window_params = [{transform_indices = @transform_0, window_bounds = array<i64: 128, 1024>}, {transform_indices = @transform_1, window_bounds = array<i64: 128, 1>}, {transform_indices = @transform_2, window_bounds = array<i64: 1024, 256>}, {pipeline_mode = #tpu.pipeline_mode<synchronous>, transform_indices = @transform_3, window_bounds = array<i64: 1, 256>}, {pipeline_mode = #tpu.pipeline_mode<synchronous>, transform_indices = @transform_4, window_bounds = array<i64: 256, 256>}, {pipeline_mode = #tpu.pipeline_mode<synchronous>, transform_indices = @transform_5, window_bounds = array<i64: 1, 256>}, {pipeline_mode = #tpu.pipeline_mode<synchronous>, transform_indices = @transform_6, window_bounds = array<i64: 256, 128>}, {pipeline_mode = #tpu.pipeline_mode<synchronous>, transform_indices = @transform_7, window_bounds = array<i64: 1, 128>}, {transform_indices = @transform_8, window_bounds = array<i64: 128, 64>}, {transform_indices = @transform_9, window_bounds = array<i64: 128, 1>}]} {
    %c0_i32 = arith.constant 0 : i32
    %0 = arith.cmpi eq, %arg1, %c0_i32 : i32
    %1 = arith.extui %0 : i1 to i32
    %c0_i32_0 = arith.constant 0 : i32
    %2 = arith.cmpi ne, %1, %c0_i32_0 : i32
    scf.if %2 {
      %cst_11 = arith.constant 0.000000e+00 : f32
      %16 = vector.broadcast %cst_11 : f32 to vector<128x256xf32>
      %c0_12 = arith.constant 0 : index
      %c0_13 = arith.constant 0 : index
      %17 = vector.load %arg12[%c0_12, %c0_13] : memref<128x256xf32, #tpu.memory_space<vmem>>, vector<128x256xf32>
      tpu.vector_store %arg12[%c0_12, %c0_13], %16 {strides = array<i32>} : memref<128x256xf32, #tpu.memory_space<vmem>>, vector<128x256xf32>,
    } else {
    }
    %c0 = arith.constant 0 : index
    %c0_1 = arith.constant 0 : index
    %3 = vector.load %arg2[%c0, %c0_1] : memref<128x1024xf32, #tpu.memory_space<vmem>>, vector<128x1024xf32>
    %c0_2 = arith.constant 0 : index
    %c0_3 = arith.constant 0 : index
    %4 = vector.load %arg3[%c0_2, %c0_3] : memref<128x1xf32, #tpu.memory_space<vmem>>, vector<128x1xf32>
    %5 = vector.broadcast %4 : vector<128x1xf32> to vector<128x1024xf32>
    %6 = arith.mulf %3, %5 : vector<128x1024xf32>
    %7 = arith.truncf %6 : vector<128x1024xf32> to vector<128x1024xbf16>
    %c0_4 = arith.constant 0 : index
    %c0_5 = arith.constant 0 : index
    %8 = vector.load %arg12[%c0_4, %c0_5] : memref<128x256xf32, #tpu.memory_space<vmem>>, vector<128x256xf32>
    %c0_6 = arith.constant 0 : index
    %c0_7 = arith.constant 0 : index
    %9 = vector.load %arg4[%c0_6, %c0_7] : memref<1024x256xbf16, #tpu.memory_space<vmem>>, vector<1024x256xbf16>
    %cst = arith.constant dense<0.000000e+00> : vector<128x256xf32>
    %10 = tpu.matmul %7, %9, %cst {dimension_numbers = #tpu.dot_dimension_numbers<[1], [0], [0], [1], [0, 0, 1, 1], [], []>} : vector<128x1024xbf16>, vector<1024x256xbf16>, vector<128x256xf32> -> vector<128x256xf32>
    %11 = arith.addf %8, %10 : vector<128x256xf32>
    %c0_8 = arith.constant 0 : index
    %c0_9 = arith.constant 0 : index
    %12 = vector.load %arg12[%c0_8, %c0_9] : memref<128x256xf32, #tpu.memory_space<vmem>>, vector<128x256xf32>
    tpu.vector_store %arg12[%c0_8, %c0_9], %11 {strides = array<i32>} : memref<128x256xf32, #tpu.memory_space<vmem>>, vector<128x256xf32>,
    %c3_i32 = arith.constant 3 : i32
    %13 = arith.cmpi eq, %arg1, %c3_i32 : i32
    %14 = arith.extui %13 : i1 to i32
    %c0_i32_10 = arith.constant 0 : i32
    %15 = arith.cmpi ne, %14, %c0_i32_10 : i32
    scf.if %15 {
      %c0_11 = arith.constant 0 : index
      %c0_12 = arith.constant 0 : index
      %16 = vector.load %arg12[%c0_11, %c0_12] : memref<128x256xf32, #tpu.memory_space<vmem>>, vector<128x256xf32>
      %c0_13 = arith.constant 0 : index
      %c0_14 = arith.constant 0 : index
      %17 = vector.load %arg5[%c0_13, %c0_14] : memref<1x256xf32, #tpu.memory_space<vmem>>, vector<1x256xf32>
      %18 = vector.broadcast %17 : vector<1x256xf32> to vector<128x256xf32>
      %19 = arith.addf %16, %18 : vector<128x256xf32>
      %cst_15 = arith.constant 0.000000e+00 : f32
      %20 = vector.broadcast %cst_15 : f32 to vector<128x256xf32>
      %21 = arith.maximumf %19, %20 : vector<128x256xf32>
      %22 = arith.truncf %21 : vector<128x256xf32> to vector<128x256xbf16>
      %c0_16 = arith.constant 0 : index
      %c0_17 = arith.constant 0 : index
      %23 = vector.load %arg6[%c0_16, %c0_17] : memref<256x256xbf16, #tpu.memory_space<vmem>>, vector<256x256xbf16>
      %cst_18 = arith.constant dense<0.000000e+00> : vector<128x256xf32>
      %24 = tpu.matmul %22, %23, %cst_18 {dimension_numbers = #tpu.dot_dimension_numbers<[1], [0], [0], [1], [0, 0, 1, 1], [], []>} : vector<128x256xbf16>, vector<256x256xbf16>, vector<128x256xf32> -> vector<128x256xf32>
      %c0_19 = arith.constant 0 : index
      %c0_20 = arith.constant 0 : index
      %25 = vector.load %arg7[%c0_19, %c0_20] : memref<1x256xf32, #tpu.memory_space<vmem>>, vector<1x256xf32>
      %26 = vector.broadcast %25 : vector<1x256xf32> to vector<128x256xf32>
      %27 = arith.addf %24, %26 : vector<128x256xf32>
      %cst_21 = arith.constant 0.000000e+00 : f32
      %28 = vector.broadcast %cst_21 : f32 to vector<128x256xf32>
      %29 = arith.maximumf %27, %28 : vector<128x256xf32>
      %30 = arith.truncf %29 : vector<128x256xf32> to vector<128x256xbf16>
      %c0_22 = arith.constant 0 : index
      %c0_23 = arith.constant 0 : index
      %31 = vector.load %arg8[%c0_22, %c0_23] : memref<256x128xbf16, #tpu.memory_space<vmem>>, vector<256x128xbf16>
      %cst_24 = arith.constant dense<0.000000e+00> : vector<128x128xf32>
      %32 = tpu.matmul %30, %31, %cst_24 {dimension_numbers = #tpu.dot_dimension_numbers<[1], [0], [0], [1], [0, 0, 1, 1], [], []>} : vector<128x256xbf16>, vector<256x128xbf16>, vector<128x128xf32> -> vector<128x128xf32>
      %c0_25 = arith.constant 0 : index
      %c0_26 = arith.constant 0 : index
      %33 = vector.load %arg9[%c0_25, %c0_26] : memref<1x128xf32, #tpu.memory_space<vmem>>, vector<1x128xf32>
      %34 = vector.broadcast %33 : vector<1x128xf32> to vector<128x128xf32>
      %35 = arith.addf %32, %34 : vector<128x128xf32>
      %36 = vector.extract_strided_slice %35 {offsets = [0, 0], sizes = [128, 64], strides = [1, 1]} : vector<128x128xf32> to vector<128x64xf32>
      %37 = vector.extract_strided_slice %35 {offsets = [0, 64], sizes = [128, 64], strides = [1, 1]} : vector<128x128xf32> to vector<128x64xf32>
      %cst_27 = arith.constant 1.000000e+00 : f32
      %38 = vector.broadcast %cst_27 : f32 to vector<128x64xf32>
      %39 = arith.addf %38, %37 : vector<128x64xf32>
      %40 = arith.mulf %36, %36 : vector<128x64xf32>
      %41 = arith.subf %39, %40 : vector<128x64xf32>
      %42 = math.exp %37 : vector<128x64xf32>
      %43 = arith.subf %41, %42 : vector<128x64xf32>
      %cst_28 = arith.constant dense<0.000000e+00> : vector<128xf32>
      %44 = vector.multi_reduction <add>, %43, %cst_28 [1] : vector<128x64xf32> to vector<128xf32>
      %45 = vector.shape_cast %44 : vector<128xf32> to vector<128x1xf32>
      %cst_29 = arith.constant -5.000000e-01 : f32
      %46 = vector.broadcast %cst_29 : f32 to vector<128x1xf32>
      %47 = arith.mulf %46, %45 : vector<128x1xf32>
      %c0_30 = arith.constant 0 : index
      %c0_31 = arith.constant 0 : index
      %48 = vector.load %arg11[%c0_30, %c0_31] : memref<128x1xf32, #tpu.memory_space<vmem>>, vector<128x1xf32>
      tpu.vector_store %arg11[%c0_30, %c0_31], %47 {strides = array<i32>} : memref<128x1xf32, #tpu.memory_space<vmem>>, vector<128x1xf32>,
      %cst_32 = arith.constant dense<0xFF800000> : vector<128xf32>
      %49 = vector.multi_reduction <maximumf>, %36, %cst_32 [1] : vector<128x64xf32> to vector<128xf32>
      %50 = vector.shape_cast %49 : vector<128xf32> to vector<128x1xf32>
      %51 = vector.broadcast %50 : vector<128x1xf32> to vector<128x64xf32>
      %52 = arith.subf %36, %51 : vector<128x64xf32>
      %53 = math.exp %52 : vector<128x64xf32>
      %cst_33 = arith.constant dense<0.000000e+00> : vector<128xf32>
      %54 = vector.multi_reduction <add>, %53, %cst_33 [1] : vector<128x64xf32> to vector<128xf32>
      %55 = vector.shape_cast %54 : vector<128xf32> to vector<128x1xf32>
      %56 = tpu.reciprocal %55 {approx = true} : vector<128x1xf32> -> vector<128x1xf32>
      %57 = vector.broadcast %56 : vector<128x1xf32> to vector<128x64xf32>
      %58 = arith.mulf %53, %57 : vector<128x64xf32>
      %c0_34 = arith.constant 0 : index
      %c0_35 = arith.constant 0 : index
      %59 = vector.load %arg10[%c0_34, %c0_35] : memref<128x64xf32, #tpu.memory_space<vmem>>, vector<128x64xf32>
      tpu.vector_store %arg10[%c0_34, %c0_35], %58 {strides = array<i32>} : memref<128x64xf32, #tpu.memory_space<vmem>>, vector<128x64xf32>,
    } else {
    }
    return
  }
  func.func @transform_0(%arg0: i32, %arg1: i32) -> (i32, i32) {
    %c0_i32 = arith.constant 0 : i32
    return %arg0, %arg1 : i32, i32
  }
  func.func @transform_1(%arg0: i32, %arg1: i32) -> (i32, i32) {
    %c0_i32 = arith.constant 0 : i32
    %c0_i32_0 = arith.constant 0 : i32
    return %arg0, %c0_i32 : i32, i32
  }
  func.func @transform_2(%arg0: i32, %arg1: i32) -> (i32, i32) {
    %c0_i32 = arith.constant 0 : i32
    %c0_i32_0 = arith.constant 0 : i32
    return %arg1, %c0_i32 : i32, i32
  }
  func.func @transform_3(%arg0: i32, %arg1: i32) -> (i32, i32) {
    %c0_i32 = arith.constant 0 : i32
    %c0_i32_0 = arith.constant 0 : i32
    %c0_i32_1 = arith.constant 0 : i32
    return %c0_i32, %c0_i32_0 : i32, i32
  }
  func.func @transform_4(%arg0: i32, %arg1: i32) -> (i32, i32) {
    %c0_i32 = arith.constant 0 : i32
    %c0_i32_0 = arith.constant 0 : i32
    %c0_i32_1 = arith.constant 0 : i32
    return %c0_i32, %c0_i32_0 : i32, i32
  }
  func.func @transform_5(%arg0: i32, %arg1: i32) -> (i32, i32) {
    %c0_i32 = arith.constant 0 : i32
    %c0_i32_0 = arith.constant 0 : i32
    %c0_i32_1 = arith.constant 0 : i32
    return %c0_i32, %c0_i32_0 : i32, i32
  }
  func.func @transform_6(%arg0: i32, %arg1: i32) -> (i32, i32) {
    %c0_i32 = arith.constant 0 : i32
    %c0_i32_0 = arith.constant 0 : i32
    %c0_i32_1 = arith.constant 0 : i32
    return %c0_i32, %c0_i32_0 : i32, i32
  }
  func.func @transform_7(%arg0: i32, %arg1: i32) -> (i32, i32) {
    %c0_i32 = arith.constant 0 : i32
    %c0_i32_0 = arith.constant 0 : i32
    %c0_i32_1 = arith.constant 0 : i32
    return %c0_i32, %c0_i32_0 : i32, i32
  }
  func.func @transform_8(%arg0: i32, %arg1: i32) -> (i32, i32) {
    %c0_i32 = arith.constant 0 : i32
    %c0_i32_0 = arith.constant 0 : i32
    return %arg0, %c0_i32 : i32, i32
  }
  func.func @transform_9(%arg0: i32, %arg1: i32) -> (i32, i32) {
    %c0_i32 = arith.constant 0 : i32
    %c0_i32_0 = arith.constant 0 : i32
    return %arg0, %c0_i32 : i32, i32
  }
}

</mosaic_0001>

<bundles_post_ra>
// kernel: tpu_custom_call.1
= control target key start
LH: loop header
LB: loop body
LE: loop exit
PB: predicated region body
PF: predicated region fallthrough
CT: control target
= control target key end

     0   :  { %s6468_s0 = inlined_call_operand.hbm [shape: f32[256,4096], index: 0, kind: input, shape index: {}]   ;;  %s6469_s1 = inlined_call_operand.vmem [shape: f32[256,1], index: 1, kind: input, shape index: {}]   ;;  %s6470_s2 = inlined_call_operand.hbm [shape: bf16[4096,256], index: 2, kind: input, shape index: {}]   ;;  %s6471_s3 = inlined_call_operand.hbm [shape: f32[1,256], index: 3, kind: input, shape index: {}]   ;;  %s6472_s4 = inlined_call_operand.hbm [shape: bf16[256,256], index: 4, kind: input, shape index: {}]   ;;  %s6473_s5 = inlined_call_operand.hbm [shape: f32[1,256], index: 5, kind: input, shape index: {}]   ;;  %s6474_s6 = inlined_call_operand.hbm [shape: bf16[256,128], index: 6, kind: input, shape index: {}]   ;;  %s6475_s7 = inlined_call_operand.hbm [shape: f32[1,128], index: 7, kind: input, shape index: {}]   ;;  %s6476_s8 = inlined_call_operand.vmem [shape: f32[256,64], index: 8, kind: output, shape index: {0}]   ;;  %s6477_s9 = inlined_call_operand.vmem [shape: f32[256,1], index: 9, kind: output, shape index: {1}]  }
   0x1   :  { %6498 = sst [smem:[#allocation30_spill]] %s6468_s0 }
   0x2   :  { %6499 = sst [smem:[#allocation31_spill]] %s6469_s1 }
   0x3   :  { %6500 = sst [smem:[#allocation32_spill]] %s6470_s2 }
   0x4   :  { %6501 = sst [smem:[#allocation33_spill]] %s6471_s3 }
   0x5   :  { %6502 = sst [smem:[#allocation34_spill]] %s6472_s4 }
   0x6   :  { %6503 = sst [smem:[#allocation35_spill]] %s6473_s5 }
   0x7   :  { %6504 = sst [smem:[#allocation36_spill]] %s6474_s6 }
   0x8   :  { %6505 = sst [smem:[#allocation37_spill]] %s6476_s8 }
   0x9   :  { %6506 = sst [smem:[#allocation38_spill]] %s6477_s9 }
   0xa   :  { %15 = vsyncpa [#allocation4], 0 }
   0xb   :  { %17 = vsyncpa [#allocation4 + $0x1], 0 }
   0xc   :  { %18 = vsyncpa [#allocation6], 0 }
   0xd   :  { %20 = vsyncpa [#allocation6 + $0x1], 0 }
   0xe   :  { %21 = vsyncpa [#allocation9], 0 }
   0xf   :  { %22 = vsyncpa [#allocation12], 0  ;;  %s4971_s30 = smov 0   ;;  %s4973_s10 = smov 0  }
  0x10   :  { %s4975_s11 = smov 0   ;;  %s4977_s12 = smov 0  }
  0x11   :  { %s4979_s13 = smov 0   ;;  %s4981_s14 = smov 0  }
  0x12   :  { %s4983_s15 = smov 0   ;;  %s4985_s16 = smov 0  }
  0x13   :  { %s4987_s17 = smov 0   ;;  %s4989_s18 = smov 0  }
  0x14   :  { %s4991_s19 = smov 0  }
  0x15 LB: > { %6507 = sst [smem:[#allocation19_spill]] %s4863_s30  ;;  %s6478_s20 = sadd.s32 4294967295, %s4903_s19   ;;  %s4903_s19 = sphi %s4991_s19, %s28_s19   ;;  %s4899_s18 = sphi %s4989_s18, %s6584_s18   ;;  %s4895_s17 = sphi %s4987_s17, %s6583_s17   ;;  %s4891_s16 = sphi %s4985_s16, %s6582_s16   ;;  %s4887_s15 = sphi %s4983_s15, %s6581_s15   ;;  %s4883_s14 = sphi %s4981_s14, %s6580_s14   ;;  %s4879_s13 = sphi %s4979_s13, %s6579_s13   ;;  %s4875_s12 = sphi %s4977_s12, %s6578_s12   ;;  %s4871_s11 = sphi %s4975_s11, %s6577_s11   ;;  %s4867_s10 = sphi %s4973_s10, %s6576_s10   ;;  %s4863_s30 = sphi %s4971_s30, %s6575_s30  }
  0x16   : > { %6508 = sst [smem:[#allocation20_spill]] %s4887_s15  ;;  %p3709_p0 = scmp.ge.s32.totalorder %s4903_s19, 1 }
  0x17   : > { %6509 = sst [smem:[#allocation21_spill]] %s4891_s16  ;;  %p5030_p1 = scmp.eq.s32.totalorder %s6478_s20, 0 }
  0x18   : > { %p282_p2 = scmp.lt.s32.totalorder %s4903_s19, 9  ;;  %s4905_s23 = smov [#allocation7]  }
  0x19   : > { %s6510_s21 = scalar_select %p5030_p1, 1, 0 }
  0x1a   : > { %p5035_p3 = pnand %p3709_p0, %p282_p2  ;;  %s295_s24 = sshll.u32 %s4905_s23, 4  ;;  %s296_s24 = int_to_ptr.vmem [resolvable:$true] %s295_s24 }
  0x1b   : > { %s4906_s25 = smov [#allocation8]   ;;  %s4907_s28 = smov [#allocation11]  }
  0x1c   : > { %s6511_s22 = scalar_select %p5035_p3, 1, 0 }
  0x1d   : > { %p4107_p4 = pneg %p5035_p3  ;;  %s305_s26 = sshll.u32 %s4906_s25, 4  ;;  %s5047_s26 = int_to_ptr.vmem [resolvable:$true] %s305_s26 }
  0x1e   : > { %6512 = sst [smem:[#allocation22_spill]] %s6511_s22  ;;  %s5049_s29 = sshll.u32 %s4907_s28, 4  ;;  %s330_s29 = int_to_ptr.vmem [resolvable:$true] %s5049_s29 }
  0x1f   : > { %p5043_p5 = pnand %p4107_p4, %p5030_p1  ;;  %s6514_s3 = sld [smem:[#allocation33_spill]] }
  0x21   : > { %p5059_p7 = pneg %p5043_p5 }
  0x25   : > { %s4597_s23 = scalar_lea.hbm %s6514_s3, 32 }
  0x26   : > { %p4598_p6 = scmp.ne.s32.totalorder %s6514_s3, %s4597_s23  ;;  %p4604_p10 = scmp.lt.u32.totalorder %s4597_s23, %s6514_s3 }
  0x28   : > { %p4600_p8 = pnand %p5059_p7, %p4598_p6 }
  0x2a   : > { %p4601_p9 = pneg %p4600_p8 }
  0x2c   : > { %p4606_p11 = pnand %p4604_p10, %p4601_p9 }
  0x2e   : > { %4609 = shalt.err (!%p4606_p11)
}
  0x2f   : > { %s4610_s15 = scalar_lea.vmem %s296_s24, 32  ;;  %p4618_p2 = scmp.lt.s32.totalorder %s296_s24, %s296_s24 }
  0x30   : > { %p4611_p12 = scmp.ne.s32.totalorder %s296_s24, %s4610_s15  ;;  %p4619_p4 = scmp.lt.s32.totalorder %s4610_s15, %s4610_s15 }
  0x32   : > { %p4613_p13 = pnand %p4611_p12, %p5059_p7  ;;  %p4620_p3 = por %p4619_p4, %p4618_p2 }
  0x34   : > { %p4614_p0 = pneg %p4613_p13 }
  0x36   : > { %p4621_p1 = pnand %p4620_p3, %p4614_p0 }
  0x38   : > { %4624 = shalt.err (!%p4621_p1)
}
  0x39   : > { %4110 = dma.hbm_to_vmem [thread:$0]  (!%p5043_p5), %s6514_s3, 32, %s296_s24, [#allocation6]  }
  0x3a   : > { %s6516_s4 = sld [smem:[#allocation34_spill]] }
  0x40   : > { %s4625_s23 = scalar_lea.hbm %s6516_s4, 4096 }
  0x41   : > { %p4626_p6 = scmp.ne.s32.totalorder %s6516_s4, %s4625_s23  ;;  %p4632_p1 = scmp.lt.u32.totalorder %s4625_s23, %s6516_s4 }
  0x43   : > { %p4628_p8 = pnand %p4626_p6, %p5059_p7 }
  0x45   : > { %p4629_p9 = pneg %p4628_p8 }
  0x47   : > { %p4634_p3 = pnand %p4632_p1, %p4629_p9 }
  0x49   : > { %4637 = shalt.err (!%p4634_p3)
}
  0x4a   : > { %s4638_s24 = scalar_lea.vmem %s5047_s26, 4096  ;;  %p4646_p13 = scmp.lt.s32.totalorder %s5047_s26, %s5047_s26 }
  0x4b   : > { %p4639_p10 = scmp.ne.s32.totalorder %s5047_s26, %s4638_s24  ;;  %p4647_p0 = scmp.lt.s32.totalorder %s4638_s24, %s4638_s24 }
  0x4d   : > { %p4641_p11 = pnand %p4639_p10, %p5059_p7  ;;  %p4648_p2 = por %p4647_p0, %p4646_p13 }
  0x4f   : > { %p4642_p12 = pneg %p4641_p11 }
  0x51   : > { %p4649_p4 = pnand %p4648_p2, %p4642_p12 }
  0x53   : > { %4652 = shalt.err (!%p4649_p4)
}
  0x54   : > { %s6484_s16 = smov 128   ;;  %s6485_s22 = smov 8  }
  0x55   : > { %4113 = dma.hbm_to_vmem [thread:$0]  (!%p5043_p5), %s6516_s4, 4096, %s5047_s26, [#allocation9], %s6484_s16, %s6484_s16, %s6485_s22  }
  0x56   : > { %s6517_s6 = sld [smem:[#allocation36_spill]] }
  0x5c   : > { %s4653_s23 = scalar_lea.hbm %s6517_s6, 2048 }
  0x5d   : > { %p4654_p6 = scmp.ne.s32.totalorder %s6517_s6, %s4653_s23  ;;  %p4660_p1 = scmp.lt.u32.totalorder %s4653_s23, %s6517_s6 }
  0x5f   : > { %p4656_p8 = pnand %p4654_p6, %p5059_p7 }
  0x61   : > { %p4657_p9 = pneg %p4656_p8 }
  0x63   : > { %p4662_p3 = pnand %p4660_p1, %p4657_p9 }
  0x65   : > { %4665 = shalt.err (!%p4662_p3)
}
  0x66   : > { %s4666_s8 = scalar_lea.vmem %s330_s29, 2048  ;;  %p4674_p13 = scmp.lt.s32.totalorder %s330_s29, %s330_s29 }
  0x67   : > { %p4667_p10 = scmp.ne.s32.totalorder %s330_s29, %s4666_s8  ;;  %p4675_p0 = scmp.lt.s32.totalorder %s4666_s8, %s4666_s8 }
  0x69   : > { %p4669_p11 = pnand %p4667_p10, %p5059_p7  ;;  %p4676_p2 = por %p4675_p0, %p4674_p13 }
  0x6b   : > { %p4670_p12 = pneg %p4669_p11 }
  0x6d   : > { %p4677_p4 = pnand %p4676_p2, %p4670_p12 }
  0x6f   : > { %4680 = shalt.err (!%p4677_p4)
}
  0x70   : > { %s6487_s26 = smov 64   ;;  %s4911_s9 = smov 4  }
  0x71   : > { %4119 = dma.hbm_to_vmem [thread:$0]  (!%p5043_p5), %s6517_s6, 2048, %s330_s29, [#allocation12], %s6487_s26, %s6487_s26, %s4911_s9  }
  0x72   : > { %s4912_s20 = smov [#allocation10]   ;;  %s4913_s28 = smov [#allocation13]  }
  0x73   : > { %s319_s23 = sshll.u32 %s4912_s20, 4  ;;  %s343_s15 = sshll.u32 %s4913_s28, 4  ;;  %s320_s23 = int_to_ptr.vmem [resolvable:$true] %s319_s23  ;;  %s344_s15 = int_to_ptr.vmem [resolvable:$true] %s343_s15 }
  0x74   : > { %s6518_s5 = sld [smem:[#allocation35_spill]] }
  0x7a   : > { %s4681_s16 = scalar_lea.hbm %s6518_s5, 32 }
  0x7b   : > { %p4682_p6 = scmp.ne.s32.totalorder %s6518_s5, %s4681_s16  ;;  %p4688_p1 = scmp.lt.u32.totalorder %s4681_s16, %s6518_s5 }
  0x7d   : > { %p4684_p8 = pnand %p4682_p6, %p5059_p7 }
  0x7f   : > { %p4685_p9 = pneg %p4684_p8 }
  0x81   : > { %p4690_p3 = pnand %p4688_p1, %p4685_p9 }
  0x83   : > { %4693 = shalt.err (!%p4690_p3)
}
  0x84   : > { %s4694_s29 = scalar_lea.vmem %s320_s23, 32  ;;  %p4702_p13 = scmp.lt.s32.totalorder %s320_s23, %s320_s23 }
  0x85   : > { %p4695_p10 = scmp.ne.s32.totalorder %s320_s23, %s4694_s29  ;;  %p4703_p0 = scmp.lt.s32.totalorder %s4694_s29, %s4694_s29 }
  0x87   : > { %p4697_p11 = pnand %p4695_p10, %p5059_p7  ;;  %p4704_p2 = por %p4703_p0, %p4702_p13 }
  0x89   : > { %p4698_p12 = pneg %p4697_p11 }
  0x8b   : > { %p4705_p4 = pnand %p4704_p2, %p4698_p12 }
  0x8d   : > { %4708 = shalt.err (!%p4705_p4)
}
  0x8e   : > { %4116 = dma.hbm_to_vmem [thread:$0]  (!%p5043_p5), %s6518_s5, 32, %s320_s23, [#allocation9]  }
  0x8f   : > { %s4709_s16 = scalar_lea.hbm %s6475_s7, 16 }
  0x90   : > { %p4710_p6 = scmp.ne.s32.totalorder %s6475_s7, %s4709_s16  ;;  %p4716_p1 = scmp.lt.u32.totalorder %s4709_s16, %s6475_s7 }
  0x92   : > { %p4712_p8 = pnand %p4710_p6, %p5059_p7 }
  0x94   : > { %p4713_p9 = pneg %p4712_p8 }
  0x96   : > { %p4718_p3 = pnand %p4716_p1, %p4713_p9 }
  0x98   : > { %4721 = shalt.err (!%p4718_p3)
}
  0x99   : > { %s4722_s28 = scalar_lea.vmem %s344_s15, 16  ;;  %s4729_s23 = scalar_lea.vmem %s344_s15, 32 }
  0x9a   : > { %p4723_p10 = scmp.ne.s32.totalorder %s344_s15, %s4722_s28  ;;  %p4730_p13 = scmp.lt.s32.totalorder %s344_s15, %s344_s15 }
  0x9b   : > { %p4731_p0 = scmp.lt.s32.totalorder %s4729_s23, %s4722_s28 }
  0x9c   : > { %p4725_p11 = pnand %p4723_p10, %p5059_p7 }
  0x9d   : > { %p4732_p2 = por %p4731_p0, %p4730_p13 }
  0x9e   : > { %p4726_p12 = pneg %p4725_p11 }
  0xa0   : > { %p4733_p4 = pnand %p4732_p2, %p4726_p12 }
  0xa2   : > { %4736 = shalt.err (!%p4733_p4)
}
  0xa3   : > { %4122 = dma.hbm_to_vmem [thread:$0]  (!%p5043_p5), %s6475_s7, 16, %s344_s15, [#allocation12]  }
  0xa4   : > { %s37_s25 = sadd.s32 1, %s4895_s17  ;;  %s40_s27 = sadd.s32 1, %s4899_s18 }
  0xa5   : > { %p38_p7 = scmp.ge.s32.totalorder %s37_s25, 4  ;;  %s49_s29 = sadd.s32 1, %s4883_s14 }
  0xa6   : > { %p56_p6 = scmp.ne.s32.totalorder %s4883_s14, %s4879_s13  ;;  %p6489_p5 = scmp.eq.s32.totalorder %s4903_s19, 0 }
  0xa7   : > { %s6586_s25 = smov (%p38_p7, %s37_s25), 0  ;;  %s6588_s27 = smov (!%p38_p7, %s40_s27), %s4899_s18 }
  0xa8   : > { %s5168_s4 = ssub.s32 %s4895_s17, %s6586_s25  ;;  %p42_p8 = scmp.ge.s32.totalorder %s6588_s27, 2 }
  0xa9   : > { %p62_p9 = scmp.ne.s32.totalorder %s4879_s13, %s4875_s12  ;;  %p5175_p1 = por %p6489_p5, %p56_p6 }
  0xaa   : > { %s6590_s27 = smov (%p42_p8, %s6588_s27), 0  ;;  %p6520_p10 = scmp.ne.s32.totalorder %s6510_s21, 0 }
  0xab   : > { %p6488_p12 = scmp.lt.s32.totalorder %s4903_s19, 8  ;;  %s44_s2 = ssub.s32 %s4899_s18, %s6590_s27 }
  0xac   : > { %p5184_p11 = por %p6520_p10, %p62_p9  ;;  %s354_s30 = sand.u32 1, %s4883_s14  }
  0xad   : > { %s46_s12 = sor.u32 %s5168_s4, %s44_s2  ;;  %s3716_s16 = sshll.u32 %s354_s30, 10 }
  0xae   : > { %s6521_s22 = scalar_select %p5184_p11, 1, 0 }
  0xaf   : > { %p47_p13 = scmp.eq.s32.totalorder %s46_s12, 0  ;;  %s3718_s9 = sshll.u32 %s4895_s17, 3 }
  0xb0   : > { %s3920_s1 = sshll.u32 %s4899_s18, 9  ;;  %s358_s20 = scalar_lea.vmem [#allocation3], %s3716_s16 }
  0xb1   : > { %s5195_s3 = scalar_select %p47_p13, %s4883_s14, %s49_s29  }
  0xb2   : > { %s368_s28 = sshll.u32 %s358_s20, 4  ;;  %s365_s23 = sadd.s32 %s3920_s1, %s3718_s9  ;;  %s5198_s28 = int_to_ptr.vmem [resolvable:$true] %s368_s28 }
  0xb3   : > { %s3720_s24 = sshll.u32 %s365_s23, 7  ;;  %p5204_p0 = pnand %p6488_p12, %p5175_p1 }
  0xb4   : > { %s6523_s0 = sld [smem:[#allocation30_spill]]  ;;  %s5213_s12 = scalar_lea.sflag [#allocation4], %s354_s30 }
  0xb5   : > { %p4739_p4 = pneg %p5204_p0 }
  0xba   : > { %s5211_s29 = scalar_lea.hbm %s6523_s0, %s3720_s24  ;;  %s4742_s9 = scalar_lea.hbm %s6523_s0, 131072 }
  0xbb   : > { %s4737_s16 = scalar_lea.hbm %s5211_s29, 16384  ;;  %p4743_p8 = scmp.lt.u32.totalorder %s5211_s29, %s6523_s0 }
  0xbc   : > { %p4738_p2 = scmp.ne.s32.totalorder %s5211_s29, %s4737_s16  ;;  %p4744_p9 = scmp.lt.u32.totalorder %s4742_s9, %s4737_s16 }
  0xbd   : > { %p4746_p13 = scmp.lt.u32.totalorder %s4737_s16, %s5211_s29 }
  0xbe   : > { %p4740_p7 = pnand %p4739_p4, %p4738_p2  ;;  %p4745_p1 = por %p4744_p9, %p4743_p8 }
  0xc0   : > { %p4741_p6 = pneg %p4740_p7  ;;  %p4747_p12 = por %p4746_p13, %p4745_p1 }
  0xc2   : > { %p4748_p5 = pnand %p4747_p12, %p4741_p6 }
  0xc4   : > { %4751 = shalt.err (!%p4748_p5)
}
  0xc5   : > { %s4752_s30 = scalar_lea.vmem %s5198_s28, 16384  ;;  %s4914_s23 = smov [#allocation3]  }
  0xc6   : > { %p4753_p2 = scmp.ne.s32.totalorder %s5198_s28, %s4752_s30  ;;  %s4757_s24 = sshll.u32 %s4914_s23, 4  ;;  %s4758_s24 = int_to_ptr.vmem [resolvable:$false] %s4757_s24 }
  0xc7   : > { %s4759_s2 = scalar_lea.vmem %s4758_s24, 32768  ;;  %p4760_p11 = scmp.lt.s32.totalorder %s5198_s28, %s4758_s24 }
  0xc8   : > { %p4755_p7 = pnand %p4753_p2, %p4739_p4  ;;  %p4761_p8 = scmp.lt.s32.totalorder %s4759_s2, %s4752_s30 }
  0xca   : > { %p4756_p3 = pneg %p4755_p7  ;;  %p4762_p9 = por %p4761_p8, %p4760_p11 }
  0xcc   : > { %p4763_p1 = pnand %p4762_p9, %p4756_p3 }
  0xce   : > { %4766 = shalt.err (!%p4763_p1)
}
  0xcf   : > { %s4915_s16 = smov 4096   ;;  %s6524_s15 = sld [smem:[#allocation19_spill]] }
  0xd0   : > { %s4916_s26 = smov 1024   ;;  %s6525_s9 = smov 64  }
  0xd1   : > { %4126 = dma.hbm_to_vmem [thread:$0]  (!%p5204_p0), %s5211_s29, 16384, %s5198_s28, %s5213_s12, %s4915_s16, %s4916_s26, %s6525_s9  }
  0xd2   : > { %s101_s1 = sadd.s32 1, %s4871_s11  ;;  %p108_p5 = scmp.ne.s32.totalorder %s4871_s11, %s4867_s10 }
  0xd3   : > { %p6526_p3 = scmp.eq.s32.totalorder %s5168_s4, 0  ;;  %p6527_p11 = scmp.eq.s32.totalorder %s4903_s19, 0 }
  0xd4   : > { %s387_s30 = sand.u32 1, %s4903_s19   ;;  %s389_s23 = sand.u32 1, %s4871_s11  }
  0xd5   : > { %s5248_s20 = scalar_select %p6526_p3, %s4871_s11, %s101_s1  }
  0xd6   : > { %p110_p12 = por %p108_p5, %p6527_p11  ;;  %p114_p4 = scmp.ne.s32.totalorder %s4867_s10, %s6524_s15 }
  0xd7   : > { %s3721_s2 = sshll.u32 %s389_s23, 10  ;;  %s3922_s0 = sshll.u32 %s4895_s17, 14 }
  0xd8   : > { %p5258_p6 = por %p114_p4, %p6520_p10  ;;  %s6529_s28 = sld [smem:[#allocation32_spill]] }
  0xd9   : > { %s391_s4 = scalar_lea.vmem [#allocation5], %s3721_s2  ;;  %p6530_p0 = scmp.lt.s32.totalorder %s4903_s19, 8 }
  0xda   : > { %s399_s12 = sshll.u32 %s391_s4, 4  ;;  %s5276_s15 = scalar_lea.sflag [#allocation6], %s387_s30  ;;  %s5274_s12 = int_to_ptr.vmem [resolvable:$true] %s399_s12 }
  0xdb   : > { %p5270_p13 = pnand %p6530_p0, %p110_p12 }
  0xdd   : > { %p4769_p2 = pneg %p5270_p13 }
  0xde   : > { %s5266_s29 = scalar_lea.hbm %s6529_s28, %s3922_s0  ;;  %s4772_s9 = scalar_lea.hbm %s6529_s28, 65536 }
  0xdf   : > { %s4767_s5 = scalar_lea.hbm %s5266_s29, 16384  ;;  %p4773_p9 = scmp.lt.u32.totalorder %s5266_s29, %s6529_s28 }
  0xe0   : > { %p4768_p10 = scmp.ne.s32.totalorder %s5266_s29, %s4767_s5  ;;  %p4774_p1 = scmp.lt.u32.totalorder %s4772_s9, %s4767_s5 }
  0xe1   : > { %p4776_p3 = scmp.lt.u32.totalorder %s4767_s5, %s5266_s29 }
  0xe2   : > { %p4770_p7 = pnand %p4769_p2, %p4768_p10  ;;  %p4775_p5 = por %p4774_p1, %p4773_p9 }
  0xe4   : > { %p4771_p8 = pneg %p4770_p7  ;;  %p4777_p11 = por %p4776_p3, %p4775_p5 }
  0xe6   : > { %p4778_p12 = pnand %p4777_p11, %p4771_p8 }
  0xe8   : > { %4781 = shalt.err (!%p4778_p12)
}
  0xe9   : > { %s4782_s30 = scalar_lea.vmem %s5274_s12, 16384  ;;  %s4917_s2 = smov [#allocation5]  }
  0xea   : > { %p4783_p4 = scmp.ne.s32.totalorder %s5274_s12, %s4782_s30  ;;  %s4787_s8 = sshll.u32 %s4917_s2, 4  ;;  %s4788_s8 = int_to_ptr.vmem [resolvable:$false] %s4787_s8 }
  0xeb   : > { %s4789_s4 = scalar_lea.vmem %s4788_s8, 32768  ;;  %p4790_p7 = scmp.lt.s32.totalorder %s5274_s12, %s4788_s8 }
  0xec   : > { %p4785_p0 = pnand %p4783_p4, %p4769_p2  ;;  %p4791_p9 = scmp.lt.s32.totalorder %s4789_s4, %s4782_s30 }
  0xee   : > { %p4786_p10 = pneg %p4785_p0  ;;  %p4792_p1 = por %p4791_p9, %p4790_p7 }
  0xf0   : > { %p4793_p5 = pnand %p4792_p1, %p4786_p10 }
  0xf2   : > { %4796 = shalt.err (!%p4793_p5)
}
  0xf3   : > { %s6532_s5 = smov 8   ;;  %s6533_s0 = smov 128  }
  0xf4   : > { %4129 = dma.hbm_to_vmem [thread:$0]  (!%p5270_p13), %s5266_s29, 16384, %s5274_s12, %s5276_s15, %s6533_s0, %s6533_s0, %s6532_s5  }
  0xf5   : > { %s6534_s26 = sld [smem:[#allocation22_spill]] }
  0xfb   : > { %p6535_p2 = scmp.ne.s32.totalorder %s6534_s26, 0 }
  0xfd   : > { %411 = sbr.rel (%p6535_p2) target bundleno = 2100 (0x834), region = 52 }
 0x104   : > { %s413_s9 = sand.u32 1, %s4879_s13   ;;  %p6536_p8 = scmp.ne.s32.totalorder %s6521_s22, 0 }
 0x105   : > { %s3726_s1 = sshll.u32 %s413_s9, 10  ;;  %s414_s23 = scalar_lea.sflag [#allocation4], %s413_s9 }
 0x106   : > { %s5310_s30 = scalar_lea.vmem [#allocation3], %s3726_s1 }
 0x107   : > { %4842 = dma.done.wait (%p6536_p8), %s414_s23, 16384  }
 0x108   : > { %4844 = vsyncadd (%p6536_p8), %s414_s23, 4294950912  ;;  %s6537_s16 = sadd.s32 4294967295, %s4903_s19   ;;  %s424_s12 = sand.u32 1, %s4867_s10  }
 0x109   : > { %s422_s29 = sand.u32 1, %s6537_s16   ;;  %s3727_s15 = sshll.u32 %s424_s12, 10 }
 0x10a   : > { %s423_s2 = scalar_lea.sflag [#allocation6], %s422_s29  ;;  %s5319_s8 = scalar_lea.vmem [#allocation5], %s3727_s15 }
 0x10b   : > { %4846 = dma.done.wait (%p5258_p6), %s423_s2, 16384  }
 0x10c   : > { %4848 = vsyncadd (%p5258_p6), %s423_s2, 4294950912  ;;  %p6538_p13 = scmp.ne.s32.totalorder %s6510_s21, 0 }
 0x10e   : > { %4850 = dma.done.wait (%p6538_p13), [#allocation6], 32  }
 0x10f   : > { %4852 = vsyncadd (%p6538_p13), [#allocation6], 4294967264 }
 0x110   : > { %4854 = dma.done.wait (%p6538_p13), [#allocation9], 4128  }
 0x111   : > { %4856 = vsyncadd (%p6538_p13), [#allocation9], 4294963168 }
 0x112   : > { %4858 = dma.done.wait (%p6538_p13), [#allocation12], 2064  }
 0x113   : > { %4860 = vsyncadd (%p6538_p13), [#allocation12], 4294965232  ;;  %s6539_s22 = sld [smem:[#allocation21_spill]]  ;;  %s6540_s26 = sld [smem:[#allocation31_spill]] }
 0x114   : > { %s6541_s16 = sld [smem:[#allocation37_spill]]  ;;  %s6542_s2 = sld [smem:[#allocation38_spill]] }
 0x115   : > { %s6543_s6 = sld [smem:[#allocation20_spill]] }
 0x119   : > { %s3733_s24 = sshll.u32 %s6539_s22, 4 }
 0x11a   : > { %p499_p6 = scmp.lt.s32.totalorder %s3733_s24, 31 }
 0x11b   : > { %p3739_p3 = scmp.ne.s32.totalorder %s6543_s6, 0 }
 0x11c   : > { %s6592_s24 = smov (!%p499_p6, %s3733_s24), 31  ;;  %v4918_v0 = vmov (!%p3739_p3), 0.0  }
 0x11d   : > { %s3734_s4 = sshll.u32 %s6592_s24, 3  ;;  %521 = sbr.rel (%p3739_p3) target bundleno = 301 (0x12d), region = 84  ;;  %522 = vst [vmem:[#allocation2] sm:$0xff] (!%p3739_p3), %v4918_v0  ;;  %523 = vst [vmem:[#allocation2 + $0x8] sm:$0xff] (!%p3739_p3), %v4918_v0 }
 0x11e   : > { %s5341_s9 = scalar_lea.vmem %s6540_s26, %s3734_s4  ;;  %s5346_s29 = scalar_lea.vmem %s6541_s16, %s3734_s4  ;;  %524 = vst [vmem:[#allocation2 + $0x10] sm:$0xff] (!%p3739_p3), %v4918_v0  ;;  %525 = vst [vmem:[#allocation2 + $0x18] sm:$0xff] (!%p3739_p3), %v4918_v0 }
 0x11f   : > { %s5351_s21 = scalar_lea.vmem %s6542_s2, %s3734_s4  ;;  %526 = vst [vmem:[#allocation2 + $0x20] sm:$0xff] (!%p3739_p3), %v4918_v0  ;;  %527 = vst [vmem:[#allocation2 + $0x28] sm:$0xff] (!%p3739_p3), %v4918_v0 }
 0x120   : > { %528 = vst [vmem:[#allocation2 + $0x30] sm:$0xff] (!%p3739_p3), %v4918_v0  ;;  %529 = vst [vmem:[#allocation2 + $0x38] sm:$0xff] (!%p3739_p3), %v4918_v0 }
 0x121   : > { %530 = vst [vmem:[#allocation2 + $0x40] sm:$0xff] (!%p3739_p3), %v4918_v0  ;;  %531 = vst [vmem:[#allocation2 + $0x48] sm:$0xff] (!%p3739_p3), %v4918_v0 }
 0x122   : > { %532 = vst [vmem:[#allocation2 + $0x50] sm:$0xff] (!%p3739_p3), %v4918_v0  ;;  %533 = vst [vmem:[#allocation2 + $0x58] sm:$0xff] (!%p3739_p3), %v4918_v0 }
 0x123   : > { %534 = vst [vmem:[#allocation2 + $0x60] sm:$0xff] (!%p3739_p3), %v4918_v0  ;;  %535 = vst [vmem:[#allocation2 + $0x68] sm:$0xff] (!%p3739_p3), %v4918_v0 }
 0x124   : > { %536 = vst [vmem:[#allocation2 + $0x70] sm:$0xff] %v4918_v0  ;;  %537 = vst [vmem:[#allocation2 + $0x78] sm:$0xff] %v4918_v0 }
 0x125   : > { %538 = vst [vmem:[#allocation2 + $0x80] sm:$0xff] %v4918_v0  ;;  %539 = vst [vmem:[#allocation2 + $0x88] sm:$0xff] %v4918_v0 }
 0x126   : > { %540 = vst [vmem:[#allocation2 + $0x90] sm:$0xff] %v4918_v0  ;;  %541 = vst [vmem:[#allocation2 + $0x98] sm:$0xff] %v4918_v0 }
 0x127   : > { %542 = vst [vmem:[#allocation2 + $0xa0] sm:$0xff] %v4918_v0  ;;  %543 = vst [vmem:[#allocation2 + $0xa8] sm:$0xff] %v4918_v0 }
 0x128   : > { %544 = vst [vmem:[#allocation2 + $0xb0] sm:$0xff] %v4918_v0  ;;  %545 = vst [vmem:[#allocation2 + $0xb8] sm:$0xff] %v4918_v0 }
 0x129   : > { %546 = vst [vmem:[#allocation2 + $0xc0] sm:$0xff] %v4918_v0  ;;  %547 = vst [vmem:[#allocation2 + $0xc8] sm:$0xff] %v4918_v0 }
 0x12a   : > { %548 = vst [vmem:[#allocation2 + $0xd0] sm:$0xff] %v4918_v0  ;;  %549 = vst [vmem:[#allocation2 + $0xd8] sm:$0xff] %v4918_v0 }
 0x12b   : > { %550 = vst [vmem:[#allocation2 + $0xe0] sm:$0xff] %v4918_v0  ;;  %551 = vst [vmem:[#allocation2 + $0xe8] sm:$0xff] %v4918_v0 }
 0x12c   : > { %552 = vst [vmem:[#allocation2 + $0xf0] sm:$0xff] %v4918_v0  ;;  %553 = vst [vmem:[#allocation2 + $0xf8] sm:$0xff] %v4918_v0 }
 0x12d PF: > { %v684_v1 = vld [vmem:[%s5341_s9 + $0x10] sm:$0xff]  ;;  %v682_v2 = vld [vmem:[%s5341_s9] sm:$0xff]  ;;  %v4919_v3 = vmov 0   ;;  %v685_v4 = vld [vmem:[%s5341_s9 + $0x18] sm:$0xff]  ;;  %s6574_s6 = sld [smem:[#allocation20_spill]] }
 0x12e   : > { %4244 = vset.pattern.permute.xlu1 %v4919_v3  ;;  %4243 = vset.pattern.permute.xlu0 %v4919_v3  ;;  %v683_v5 = vld [vmem:[%s5341_s9 + $0x8] sm:$0xff]  ;;  %v686_v7 = vld [vmem:[%s5341_s9 + $0x20] sm:$0xff]  ;;  %v4251_v12 = vld [vmem:[%s5319_s8 + $0x14] ss:$8 sps:$4 sm:$0xff]  }
 0x12f   : > { %710 = vperm.xlu1 %4244, %v684_v1   ;;  %700 = vperm.xlu0 %4243, %v682_v2   ;;  %v687_v6 = vld [vmem:[%s5341_s9 + $0x28] sm:$0xff]  ;;  %v689_v13 = vld [vmem:[%s5341_s9 + $0x38] sm:$0xff]  ;;  %v688_v14 = vld [vmem:[%s5341_s9 + $0x30] sm:$0xff] }
 0x130   : > { %v4245_v8 = vld [vmem:[%s5319_s8 + $0x4] ss:$8 sps:$4 sm:$0xff]   ;;  %v4249_v10 = vld [vmem:[%s5319_s8] ss:$8 sps:$4 sm:$0xff]   ;;  %v4253_v15 = vld [vmem:[%s5319_s8 + $0x214] ss:$8 sps:$4 sm:$0xff]  }
 0x131   : > { %v4247_v9 = vld [vmem:[%s5319_s8 + $0x204] ss:$8 sps:$4 sm:$0xff]   ;;  %v4250_v11 = vld [vmem:[%s5319_s8 + $0x200] ss:$8 sps:$4 sm:$0xff]   ;;  %1770 = vmatprep.subr.bf16.mxu1 %v4245_v8  ;;  %v4255_v16 = vld [vmem:[%s5319_s8 + $0x10] ss:$8 sps:$4 sm:$0xff]  }
 0x132   : > { %1996 = vmatprep.subr.bf16.mxu0 %v4247_v9  ;;  %1771 = vmatpush1.bf16.msra.mxu1 %v4249_v10  ;;  %v4256_v17 = vld [vmem:[%s5319_s8 + $0x210] ss:$8 sps:$4 sm:$0xff]   ;;  %v4257_v18 = vld [vmem:[%s5319_s8 + $0x24] ss:$8 sps:$4 sm:$0xff]   ;;  %v4261_v20 = vld [vmem:[%s5319_s8 + $0x20] ss:$8 sps:$4 sm:$0xff]  }
 0x133   : > { %715 = vperm.xlu1 %4244, %v685_v4   ;;  %705 = vperm.xlu0 %4243, %v683_v5   ;;  %v4259_v19 = vld [vmem:[%s5319_s8 + $0x224] ss:$8 sps:$4 sm:$0xff]   ;;  %v4262_v23 = vld [vmem:[%s5319_s8 + $0x220] ss:$8 sps:$4 sm:$0xff]   ;;  %v4263_v24 = vld [vmem:[%s5319_s8 + $0x34] ss:$8 sps:$4 sm:$0xff]  }
 0x134   : > { %1997 = vmatpush1.bf16.msra.mxu0 %v4250_v11  ;;  %1772 = vmatprep.subr.bf16.mxu1 %v4251_v12  ;;  %v691_v21 = vld [vmem:[%s5341_s9 + $0x48] sm:$0xff]  ;;  %v690_v22 = vld [vmem:[%s5341_s9 + $0x40] sm:$0xff]  ;;  %v4265_v25 = vld [vmem:[%s5319_s8 + $0x234] ss:$8 sps:$4 sm:$0xff]   ;;  %p3868_p11 = scmp.ne.s32.totalorder %s6574_s6, 3 }
 0x135   : > { %1998 = vmatprep.subr.bf16.mxu0 %v4253_v15  ;;  %v693_v26 = vld [vmem:[%s5341_s9 + $0x58] sm:$0xff]  ;;  %v692_v28 = vld [vmem:[%s5341_s9 + $0x50] sm:$0xff]  ;;  %v4269_v30 = vld [vmem:[%s5319_s8 + $0x44] ss:$8 sps:$4 sm:$0xff]   ;;  %vm3235_vm0 = vcmask (!%p3868_p11), 523264   ;;  %vm3300_vm1 = vcmask (!%p3868_p11), 7168  }
 0x136   : > { %1773 = vmatpush1.bf16.msra.mxu1 %v4255_v16  ;;  %v4267_v27 = vld [vmem:[%s5319_s8 + $0x30] ss:$8 sps:$4 sm:$0xff]   ;;  %v4271_v31 = vld [vmem:[%s5319_s8 + $0x244] ss:$8 sps:$4 sm:$0xff]   ;;  %v4273_v32 = vld [vmem:[%s5319_s8 + $0x40] ss:$8 sps:$4 sm:$0xff]  }
 0x137   : > { %725 = vperm.xlu1 %4244, %v687_v6   ;;  %720 = vperm.xlu0 %4243, %v686_v7   ;;  %v4268_v29 = vld [vmem:[%s5319_s8 + $0x230] ss:$8 sps:$4 sm:$0xff]   ;;  %v695_v33 = vld [vmem:[%s5341_s9 + $0x68] sm:$0xff]  ;;  %v694_v34 = vld [vmem:[%s5341_s9 + $0x60] sm:$0xff] }
 0x138   : > { %1999 = vmatpush1.bf16.msra.mxu0 %v4256_v17  ;;  %1774 = vmatprep.subr.bf16.mxu1 %v4257_v18  ;;  %v4274_v35 = vld [vmem:[%s5319_s8 + $0x240] ss:$8 sps:$4 sm:$0xff]   ;;  %v4275_v36 = vld [vmem:[%s5319_s8 + $0x54] ss:$8 sps:$4 sm:$0xff]   ;;  %v4279_v39 = vld [vmem:[%s5319_s8 + $0x50] ss:$8 sps:$4 sm:$0xff]  }
 0x139   : > { %2000 = vmatprep.subr.bf16.mxu0 %v4259_v19  ;;  %v4277_v37 = vld [vmem:[%s5319_s8 + $0x254] ss:$8 sps:$4 sm:$0xff]   ;;  %v4280_v41 = vld [vmem:[%s5319_s8 + $0x250] ss:$8 sps:$4 sm:$0xff]   ;;  %v4281_v42 = vld [vmem:[%s5319_s8 + $0x64] ss:$8 sps:$4 sm:$0xff]  }
 0x13a   : > { %1775 = vmatpush1.bf16.msra.mxu1 %v4261_v20  ;;  %v697_v38 = vld [vmem:[%s5341_s9 + $0x78] sm:$0xff]  ;;  %v696_v40 = vld [vmem:[%s5341_s9 + $0x70] sm:$0xff]  ;;  %v4283_v43 = vld [vmem:[%s5319_s8 + $0x264] ss:$8 sps:$4 sm:$0xff]  }
 0x13b   : > { %735 = vperm.xlu1 %4244, %v689_v13   ;;  %730 = vperm.xlu0 %4243, %v688_v14   ;;  %v4285_v44 = vld [vmem:[%s5319_s8 + $0x60] ss:$8 sps:$4 sm:$0xff]   ;;  %v4287_v45 = vld [vmem:[%s5319_s8 + $0x74] ss:$8 sps:$4 sm:$0xff]   ;;  %v4291_v48 = vld [vmem:[%s5319_s8 + $0x70] ss:$8 sps:$4 sm:$0xff]  }
 0x13c   : > { %2001 = vmatpush1.bf16.msra.mxu0 %v4262_v23  ;;  %1776 = vmatprep.subr.bf16.mxu1 %v4263_v24  ;;  %v4286_v46 = vld [vmem:[%s5319_s8 + $0x260] ss:$8 sps:$4 sm:$0xff]   ;;  %v4289_v47 = vld [vmem:[%s5319_s8 + $0x274] ss:$8 sps:$4 sm:$0xff]   ;;  %v4293_v49 = vld [vmem:[%s5319_s8 + $0x84] ss:$8 sps:$4 sm:$0xff]  }
 0x13d   : > { %2002 = vmatprep.subr.bf16.mxu0 %v4265_v25  ;;  %v4292_v50 = vld [vmem:[%s5319_s8 + $0x270] ss:$8 sps:$4 sm:$0xff]   ;;  %v4295_v51 = vld [vmem:[%s5319_s8 + $0x284] ss:$8 sps:$4 sm:$0xff]   ;;  %v4297_v52 = vld [vmem:[%s5319_s8 + $0x80] ss:$8 sps:$4 sm:$0xff]  }
 0x13e   : > { %1777 = vmatpush1.bf16.msra.mxu1 %v4267_v27  ;;  %v4299_v53 = vld [vmem:[%s5319_s8 + $0x94] ss:$8 sps:$4 sm:$0xff]   ;;  %v4298_v54 = vld [vmem:[%s5319_s8 + $0x280] ss:$8 sps:$4 sm:$0xff]   ;;  %v4303_v56 = vld [vmem:[%s5319_s8 + $0x90] ss:$8 sps:$4 sm:$0xff]  }
 0x13f   : > { %745 = vperm.xlu1 %4244, %v691_v21   ;;  %740 = vperm.xlu0 %4243, %v690_v22   ;;  %v4301_v55 = vld [vmem:[%s5319_s8 + $0x294] ss:$8 sps:$4 sm:$0xff]   ;;  %v4305_v57 = vld [vmem:[%s5319_s8 + $0xa4] ss:$8 sps:$4 sm:$0xff]   ;;  %v4304_v58 = vld [vmem:[%s5319_s8 + $0x290] ss:$8 sps:$4 sm:$0xff]  }
 0x140   : > { %2003 = vmatpush1.bf16.msra.mxu0 %v4268_v29  ;;  %1778 = vmatprep.subr.bf16.mxu1 %v4269_v30  ;;  %v4307_v59 = vld [vmem:[%s5319_s8 + $0x2a4] ss:$8 sps:$4 sm:$0xff]   ;;  %v4309_v60 = vld [vmem:[%s5319_s8 + $0xa0] ss:$8 sps:$4 sm:$0xff]   ;;  %v4311_v61 = vld [vmem:[%s5319_s8 + $0xb4] ss:$8 sps:$4 sm:$0xff]  }
 0x141   : > { %2004 = vmatprep.subr.bf16.mxu0 %v4271_v31  ;;  %v4310_v62 = vld [vmem:[%s5319_s8 + $0x2a0] ss:$8 sps:$4 sm:$0xff]   ;;  %v4313_v63 = vld [vmem:[%s5319_s8 + $0x2b4] ss:$8 sps:$4 sm:$0xff]   ;;  %v4315_v0 = vld [vmem:[%s5319_s8 + $0xb0] ss:$8 sps:$4 sm:$0xff]  }
 0x142   : > { %1779 = vmatpush1.bf16.msra.mxu1 %v4273_v32  ;;  %v4317_v1 = vld [vmem:[%s5319_s8 + $0xc4] ss:$8 sps:$4 sm:$0xff]   ;;  %v4316_v2 = vld [vmem:[%s5319_s8 + $0x2b0] ss:$8 sps:$4 sm:$0xff]   ;;  %v4321_v4 = vld [vmem:[%s5319_s8 + $0xc0] ss:$8 sps:$4 sm:$0xff]  }
 0x143   : > { %755 = vperm.xlu1 %4244, %v693_v26   ;;  %750 = vperm.xlu0 %4243, %v692_v28   ;;  %v4319_v3 = vld [vmem:[%s5319_s8 + $0x2c4] ss:$8 sps:$4 sm:$0xff]   ;;  %v4323_v5 = vld [vmem:[%s5319_s8 + $0xd4] ss:$8 sps:$4 sm:$0xff]   ;;  %v4322_v6 = vld [vmem:[%s5319_s8 + $0x2c0] ss:$8 sps:$4 sm:$0xff]  }
 0x144   : > { %2005 = vmatpush1.bf16.msra.mxu0 %v4274_v35  ;;  %1780 = vmatprep.subr.bf16.mxu1 %v4275_v36  ;;  %v4325_v7 = vld [vmem:[%s5319_s8 + $0x2d4] ss:$8 sps:$4 sm:$0xff]   ;;  %v4327_v8 = vld [vmem:[%s5319_s8 + $0xd0] ss:$8 sps:$4 sm:$0xff]   ;;  %v4329_v9 = vld [vmem:[%s5319_s8 + $0xe4] ss:$8 sps:$4 sm:$0xff]  }
 0x145   : > { %2006 = vmatprep.subr.bf16.mxu0 %v4277_v37  ;;  %v4328_v10 = vld [vmem:[%s5319_s8 + $0x2d0] ss:$8 sps:$4 sm:$0xff]   ;;  %v4331_v11 = vld [vmem:[%s5319_s8 + $0x2e4] ss:$8 sps:$4 sm:$0xff]   ;;  %v4333_v12 = vld [vmem:[%s5319_s8 + $0xe0] ss:$8 sps:$4 sm:$0xff]  }
 0x146   : > { %1781 = vmatpush1.bf16.msra.mxu1 %v4279_v39  ;;  %v4335_v13 = vld [vmem:[%s5319_s8 + $0xf4] ss:$8 sps:$4 sm:$0xff]   ;;  %v4334_v14 = vld [vmem:[%s5319_s8 + $0x2e0] ss:$8 sps:$4 sm:$0xff]   ;;  %v4339_v16 = vld [vmem:[%s5319_s8 + $0xf0] ss:$8 sps:$4 sm:$0xff]  }
 0x147   : > { %765 = vperm.xlu1 %4244, %v695_v33   ;;  %760 = vperm.xlu0 %4243, %v694_v34   ;;  %v4337_v15 = vld [vmem:[%s5319_s8 + $0x2f4] ss:$8 sps:$4 sm:$0xff]   ;;  %v4343_v17 = vld [vmem:[%s5319_s8 + $0x104] ss:$8 sps:$4 sm:$0xff]   ;;  %v4340_v18 = vld [vmem:[%s5319_s8 + $0x2f0] ss:$8 sps:$4 sm:$0xff]  }
 0x148   : > { %2007 = vmatpush1.bf16.msra.mxu0 %v4280_v41  ;;  %1782 = vmatprep.subr.bf16.mxu1 %v4281_v42  ;;  %v4346_v19 = vld [vmem:[%s5319_s8 + $0x304] ss:$8 sps:$4 sm:$0xff]  }
 0x149   : > { %2008 = vmatprep.subr.bf16.mxu0 %v4283_v43  ;;  %v555_v20 = vld [vmem:[%s5310_s30 + $0x8] sm:$0xff]  ;;  %v554_v25 = vld [vmem:[%s5310_s30] sm:$0xff] }
 0x14a   : > { %1783 = vmatpush1.bf16.msra.mxu1 %v4285_v44  ;;  %v563_v23 = vld [vmem:[%s5310_s30 + $0x48] sm:$0xff]  ;;  %v558_v26 = vld [vmem:[%s5310_s30 + $0x20] sm:$0xff] }
 0x14b   : > { %775 = vperm.xlu1 %4244, %v697_v38   ;;  %770 = vperm.xlu0 %4243, %v696_v40   ;;  %v559_v24 = vld [vmem:[%s5310_s30 + $0x28] sm:$0xff]  ;;  %v562_v30 = vld [vmem:[%s5310_s30 + $0x40] sm:$0xff] }
 0x14c   : > { %1784 = vmatprep.subr.bf16.mxu1 %v4287_v45  ;;  %2009 = vmatpush1.bf16.msra.mxu0 %v4286_v46  ;;  %v571_v27 = vld [vmem:[%s5310_s30 + $0x88] sm:$0xff]  ;;  %v566_v31 = vld [vmem:[%s5310_s30 + $0x60] sm:$0xff] }
 0x14d   : > { %2010 = vmatprep.subr.bf16.mxu0 %v4289_v47  ;;  %v575_v28 = vld [vmem:[%s5310_s30 + $0xa8] sm:$0xff] }
 0x14e   : > { %1785 = vmatpush1.bf16.msra.mxu1 %v4291_v48  ;;  %v567_v29 = vld [vmem:[%s5310_s30 + $0x68] sm:$0xff] }
 0x14f   : > { %1786 = vmatprep.subr.bf16.mxu1 %v4293_v49  ;;  %v579_v34 = vld [vmem:[%s5310_s30 + $0xc8] sm:$0xff] }
 0x150   : > { %2011 = vmatpush1.bf16.msra.mxu0 %v4292_v50  ;;  %v583_v35 = vld [vmem:[%s5310_s30 + $0xe8] sm:$0xff] }
 0x151   : > { %2012 = vmatprep.subr.bf16.mxu0 %v4295_v51  ;;  %v4341_v49 = vld [vmem:[%s5319_s8 + $0x100] ss:$8 sps:$4 sm:$0xff]  }
 0x152   : > { %1787 = vmatpush1.bf16.msra.mxu1 %v4297_v52  ;;  %v4344_v51 = vld [vmem:[%s5319_s8 + $0x300] ss:$8 sps:$4 sm:$0xff]  }
 0x153   : > { %1788 = vmatprep.subr.bf16.mxu1 %v4299_v53 }
 0x154   : > { %2013 = vmatpush1.bf16.msra.mxu0 %v4298_v54 }
 0x155   : > { %2014 = vmatprep.subr.bf16.mxu0 %v4301_v55  ;;  %v4349_v55 = vld [vmem:[%s5319_s8 + $0x114] ss:$8 sps:$4 sm:$0xff]  }
 0x156   : > { %1789 = vmatpush1.bf16.msra.mxu1 %v4303_v56  ;;  %v4352_v56 = vld [vmem:[%s5319_s8 + $0x314] ss:$8 sps:$4 sm:$0xff]  }
 0x157   : > { %1790 = vmatprep.subr.bf16.mxu1 %v4305_v57  ;;  %v570_v57 = vld [vmem:[%s5310_s30 + $0x80] sm:$0xff] }
 0x158   : > { %2015 = vmatpush1.bf16.msra.mxu0 %v4304_v58 }
 0x159   : > { %2016 = vmatprep.subr.bf16.mxu0 %v4307_v59  ;;  %v578_v59 = vld [vmem:[%s5310_s30 + $0xc0] sm:$0xff] }
 0x15a   : > { %1791 = vmatpush1.bf16.msra.mxu1 %v4309_v60  ;;  %v574_v60 = vld [vmem:[%s5310_s30 + $0xa0] sm:$0xff] }
 0x15b   : > { %1792 = vmatprep.subr.bf16.mxu1 %v4311_v61  ;;  %v582_v61 = vld [vmem:[%s5310_s30 + $0xe0] sm:$0xff] }
 0x15c   : > { %2017 = vmatpush1.bf16.msra.mxu0 %v4310_v62  ;;  %v4347_v62 = vld [vmem:[%s5319_s8 + $0x110] ss:$8 sps:$4 sm:$0xff]  }
 0x15d   : > { %2018 = vmatprep.subr.bf16.mxu0 %v4313_v63  ;;  %v4350_v63 = vld [vmem:[%s5319_s8 + $0x310] ss:$8 sps:$4 sm:$0xff]  }
 0x15e   : > { %1793 = vmatpush1.bf16.msra.mxu1 %v4315_v0  ;;  %v587_v0 = vld [vmem:[%s5310_s30 + $0x108] sm:$0xff] }
 0x15f   : > { %1794 = vmatprep.subr.bf16.mxu1 %v4317_v1 }
 0x160   : > { %2019 = vmatpush1.bf16.msra.mxu0 %v4316_v2 }
 0x161   : > { %2020 = vmatprep.subr.bf16.mxu0 %v4319_v3 }
 0x162   : > { %1795 = vmatpush1.bf16.msra.mxu1 %v4321_v4  ;;  %v595_v4 = vld [vmem:[%s5310_s30 + $0x148] sm:$0xff] }
 0x163   : > { %1796 = vmatprep.subr.bf16.mxu1 %v4323_v5  ;;  %v591_v5 = vld [vmem:[%s5310_s30 + $0x128] sm:$0xff] }
 0x164   : > { %2021 = vmatpush1.bf16.msra.mxu0 %v4322_v6  ;;  %v599_v6 = vld [vmem:[%s5310_s30 + $0x168] sm:$0xff] }
 0x165   : > { %2022 = vmatprep.subr.bf16.mxu0 %v4325_v7  ;;  %v4355_v7 = vld [vmem:[%s5319_s8 + $0x124] ss:$8 sps:$4 sm:$0xff]  }
 0x166   : > { %1797 = vmatpush1.bf16.msra.mxu1 %v4327_v8  ;;  %v4358_v8 = vld [vmem:[%s5319_s8 + $0x324] ss:$8 sps:$4 sm:$0xff]  }
 0x167   : > { %1798 = vmatprep.subr.bf16.mxu1 %v4329_v9 }
 0x168   : > { %2023 = vmatpush1.bf16.msra.mxu0 %v4328_v10 }
 0x169   : > { %2024 = vmatprep.subr.bf16.mxu0 %v4331_v11 }
 0x16a   : > { %1799 = vmatpush1.bf16.msra.mxu1 %v4333_v12 }
 0x16b   : > { %1800 = vmatprep.subr.bf16.mxu1 %v4335_v13 }
 0x16c   : > { %2025 = vmatpush1.bf16.msra.mxu0 %v4334_v14 }
 0x16d   : > { %2026 = vmatprep.subr.bf16.mxu0 %v4337_v15 }
 0x16e   : > { %1801 = vmatpush1.bf16.msra.mxu1 %v4339_v16  ;;  %v4353_v16 = vld [vmem:[%s5319_s8 + $0x120] ss:$8 sps:$4 sm:$0xff]  }
 0x16f   : > { %1883 = vmatprep.subr.bf16.mxu1 %v4343_v17  ;;  %v4356_v17 = vld [vmem:[%s5319_s8 + $0x320] ss:$8 sps:$4 sm:$0xff]  }
 0x170   : > { %2027 = vmatpush1.bf16.msra.mxu0 %v4340_v18 }
 0x171   : > { %2109 = vmatprep.subr.bf16.mxu0 %v4346_v19 }
 0x1ae   : > { %v5437_v21 = vpop.permute.xlu1 %710  ;;  %v5439_v22 = vpop.permute.xlu0 %700 }
 0x1af   : > { %v779_v32 = vmul.f32 %v5439_v22, %v555_v20  ;;  %v783_v33 = vmul.f32 %v5439_v22, %v559_v24  ;;  %v778_v37 = vmul.f32 %v5439_v22, %v554_v25  ;;  %v782_v38 = vmul.f32 %v5439_v22, %v558_v26  ;;  %v4361_v20 = vld [vmem:[%s5319_s8 + $0x134] ss:$8 sps:$4 sm:$0xff]   ;;  %v586_v24 = vld [vmem:[%s5310_s30 + $0x100] sm:$0xff] }
 0x1b0   : > { %v795_v39 = vmul.f32 %v5437_v21, %v571_v27  ;;  %v799_v40 = vmul.f32 %v5437_v21, %v575_v28  ;;  %v794_v3 = vmul.f32 %v5437_v21, %v570_v57  ;;  %v798_v10 = vmul.f32 %v5437_v21, %v574_v60  ;;  %v594_v25 = vld [vmem:[%s5310_s30 + $0x140] sm:$0xff] }
 0x1b1   : > { %v590_v26 = vld [vmem:[%s5310_s30 + $0x120] sm:$0xff] }
 0x1b2   : > { %v5454_v36 = vpop.permute.xlu0 %705  ;;  %v5460_v41 = vpop.permute.xlu1 %715  ;;  %v598_v27 = vld [vmem:[%s5310_s30 + $0x160] sm:$0xff] }
 0x1b3   : > { %v787_v42 = vmul.f32 %v5454_v36, %v563_v23  ;;  %v791_v43 = vmul.f32 %v5454_v36, %v567_v29  ;;  %v786_v44 = vmul.f32 %v5454_v36, %v562_v30  ;;  %v790_v45 = vmul.f32 %v5454_v36, %v566_v31  ;;  %v4364_v23 = vld [vmem:[%s5319_s8 + $0x334] ss:$8 sps:$4 sm:$0xff]   ;;  %v4359_v30 = vld [vmem:[%s5319_s8 + $0x130] ss:$8 sps:$4 sm:$0xff]   ;;  %v610_v57 = vld [vmem:[%s5310_s30 + $0x1c0] sm:$0xff] }
 0x1b4   : > { %v803_v46 = vmul.f32 %v5460_v41, %v579_v34  ;;  %v807_v47 = vmul.f32 %v5460_v41, %v583_v35  ;;  %v802_v9 = vmul.f32 %v5460_v41, %v578_v59  ;;  %v806_v11 = vmul.f32 %v5460_v41, %v582_v61  ;;  %v4362_v31 = vld [vmem:[%s5319_s8 + $0x330] ss:$8 sps:$4 sm:$0xff]   ;;  %v606_v60 = vld [vmem:[%s5310_s30 + $0x1a0] sm:$0xff] }
 0x1b5   : > { %v907_v48 = vpack.c.bf16 %v787_v42, %v779_v32  ;;  %v911_v50 = vpack.c.bf16 %v791_v43, %v783_v33  ;;  %v906_v52 = vpack.c.bf16 %v786_v44, %v778_v37  ;;  %v910_v53 = vpack.c.bf16 %v790_v45, %v782_v38  ;;  %v603_v32 = vld [vmem:[%s5310_s30 + $0x188] sm:$0xff]  ;;  %v4374_v59 = vld [vmem:[%s5319_s8 + $0x350] ss:$8 sps:$4 sm:$0xff]   ;;  %v614_v61 = vld [vmem:[%s5310_s30 + $0x1e0] sm:$0xff] }
 0x1b6   : > { %v915_v54 = vpack.c.bf16 %v803_v46, %v795_v39  ;;  %v919_v58 = vpack.c.bf16 %v807_v47, %v799_v40  ;;  %v5479_v1 = vpop.permute.xlu1 %725  ;;  %v5481_v2 = vpop.permute.xlu0 %720  ;;  %v914_v18 = vpack.c.bf16 %v802_v9, %v794_v3  ;;  %v918_v19 = vpack.c.bf16 %v806_v11, %v798_v10  ;;  %v611_v37 = vld [vmem:[%s5310_s30 + $0x1c8] sm:$0xff] }
 0x1b7   : > { %1802 = vmatprep.mubr.bf16.mxu1 %v907_v48  ;;  %2028 = vmatprep.mubr.bf16.mxu0 %v911_v50  ;;  %v811_v12 = vmul.f32 %v5481_v2, %v587_v0  ;;  %v819_v13 = vmul.f32 %v5479_v1, %v595_v4  ;;  %v815_v14 = vmul.f32 %v5481_v2, %v591_v5  ;;  %v607_v38 = vld [vmem:[%s5310_s30 + $0x1a8] sm:$0xff] }
 0x1b8   : > { %1803 = vmatmul.mubr.bf16.vlgmr.msra.gmra.mrb[0].mxu1 %v906_v52  ;;  %2029 = vmatmul.mubr.bf16.vlgmr.msra.gmra.mrb[0].mxu0 %v910_v53  ;;  %v823_v15 = vmul.f32 %v5479_v1, %v599_v6  ;;  %v810_v35 = vmul.f32 %v5481_v2, %v586_v24  ;;  %v615_v39 = vld [vmem:[%s5310_s30 + $0x1e8] sm:$0xff]  ;;  %v818_v43 = vmul.f32 %v5479_v1, %v594_v25  ;;  %v4373_v52 = vld [vmem:[%s5319_s8 + $0x154] ss:$8 sps:$4 sm:$0xff]  }
 0x1b9   : > { %1884 = vmatpush1.bf16.msra.mxu1 %v4341_v49  ;;  %2110 = vmatpush1.bf16.msra.mxu0 %v4344_v51  ;;  %v923_v28 = vpack.c.bf16 %v819_v13, %v811_v12  ;;  %v4367_v40 = vld [vmem:[%s5319_s8 + $0x144] ss:$8 sps:$4 sm:$0xff]   ;;  %v814_v44 = vmul.f32 %v5481_v2, %v590_v26  ;;  %v822_v45 = vmul.f32 %v5479_v1, %v598_v27  ;;  %v4365_v50 = vld [vmem:[%s5319_s8 + $0x140] ss:$8 sps:$4 sm:$0xff]   ;;  %v556_v13 = vld [vmem:[%s5310_s30 + $0x10] sm:$0xff] }
 0x1ba   : > { %1812 = vmatprep.mubr.bf16.mxu1 %v915_v54  ;;  %1885 = vmatprep.subr.bf16.mxu1 %v4349_v55  ;;  %v927_v29 = vpack.c.bf16 %v823_v15, %v815_v14  ;;  %v5507_v33 = vpop.permute.xlu1 %735  ;;  %v5509_v34 = vpop.permute.xlu0 %730  ;;  %v4370_v42 = vld [vmem:[%s5319_s8 + $0x344] ss:$8 sps:$4 sm:$0xff]   ;;  %v4368_v51 = vld [vmem:[%s5319_s8 + $0x340] ss:$8 sps:$4 sm:$0xff]   ;;  %v922_v53 = vpack.c.bf16 %v818_v43, %v810_v35  ;;  %v4376_v55 = vld [vmem:[%s5319_s8 + $0x354] ss:$8 sps:$4 sm:$0xff]  }
 0x1bb   : > { %2038 = vmatprep.mubr.bf16.mxu0 %v919_v58  ;;  %2111 = vmatprep.subr.bf16.mxu0 %v4352_v56  ;;  %v827_v46 = vmul.f32 %v5509_v34, %v603_v32  ;;  %v835_v47 = vmul.f32 %v5507_v33, %v611_v37  ;;  %v831_v48 = vmul.f32 %v5509_v34, %v607_v38  ;;  %v602_v56 = vld [vmem:[%s5310_s30 + $0x180] sm:$0xff]  ;;  %v4371_v58 = vld [vmem:[%s5319_s8 + $0x150] ss:$8 sps:$4 sm:$0xff]   ;;  %v623_v11 = vld [vmem:[%s5310_s30 + $0x228] sm:$0xff] }
 0x1bc   : > { %v839_v49 = vmul.f32 %v5507_v33, %v615_v39  ;;  %v926_v54 = vpack.c.bf16 %v822_v45, %v814_v44  ;;  %v4379_v5 = vld [vmem:[%s5319_s8 + $0x164] ss:$8 sps:$4 sm:$0xff]   ;;  %v826_v9 = vmul.f32 %v5509_v34, %v602_v56  ;;  %v834_v10 = vmul.f32 %v5507_v33, %v610_v57  ;;  %v580_v35 = vld [vmem:[%s5310_s30 + $0xd0] sm:$0xff] }
 0x1bd   : > { %1886 = vmatpush1.bf16.msra.mxu1 %v4347_v62  ;;  %2112 = vmatpush1.bf16.msra.mxu0 %v4350_v63  ;;  %v564_v62 = vld [vmem:[%s5310_s30 + $0x50] sm:$0xff]  ;;  %v931_v3 = vpack.c.bf16 %v835_v47, %v827_v46  ;;  %v4382_v6 = vld [vmem:[%s5319_s8 + $0x364] ss:$8 sps:$4 sm:$0xff]   ;;  %v830_v14 = vmul.f32 %v5509_v34, %v606_v60  ;;  %v838_v15 = vmul.f32 %v5507_v33, %v614_v61 }
 0x1be   : > { %1887 = vmatprep.subr.bf16.mxu1 %v4355_v7  ;;  %2113 = vmatprep.subr.bf16.mxu0 %v4358_v8  ;;  %v5535_v63 = vpop.permute.xlu1 %745  ;;  %v5537_v0 = vpop.permute.xlu0 %740  ;;  %v935_v4 = vpack.c.bf16 %v839_v49, %v831_v48  ;;  %v619_v7 = vld [vmem:[%s5310_s30 + $0x208] sm:$0xff]  ;;  %v618_v27 = vld [vmem:[%s5310_s30 + $0x200] sm:$0xff]  ;;  %v584_v38 = vld [vmem:[%s5310_s30 + $0xf0] sm:$0xff]  ;;  %v5605_v61 = vmul.f32 %v5460_v41, %v580_v35 }
 0x1bf   : > { %v627_v8 = vld [vmem:[%s5310_s30 + $0x248] sm:$0xff]  ;;  %v847_v25 = vmul.f32 %v5537_v0, %v623_v11  ;;  %v4385_v43 = vld [vmem:[%s5319_s8 + $0x174] ss:$8 sps:$4 sm:$0xff]   ;;  %v622_v44 = vld [vmem:[%s5310_s30 + $0x220] sm:$0xff] }
 0x1c0   : > { %1813 = vmatmul.mubr.bf16.gmra.mrb[4].mxu1 %v914_v18  ;;  %2039 = vmatmul.mubr.bf16.gmra.mrb[4].mxu0 %v918_v19  ;;  %v631_v12 = vld [vmem:[%s5310_s30 + $0x268] sm:$0xff]  ;;  %v572_v18 = vld [vmem:[%s5310_s30 + $0x90] sm:$0xff]  ;;  %v851_v24 = vmul.f32 %v5535_v63, %v627_v8  ;;  %v630_v45 = vld [vmem:[%s5310_s30 + $0x260] sm:$0xff] }
 0x1c1   : > { %1888 = vmatpush1.bf16.msra.mxu1 %v4353_v16  ;;  %2114 = vmatpush1.bf16.msra.mxu0 %v4356_v17  ;;  %v5551_v16 = vmul.f32 %v5454_v36, %v564_v62  ;;  %v560_v17 = vld [vmem:[%s5310_s30 + $0x30] sm:$0xff]  ;;  %v855_v26 = vmul.f32 %v5535_v63, %v631_v12  ;;  %v5573_v37 = vmul.f32 %v5437_v21, %v572_v18  ;;  %v647_v60 = vld [vmem:[%s5310_s30 + $0x2e8] sm:$0xff] }
 0x1c2   : > { %1822 = vmatprep.mubr.bf16.mxu1 %v923_v28  ;;  %2048 = vmatprep.mubr.bf16.mxu0 %v927_v29  ;;  %v576_v19 = vld [vmem:[%s5310_s30 + $0xb0] sm:$0xff]  ;;  %v626_v28 = vld [vmem:[%s5310_s30 + $0x240] sm:$0xff]  ;;  %v5564_v29 = vmul.f32 %v5439_v22, %v556_v13  ;;  %v5569_v32 = vmul.f32 %v5439_v22, %v560_v17  ;;  %v5584_v47 = vpop.permute.xlu0 %750  ;;  %v5600_v57 = vpop.permute.xlu1 %755  ;;  %v5608_v62 = vmul.f32 %v5460_v41, %v584_v38 }
 0x1c3   : > { %1889 = vmatprep.subr.bf16.mxu1 %v4361_v20  ;;  %2115 = vmatprep.subr.bf16.mxu0 %v4364_v23  ;;  %v4377_v20 = vld [vmem:[%s5319_s8 + $0x160] ss:$8 sps:$4 sm:$0xff]   ;;  %v843_v23 = vmul.f32 %v5537_v0, %v619_v7  ;;  %v5577_v39 = vmul.f32 %v5437_v21, %v576_v19  ;;  %v4383_v49 = vld [vmem:[%s5319_s8 + $0x170] ss:$8 sps:$4 sm:$0xff]   ;;  %v4394_v11 = vld [vmem:[%s5319_s8 + $0x384] ss:$8 sps:$4 sm:$0xff]  }
 0x1c4   : > { %v596_v7 = vld [vmem:[%s5310_s30 + $0x150] sm:$0xff]  ;;  %v4392_v17 = vld [vmem:[%s5319_s8 + $0x380] ss:$8 sps:$4 sm:$0xff]  }
 0x1c5   : > { %1890 = vmatpush1.bf16.msra.mxu1 %v4359_v30  ;;  %2116 = vmatpush1.bf16.msra.mxu0 %v4362_v31  ;;  %v568_v30 = vld [vmem:[%s5310_s30 + $0x70] sm:$0xff]  ;;  %v4380_v31 = vld [vmem:[%s5319_s8 + $0x360] ss:$8 sps:$4 sm:$0xff]   ;;  %v939_v48 = vpack.c.bf16 %v851_v24, %v843_v23  ;;  %v871_v23 = vmul.f32 %v5600_v57, %v647_v60 }
 0x1c6   : > { %1891 = vmatprep.subr.bf16.mxu1 %v4367_v40  ;;  %2117 = vmatprep.subr.bf16.mxu0 %v4370_v42  ;;  %v930_v40 = vpack.c.bf16 %v834_v10, %v826_v9  ;;  %v934_v42 = vpack.c.bf16 %v838_v15, %v830_v14  ;;  %v5598_v56 = vmul.f32 %v5454_v36, %v568_v30  ;;  %v592_v8 = vld [vmem:[%s5310_s30 + $0x130] sm:$0xff]  ;;  %v4391_v10 = vld [vmem:[%s5319_s8 + $0x184] ss:$8 sps:$4 sm:$0xff]   ;;  %v4389_v15 = vld [vmem:[%s5319_s8 + $0x180] ss:$8 sps:$4 sm:$0xff]  }
 0x1c7   : > { %v600_v9 = vld [vmem:[%s5310_s30 + $0x170] sm:$0xff]  ;;  %v634_v24 = vld [vmem:[%s5310_s30 + $0x280] sm:$0xff] }
 0x1c8   : > { %1823 = vmatmul.mubr.bf16.gmra.mrb[8].mxu1 %v922_v53  ;;  %2049 = vmatmul.mubr.bf16.gmra.mrb[8].mxu0 %v926_v54  ;;  %v5593_v53 = vmul.f32 %v5535_v63, %v626_v28  ;;  %v635_v54 = vld [vmem:[%s5310_s30 + $0x288] sm:$0xff]  ;;  %v604_v28 = vld [vmem:[%s5310_s30 + $0x190] sm:$0xff]  ;;  %v662_v14 = vld [vmem:[%s5310_s30 + $0x360] sm:$0xff] }
 0x1c9   : > { %1892 = vmatpush1.bf16.msra.mxu1 %v4365_v50  ;;  %2118 = vmatpush1.bf16.msra.mxu0 %v4368_v51  ;;  %v4386_v50 = vld [vmem:[%s5319_s8 + $0x370] ss:$8 sps:$4 sm:$0xff]   ;;  %v4388_v51 = vld [vmem:[%s5319_s8 + $0x374] ss:$8 sps:$4 sm:$0xff]   ;;  %v859_v12 = vmul.f32 %v5584_v47, %v635_v54  ;;  %v5662_v54 = vmul.f32 %v5584_v47, %v634_v24  ;;  %v5668_v60 = vmul.f32 %v5509_v34, %v604_v28  ;;  %v663_v24 = vld [vmem:[%s5310_s30 + $0x368] sm:$0xff] }
 0x1ca   : > { %1832 = vmatprep.mubr.bf16.mxu1 %v931_v3  ;;  %2058 = vmatprep.mubr.bf16.mxu0 %v935_v4  ;;  %v588_v3 = vld [vmem:[%s5310_s30 + $0x110] sm:$0xff]  ;;  %v846_v4 = vmul.f32 %v5537_v0, %v622_v44  ;;  %v642_v44 = vld [vmem:[%s5310_s30 + $0x2c0] sm:$0xff] }
 0x1cb   : > { %1893 = vmatprep.subr.bf16.mxu1 %v4373_v52  ;;  %2119 = vmatprep.subr.bf16.mxu0 %v4376_v55  ;;  %v5590_v52 = vmul.f32 %v5537_v0, %v618_v27  ;;  %v643_v55 = vld [vmem:[%s5310_s30 + $0x2c8] sm:$0xff]  ;;  %v5641_v27 = vmul.f32 %v5479_v1, %v600_v9  ;;  %v612_v30 = vld [vmem:[%s5310_s30 + $0x1d0] sm:$0xff] }
 0x1cc   : > { %v867_v18 = vmul.f32 %v5600_v57, %v643_v55  ;;  %v4397_v35 = vld [vmem:[%s5319_s8 + $0x194] ss:$8 sps:$4 sm:$0xff]   ;;  %v646_v55 = vld [vmem:[%s5310_s30 + $0x2e0] sm:$0xff] }
 0x1cd   : > { %1894 = vmatpush1.bf16.msra.mxu1 %v4371_v58  ;;  %2120 = vmatpush1.bf16.msra.mxu0 %v4374_v59  ;;  %v943_v58 = vpack.c.bf16 %v855_v26, %v847_v25  ;;  %v639_v59 = vld [vmem:[%s5310_s30 + $0x2a8] sm:$0xff]  ;;  %v5635_v25 = vmul.f32 %v5479_v1, %v596_v7  ;;  %v5638_v26 = vmul.f32 %v5481_v2, %v592_v8  ;;  %v608_v38 = vld [vmem:[%s5310_s30 + $0x1b0] sm:$0xff] }
 0x1ce   : > { %1895 = vmatprep.subr.bf16.mxu1 %v4379_v5  ;;  %2121 = vmatprep.subr.bf16.mxu0 %v4382_v6  ;;  %v854_v5 = vmul.f32 %v5535_v63, %v630_v45  ;;  %v863_v19 = vmul.f32 %v5584_v47, %v639_v59  ;;  %v638_v45 = vld [vmem:[%s5310_s30 + $0x2a0] sm:$0xff]  ;;  %v659_v59 = vld [vmem:[%s5310_s30 + $0x348] sm:$0xff]  ;;  %v5677_v8 = vmul.f32 %v5509_v34, %v608_v38  ;;  %v632_v28 = vld [vmem:[%s5310_s30 + $0x270] sm:$0xff] }
 0x1cf   : > { %v655_v7 = vld [vmem:[%s5310_s30 + $0x328] sm:$0xff]  ;;  %v660_v6 = vld [vmem:[%s5310_s30 + $0x350] sm:$0xff] }
 0x1d0   : > { %1833 = vmatmul.mubr.bf16.gmra.mrb[12].mxu1 %v930_v40  ;;  %2059 = vmatmul.mubr.bf16.gmra.mrb[12].mxu0 %v934_v42  ;;  %v616_v40 = vld [vmem:[%s5310_s30 + $0x1f0] sm:$0xff]  ;;  %v942_v42 = vpack.c.bf16 %v854_v5, %v846_v4  ;;  %v5673_v4 = vpop.permute.xlu1 %765  ;;  %v951_v5 = vpack.c.bf16 %v871_v23, %v863_v19  ;;  %v667_v38 = vld [vmem:[%s5310_s30 + $0x388] sm:$0xff] }
 0x1d1   : > { %1896 = vmatpush1.bf16.msra.mxu1 %v4377_v20  ;;  %2122 = vmatpush1.bf16.msra.mxu0 %v4380_v31  ;;  %v5630_v20 = vmul.f32 %v5481_v2, %v588_v3  ;;  %v938_v31 = vpack.c.bf16 %v5593_v53, %v5590_v52  ;;  %v4395_v52 = vld [vmem:[%s5319_s8 + $0x190] ss:$8 sps:$4 sm:$0xff]   ;;  %v5671_v3 = vmul.f32 %v5507_v33, %v612_v30  ;;  %v4403_v30 = vld [vmem:[%s5319_s8 + $0x1a4] ss:$8 sps:$4 sm:$0xff]   ;;  %v4412_v19 = vld [vmem:[%s5319_s8 + $0x3b4] ss:$8 sps:$4 sm:$0xff]  }
 0x1d2   : > { %1842 = vmatprep.mubr.bf16.mxu1 %v939_v48  ;;  %2068 = vmatprep.mubr.bf16.mxu0 %v943_v58  ;;  %v4398_v53 = vld [vmem:[%s5319_s8 + $0x390] ss:$8 sps:$4 sm:$0xff]   ;;  %v651_v58 = vld [vmem:[%s5310_s30 + $0x308] sm:$0xff]  ;;  %v5680_v9 = vmul.f32 %v5507_v33, %v616_v40  ;;  %v654_v48 = vld [vmem:[%s5310_s30 + $0x320] sm:$0xff] }
 0x1d3   : > { %1897 = vmatprep.subr.bf16.mxu1 %v4385_v43  ;;  %2123 = vmatprep.subr.bf16.mxu0 %v4388_v51  ;;  %v4400_v43 = vld [vmem:[%s5319_s8 + $0x394] ss:$8 sps:$4 sm:$0xff]   ;;  %v947_v51 = vpack.c.bf16 %v867_v18, %v859_v12  ;;  %v866_v12 = vmul.f32 %v5600_v57, %v642_v44  ;;  %v862_v18 = vmul.f32 %v5584_v47, %v638_v45  ;;  %v4401_v40 = vld [vmem:[%s5319_s8 + $0x1a0] ss:$8 sps:$4 sm:$0xff]  }
 0x1d4   : > { %v624_v23 = vld [vmem:[%s5310_s30 + $0x230] sm:$0xff] }
 0x1d5   : > { %1898 = vmatpush1.bf16.msra.mxu1 %v4383_v49  ;;  %2124 = vmatpush1.bf16.msra.mxu0 %v4386_v50  ;;  %v5657_v50 = vpop.permute.xlu0 %760  ;;  %v658_v49 = vld [vmem:[%s5310_s30 + $0x340] sm:$0xff]  ;;  %v664_v46 = vld [vmem:[%s5310_s30 + $0x370] sm:$0xff] }
 0x1d6   : > { %1899 = vmatprep.subr.bf16.mxu1 %v4391_v10  ;;  %2125 = vmatprep.subr.bf16.mxu0 %v4394_v11  ;;  %v620_v10 = vld [vmem:[%s5310_s30 + $0x210] sm:$0xff] }
 0x1d7   : > { %v628_v11 = vld [vmem:[%s5310_s30 + $0x250] sm:$0xff]  ;;  %v5700_v44 = vmul.f32 %v5537_v0, %v620_v10 }
 0x1d8   : > { %1843 = vmatmul.mubr.bf16.gmra.mrb[16].mxu1 %v938_v31  ;;  %2069 = vmatmul.mubr.bf16.gmra.mrb[16].mxu0 %v942_v42  ;;  %v4406_v31 = vld [vmem:[%s5319_s8 + $0x3a4] ss:$8 sps:$4 sm:$0xff]   ;;  %v883_v42 = vmul.f32 %v5673_v4, %v659_v59  ;;  %v5703_v45 = vmul.f32 %v5535_v63, %v628_v11  ;;  %v644_v59 = vld [vmem:[%s5310_s30 + $0x2d0] sm:$0xff]  ;;  %v946_v11 = vpack.c.bf16 %v866_v12, %v5662_v54 }
 0x1d9   : > { %1900 = vmatpush1.bf16.msra.mxu1 %v4389_v15  ;;  %2126 = vmatpush1.bf16.msra.mxu0 %v4392_v17  ;;  %v870_v15 = vmul.f32 %v5600_v57, %v646_v55  ;;  %v875_v17 = vmul.f32 %v5657_v50, %v651_v58  ;;  %v879_v55 = vmul.f32 %v5657_v50, %v655_v7  ;;  %v648_v10 = vld [vmem:[%s5310_s30 + $0x2f0] sm:$0xff]  ;;  %v4404_v7 = vld [vmem:[%s5319_s8 + $0x3a0] ss:$8 sps:$4 sm:$0xff]  }
 0x1da   : > { %1852 = vmatprep.mubr.bf16.mxu1 %v947_v51  ;;  %2078 = vmatprep.mubr.bf16.mxu0 %v951_v5  ;;  %v636_v51 = vld [vmem:[%s5310_s30 + $0x290] sm:$0xff]  ;;  %v887_v58 = vmul.f32 %v5673_v4, %v663_v24 }
 0x1db   : > { %1901 = vmatprep.subr.bf16.mxu1 %v4397_v35  ;;  %2127 = vmatprep.subr.bf16.mxu0 %v4400_v43  ;;  %v5709_v35 = vmul.f32 %v5537_v0, %v624_v23  ;;  %v5712_v43 = vmul.f32 %v5535_v63, %v632_v28  ;;  %v640_v5 = vld [vmem:[%s5310_s30 + $0x2b0] sm:$0xff]  ;;  %v650_v23 = vld [vmem:[%s5310_s30 + $0x300] sm:$0xff]  ;;  %v950_v28 = vpack.c.bf16 %v870_v15, %v862_v18 }
 0x1dc   : > { %v4409_v24 = vld [vmem:[%s5319_s8 + $0x1b4] ss:$8 sps:$4 sm:$0xff]   ;;  %v4407_v54 = vld [vmem:[%s5319_s8 + $0x1b0] ss:$8 sps:$4 sm:$0xff]   ;;  %v5739_v18 = vmul.f32 %v5584_v47, %v640_v5  ;;  %v874_v13 = vmul.f32 %v5657_v50, %v650_v23  ;;  %v5749_v5 = vpop.permute.xlu1 %775  ;;  %v4418_v23 = vld [vmem:[%s5319_s8 + $0x3c4] ss:$8 sps:$4 sm:$0xff]  }
 0x1dd   : > { %6544 = vst [vmem:[#allocation23_spill] sm:$0xff] %v5709_v35  ;;  %6545 = vst [vmem:[#allocation24_spill] sm:$0xff] %v5712_v43  ;;  %1902 = vmatpush1.bf16.msra.mxu1 %v4395_v52  ;;  %2128 = vmatpush1.bf16.msra.mxu0 %v4398_v53  ;;  %v5729_v53 = vmul.f32 %v5584_v47, %v636_v51  ;;  %v4410_v12 = vld [vmem:[%s5319_s8 + $0x3b0] ss:$8 sps:$4 sm:$0xff]   ;;  %v955_v51 = vpack.c.bf16 %v883_v42, %v875_v17  ;;  %v5751_v35 = vpop.permute.xlu0 %770  ;;  %v675_v43 = vld [vmem:[%s5310_s30 + $0x3c8] sm:$0xff] }
 0x1de   : > { %1903 = vmatprep.subr.bf16.mxu1 %v4403_v30  ;;  %2129 = vmatprep.subr.bf16.mxu0 %v4406_v31  ;;  %v5736_v30 = vmul.f32 %v5600_v57, %v644_v59  ;;  %6547 = vst [vmem:[#allocation26_spill] sm:$0xff] %v5739_v18  ;;  %v5742_v31 = vmul.f32 %v5600_v57, %v648_v10  ;;  %v652_v15 = vld [vmem:[%s5310_s30 + $0x310] sm:$0xff]  ;;  %v679_v17 = vld [vmem:[%s5310_s30 + $0x3e8] sm:$0xff] }
 0x1df   : > { %6546 = vst [vmem:[#allocation25_spill] sm:$0xff] %v5729_v53  ;;  %v959_v52 = vpack.c.bf16 %v887_v58, %v879_v55  ;;  %v656_v59 = vld [vmem:[%s5310_s30 + $0x330] sm:$0xff]  ;;  %v882_v10 = vmul.f32 %v5673_v4, %v658_v49  ;;  %v4415_v58 = vld [vmem:[%s5319_s8 + $0x1c4] ss:$8 sps:$4 sm:$0xff]   ;;  %v886_v49 = vmul.f32 %v5673_v4, %v662_v14  ;;  %v891_v14 = vmul.f32 %v5751_v35, %v667_v38 }
 0x1e0   : > { %6548 = vst [vmem:[#allocation27_spill] sm:$0xff] %v5742_v31  ;;  %1853 = vmatmul.mubr.bf16.gmra.mrb[20].mxu1 %v946_v11  ;;  %2079 = vmatmul.mubr.bf16.gmra.mrb[20].mxu0 %v950_v28  ;;  %v671_v11 = vld [vmem:[%s5310_s30 + $0x3a8] sm:$0xff]  ;;  %v5769_v28 = vmul.f32 %v5673_v4, %v660_v6  ;;  %v668_v55 = vld [vmem:[%s5310_s30 + $0x390] sm:$0xff]  ;;  %v903_v6 = vmul.f32 %v5749_v5, %v679_v17  ;;  %v666_v53 = vld [vmem:[%s5310_s30 + $0x380] sm:$0xff] }
 0x1e1   : > { %1904 = vmatpush1.bf16.msra.mxu1 %v4401_v40  ;;  %2130 = vmatpush1.bf16.msra.mxu0 %v4404_v7  ;;  %v878_v40 = vmul.f32 %v5657_v50, %v654_v48  ;;  %v5766_v7 = vmul.f32 %v5657_v50, %v652_v15  ;;  %v676_v48 = vld [vmem:[%s5310_s30 + $0x3d0] sm:$0xff]  ;;  %v899_v15 = vmul.f32 %v5749_v5, %v675_v43  ;;  %v678_v38 = vld [vmem:[%s5310_s30 + $0x3e0] sm:$0xff] }
 0x1e2   : > { %1862 = vmatprep.mubr.bf16.mxu1 %v955_v51  ;;  %2088 = vmatprep.mubr.bf16.mxu0 %v959_v52  ;;  %v5772_v52 = vmul.f32 %v5657_v50, %v656_v59  ;;  %v5775_v51 = vmul.f32 %v5673_v4, %v664_v46  ;;  %v680_v42 = vld [vmem:[%s5310_s30 + $0x3f0] sm:$0xff]  ;;  %v4413_v46 = vld [vmem:[%s5319_s8 + $0x1c0] ss:$8 sps:$4 sm:$0xff]   ;;  %v954_v18 = vpack.c.bf16 %v882_v10, %v874_v13 }
 0x1e3   : > { %1905 = vmatprep.subr.bf16.mxu1 %v4409_v24  ;;  %2131 = vmatprep.subr.bf16.mxu0 %v4412_v19  ;;  %v895_v24 = vmul.f32 %v5751_v35, %v671_v11  ;;  %v672_v19 = vld [vmem:[%s5310_s30 + $0x3b0] sm:$0xff]  ;;  %v4416_v59 = vld [vmem:[%s5319_s8 + $0x3c0] ss:$8 sps:$4 sm:$0xff]   ;;  %v958_v11 = vpack.c.bf16 %v886_v49, %v878_v40 }
 0x1e4   : > { %6549 = vst [vmem:[#allocation28_spill] sm:$0xff] %v5772_v52  ;;  %v4421_v17 = vld [vmem:[%s5319_s8 + $0x1d4] ss:$8 sps:$4 sm:$0xff]   ;;  %v674_v13 = vld [vmem:[%s5310_s30 + $0x3c0] sm:$0xff]  ;;  %v4419_v49 = vld [vmem:[%s5319_s8 + $0x1d0] ss:$8 sps:$4 sm:$0xff]  }
 0x1e5   : > { %1906 = vmatpush1.bf16.msra.mxu1 %v4407_v54  ;;  %2132 = vmatpush1.bf16.msra.mxu0 %v4410_v12  ;;  %v4424_v31 = vld [vmem:[%s5319_s8 + $0x3d4] ss:$8 sps:$4 sm:$0xff]   ;;  %v5795_v54 = vmul.f32 %v5751_v35, %v668_v55  ;;  %v5798_v12 = vmul.f32 %v5749_v5, %v676_v48  ;;  %v670_v10 = vld [vmem:[%s5310_s30 + $0x3a0] sm:$0xff]  ;;  %v963_v55 = vpack.c.bf16 %v899_v15, %v891_v14  ;;  %v4422_v43 = vld [vmem:[%s5319_s8 + $0x3d0] ss:$8 sps:$4 sm:$0xff]  }
 0x1e6   : > { %1907 = vmatprep.subr.bf16.mxu1 %v4415_v58  ;;  %2133 = vmatprep.subr.bf16.mxu0 %v4418_v23  ;;  %v5804_v58 = vmul.f32 %v5751_v35, %v672_v19  ;;  %v5807_v23 = vmul.f32 %v5749_v5, %v680_v42  ;;  %v967_v40 = vpack.c.bf16 %v903_v6, %v895_v24  ;;  %v565_v52 = vld [vmem:[%s5310_s30 + $0x58] sm:$0xff]  ;;  %v4427_v14 = vld [vmem:[%s5319_s8 + $0x1e4] ss:$8 sps:$4 sm:$0xff]  }
 0x1e7   : > { %v890_v19 = vmul.f32 %v5751_v35, %v666_v53  ;;  %v569_v42 = vld [vmem:[%s5310_s30 + $0x78] sm:$0xff]  ;;  %v4430_v15 = vld [vmem:[%s5319_s8 + $0x3e4] ss:$8 sps:$4 sm:$0xff]   ;;  %v898_v24 = vmul.f32 %v5749_v5, %v674_v13  ;;  %v894_v6 = vmul.f32 %v5751_v35, %v670_v10  ;;  %v4428_v13 = vld [vmem:[%s5319_s8 + $0x3e0] ss:$8 sps:$4 sm:$0xff]  }
 0x1e8   : > { %6550 = vst [vmem:[#allocation29_spill] sm:$0xff] %v5804_v58  ;;  %1863 = vmatmul.mubr.bf16.gmra.mrb[24].mxu1 %v954_v18  ;;  %2089 = vmatmul.mubr.bf16.gmra.mrb[24].mxu0 %v958_v11  ;;  %v561_v53 = vld [vmem:[%s5310_s30 + $0x38] sm:$0xff]  ;;  %v789_v11 = vmul.f32 %v5454_v36, %v565_v52 }
 0x1e9   : > { %1908 = vmatpush1.bf16.msra.mxu1 %v4413_v46  ;;  %2134 = vmatpush1.bf16.msra.mxu0 %v4416_v59  ;;  %v902_v46 = vmul.f32 %v5749_v5, %v678_v38  ;;  %v557_v59 = vld [vmem:[%s5310_s30 + $0x18] sm:$0xff]  ;;  %v785_v10 = vmul.f32 %v5439_v22, %v561_v53 }
 0x1ea   : > { %1872 = vmatprep.mubr.bf16.mxu1 %v963_v55  ;;  %2098 = vmatprep.mubr.bf16.mxu0 %v967_v40  ;;  %v793_v55 = vmul.f32 %v5454_v36, %v569_v42  ;;  %v4425_v40 = vld [vmem:[%s5319_s8 + $0x1e0] ss:$8 sps:$4 sm:$0xff]   ;;  %v781_v38 = vmul.f32 %v5439_v22, %v557_v59  ;;  %v4433_v52 = vld [vmem:[%s5319_s8 + $0x1f4] ss:$8 sps:$4 sm:$0xff]  }
 0x1eb   : > { %1909 = vmatprep.subr.bf16.mxu1 %v4421_v17  ;;  %2135 = vmatprep.subr.bf16.mxu0 %v4424_v31  ;;  %v962_v17 = vpack.c.bf16 %v898_v24, %v890_v19  ;;  %v966_v31 = vpack.c.bf16 %v902_v46, %v894_v6  ;;  %v4436_v18 = vld [vmem:[%s5319_s8 + $0x3f4] ss:$8 sps:$4 sm:$0xff]  }
 0x1ec   : > { %v573_v36 = vld [vmem:[%s5310_s30 + $0x98] sm:$0xff] }
 0x1ed   : > { %1910 = vmatpush1.bf16.msra.mxu1 %v4419_v49  ;;  %2136 = vmatpush1.bf16.msra.mxu0 %v4422_v43  ;;  %v909_v43 = vpack.c.bf16 %v789_v11, %v781_v38  ;;  %v913_v49 = vpack.c.bf16 %v793_v55, %v785_v10  ;;  %v581_v42 = vld [vmem:[%s5310_s30 + $0xd8] sm:$0xff]  ;;  %v797_v22 = vmul.f32 %v5437_v21, %v573_v36 }
 0x1ee   : > { %1911 = vmatprep.subr.bf16.mxu1 %v4427_v14  ;;  %2137 = vmatprep.subr.bf16.mxu0 %v4430_v15  ;;  %v577_v48 = vld [vmem:[%s5310_s30 + $0xb8] sm:$0xff]  ;;  %v805_v19 = vmul.f32 %v5460_v41, %v581_v42  ;;  %v6551_v11 = vpack.c.bf16 %v5551_v16, %v5564_v29  ;;  %v6552_v55 = vpack.c.bf16 %v5598_v56, %v5569_v32 }
 0x1ef   : > { %v585_v58 = vld [vmem:[%s5310_s30 + $0xf8] sm:$0xff]  ;;  %v801_v24 = vmul.f32 %v5437_v21, %v577_v48  ;;  %v6554_v38 = vpack.c.bf16 %v5608_v62, %v5577_v39  ;;  %v6555_v36 = vpack.c.bf16 %v5635_v25, %v5630_v20 }
 0x1f0   : > { %1873 = vmatmul.mubr.bf16.gmra.mrb[28].mxu1 %v962_v17  ;;  %2099 = vmatmul.mubr.bf16.gmra.mrb[28].mxu0 %v966_v31  ;;  %v4431_v14 = vld [vmem:[%s5319_s8 + $0x1f0] ss:$8 sps:$4 sm:$0xff]   ;;  %v809_v6 = vmul.f32 %v5460_v41, %v585_v58  ;;  %v917_v46 = vpack.c.bf16 %v805_v19, %v797_v22  ;;  %v6557_v22 = vpack.c.bf16 %v5671_v3, %v5668_v60 }
 0x1f1   : > { %1912 = vmatpush1.bf16.msra.mxu1 %v4425_v40  ;;  %2138 = vmatpush1.bf16.msra.mxu0 %v4428_v13  ;;  %v4434_v15 = vld [vmem:[%s5319_s8 + $0x3f0] ss:$8 sps:$4 sm:$0xff]   ;;  %v6553_v13 = vpack.c.bf16 %v5605_v61, %v5573_v37  ;;  %v6558_v19 = vpack.c.bf16 %v5680_v9, %v5677_v8 }
 0x1f2   : > { %1915 = vmatprep.mubr.bf16.mxu1 %v909_v43  ;;  %2141 = vmatprep.mubr.bf16.mxu0 %v913_v49  ;;  %v921_v59 = vpack.c.bf16 %v809_v6, %v801_v24  ;;  %v589_v53 = vld [vmem:[%s5310_s30 + $0x118] sm:$0xff]  ;;  %v6556_v43 = vpack.c.bf16 %v5641_v27, %v5638_v26 }
 0x1f3   : > { %1913 = vmatprep.subr.bf16.mxu1 %v4433_v52  ;;  %2139 = vmatprep.subr.bf16.mxu0 %v4436_v18  ;;  %v597_v18 = vld [vmem:[%s5310_s30 + $0x158] sm:$0xff]  ;;  %v813_v58 = vmul.f32 %v5481_v2, %v589_v53  ;;  %v6559_v53 = vpack.c.bf16 %v5703_v45, %v5700_v44 }
 0x1f4   : > { %v593_v21 = vld [vmem:[%s5310_s30 + $0x138] sm:$0xff]  ;;  %v821_v48 = vmul.f32 %v5479_v1, %v597_v18 }
 0x1f5   : > { %1914 = vmatpush1.bf16.msra.mxu1 %v4431_v14  ;;  %2140 = vmatpush1.bf16.msra.mxu0 %v4434_v15  ;;  %v601_v41 = vld [vmem:[%s5310_s30 + $0x178] sm:$0xff]  ;;  %v817_v40 = vmul.f32 %v5481_v2, %v593_v21 }
 0x1f6   : > { %v825_v16 = vmul.f32 %v5479_v1, %v601_v41  ;;  %v925_v29 = vpack.c.bf16 %v821_v48, %v813_v58  ;;  %v605_v56 = vld [vmem:[%s5310_s30 + $0x198] sm:$0xff] }
 0x1f7   : > { %v613_v17 = vld [vmem:[%s5310_s30 + $0x1d8] sm:$0xff]  ;;  %v829_v1 = vmul.f32 %v5509_v34, %v605_v56  ;;  %v6565_v56 = vld [vmem:[#allocation27_spill] sm:$0xff] }
 0x1f8   : > { %1916 = vmatmul.mubr.bf16.vlgmr.msra.gmra.mrb[0].mxu1 %v6551_v11  ;;  %2142 = vmatmul.mubr.bf16.vlgmr.msra.gmra.mrb[0].mxu0 %v6552_v55  ;;  %v929_v32 = vpack.c.bf16 %v825_v16, %v817_v40  ;;  %v609_v31 = vld [vmem:[%s5310_s30 + $0x1b8] sm:$0xff]  ;;  %v837_v10 = vmul.f32 %v5507_v33, %v613_v17  ;;  %v6560_v11 = vld [vmem:[#allocation24_spill] sm:$0xff]  ;;  %v6561_v55 = vld [vmem:[#allocation23_spill] sm:$0xff] }
 0x1f9   : > { %1925 = vmatprep.mubr.bf16.mxu1 %v917_v46  ;;  %2151 = vmatprep.mubr.bf16.mxu0 %v921_v59  ;;  %v617_v2 = vld [vmem:[%s5310_s30 + $0x1f8] sm:$0xff]  ;;  %v833_v52 = vmul.f32 %v5509_v34, %v609_v31  ;;  %v6562_v18 = vpack.c.bf16 %v6560_v11, %v6561_v55 }
 0x1fa   : > { %v841_v37 = vmul.f32 %v5507_v33, %v617_v2  ;;  %v933_v61 = vpack.c.bf16 %v837_v10, %v829_v1  ;;  %v621_v62 = vld [vmem:[%s5310_s30 + $0x218] sm:$0xff] }
 0x1fb   : > { %v629_v49 = vld [vmem:[%s5310_s30 + $0x258] sm:$0xff]  ;;  %v845_v33 = vmul.f32 %v5537_v0, %v621_v62  ;;  %v6571_v62 = vpack.c.bf16 %v5798_v12, %v5795_v54 }
 0x1fc   : > { %v937_v39 = vpack.c.bf16 %v841_v37, %v833_v52  ;;  %v625_v42 = vld [vmem:[%s5310_s30 + $0x238] sm:$0xff]  ;;  %v853_v14 = vmul.f32 %v5535_v63, %v629_v49  ;;  %v6568_v37 = vpack.c.bf16 %v5769_v28, %v5766_v7  ;;  %v971_v28 = vld [vmem:[#allocation2 + $0x8] sm:$0xff] }
 0x1fd   : > { %v633_v34 = vld [vmem:[%s5310_s30 + $0x278] sm:$0xff]  ;;  %v849_v15 = vmul.f32 %v5537_v0, %v625_v42 }
 0x1fe   : > { %v857_v20 = vmul.f32 %v5535_v63, %v633_v34  ;;  %v941_v25 = vpack.c.bf16 %v853_v14, %v845_v33  ;;  %v637_v27 = vld [vmem:[%s5310_s30 + $0x298] sm:$0xff]  ;;  %v972_v14 = vld [vmem:[#allocation2 + $0x10] sm:$0xff] }
 0x1ff   : > { %v645_v24 = vld [vmem:[%s5310_s30 + $0x2d8] sm:$0xff]  ;;  %v861_v63 = vmul.f32 %v5584_v47, %v637_v27 }
 0x200   : > { %1926 = vmatmul.mubr.bf16.gmra.mrb[4].mxu1 %v6553_v13  ;;  %2152 = vmatmul.mubr.bf16.gmra.mrb[4].mxu0 %v6554_v38  ;;  %v945_v26 = vpack.c.bf16 %v857_v20, %v849_v15  ;;  %v641_v6 = vld [vmem:[%s5310_s30 + $0x2b8] sm:$0xff]  ;;  %v869_v46 = vmul.f32 %v5600_v57, %v645_v24 }
 0x201   : > { %1935 = vmatprep.mubr.bf16.mxu1 %v925_v29  ;;  %2161 = vmatprep.mubr.bf16.mxu0 %v929_v32  ;;  %v649_v0 = vld [vmem:[%s5310_s30 + $0x2f8] sm:$0xff]  ;;  %v865_v59 = vmul.f32 %v5584_v47, %v641_v6  ;;  %v974_v6 = vld [vmem:[#allocation2 + $0x20] sm:$0xff] }
 0x202   : > { %v873_v60 = vmul.f32 %v5600_v57, %v649_v0  ;;  %v949_v3 = vpack.c.bf16 %v869_v46, %v861_v63  ;;  %v653_v9 = vld [vmem:[%s5310_s30 + $0x318] sm:$0xff] }
 0x203   : > { %v661_v21 = vld [vmem:[%s5310_s30 + $0x358] sm:$0xff]  ;;  %v877_v57 = vmul.f32 %v5657_v50, %v653_v9  ;;  %v976_v9 = vld [vmem:[#allocation2 + $0x30] sm:$0xff] }
 0x204   : > { %v953_v8 = vpack.c.bf16 %v873_v60, %v865_v59  ;;  %v657_v41 = vld [vmem:[%s5310_s30 + $0x338] sm:$0xff]  ;;  %v885_v58 = vmul.f32 %v5673_v4, %v661_v21  ;;  %v975_v59 = vld [vmem:[#allocation2 + $0x28] sm:$0xff] }
 0x205   : > { %v665_v47 = vld [vmem:[%s5310_s30 + $0x378] sm:$0xff]  ;;  %v881_v48 = vmul.f32 %v5657_v50, %v657_v41 }
 0x206   : > { %v889_v44 = vmul.f32 %v5673_v4, %v665_v47  ;;  %v957_v45 = vpack.c.bf16 %v885_v58, %v877_v57  ;;  %v669_v16 = vld [vmem:[%s5310_s30 + $0x398] sm:$0xff] }
 0x207   : > { %v6563_v29 = vld [vmem:[#allocation25_spill] sm:$0xff]  ;;  %v6566_v13 = vld [vmem:[#allocation26_spill] sm:$0xff]  ;;  %v893_v50 = vmul.f32 %v5751_v35, %v669_v16 }
 0x208   : > { %1936 = vmatmul.mubr.bf16.gmra.mrb[8].mxu1 %v6555_v36  ;;  %2162 = vmatmul.mubr.bf16.gmra.mrb[8].mxu0 %v6556_v43  ;;  %v961_v40 = vpack.c.bf16 %v889_v44, %v881_v48  ;;  %v6564_v32 = vpack.c.bf16 %v5736_v30, %v6563_v29  ;;  %v6567_v38 = vpack.c.bf16 %v6565_v56, %v6566_v13  ;;  %v677_v17 = vld [vmem:[%s5310_s30 + $0x3d8] sm:$0xff]  ;;  %v970_v43 = vld [vmem:[#allocation2] sm:$0xff] }
 0x209   : > { %1945 = vmatprep.mubr.bf16.mxu1 %v933_v61  ;;  %2171 = vmatprep.mubr.bf16.mxu0 %v937_v39  ;;  %v673_v31 = vld [vmem:[%s5310_s30 + $0x3b8] sm:$0xff]  ;;  %v901_v4 = vmul.f32 %v5749_v5, %v677_v17  ;;  %v6569_v61 = vld [vmem:[#allocation28_spill] sm:$0xff] }
 0x20a   : > { %v681_v2 = vld [vmem:[%s5310_s30 + $0x3f8] sm:$0xff]  ;;  %v897_v1 = vmul.f32 %v5751_v35, %v673_v31  ;;  %v6570_v39 = vpack.c.bf16 %v5775_v51, %v6569_v61  ;;  %v980_v17 = vld [vmem:[#allocation2 + $0x50] sm:$0xff]  ;;  %s4920_s30 = smov (!%p3868_p11), 64  }
 0x20b   : > { %v905_v10 = vmul.f32 %v5749_v5, %v681_v2  ;;  %v965_v52 = vpack.c.bf16 %v901_v4, %v893_v50  ;;  %v6572_v35 = vld [vmem:[#allocation29_spill] sm:$0xff] }
 0x20c   : > { %v6573_v36 = vpack.c.bf16 %v5807_v23, %v6572_v35  ;;  %v973_v54 = vld [vmem:[#allocation2 + $0x18] sm:$0xff] }
 0x20d   : > { %v969_v30 = vpack.c.bf16 %v905_v10, %v897_v1  ;;  %v977_v21 = vld [vmem:[#allocation2 + $0x38] sm:$0xff] }
 0x20e   : > { %v981_v1 = vld [vmem:[#allocation2 + $0x58] sm:$0xff] }
 0x210   : > { %1946 = vmatmul.mubr.bf16.gmra.mrb[12].mxu1 %v6557_v22  ;;  %2172 = vmatmul.mubr.bf16.gmra.mrb[12].mxu0 %v6558_v19 }
 0x211   : > { %1955 = vmatprep.mubr.bf16.mxu1 %v941_v25  ;;  %2181 = vmatprep.mubr.bf16.mxu0 %v945_v26 }
 0x218   : > { %1956 = vmatmul.mubr.bf16.gmra.mrb[16].mxu1 %v6559_v53  ;;  %2182 = vmatmul.mubr.bf16.gmra.mrb[16].mxu0 %v6562_v18 }
 0x219   : > { %1965 = vmatprep.mubr.bf16.mxu1 %v949_v3  ;;  %2191 = vmatprep.mubr.bf16.mxu0 %v953_v8 }
 0x220   : > { %1966 = vmatmul.mubr.bf16.gmra.mrb[20].mxu1 %v6564_v32  ;;  %2192 = vmatmul.mubr.bf16.gmra.mrb[20].mxu0 %v6567_v38  ;;  %v979_v32 = vld [vmem:[#allocation2 + $0x48] sm:$0xff] }
 0x221   : > { %1975 = vmatprep.mubr.bf16.mxu1 %v957_v45  ;;  %2201 = vmatprep.mubr.bf16.mxu0 %v961_v40  ;;  %v978_v45 = vld [vmem:[#allocation2 + $0x40] sm:$0xff] }
 0x228   : > { %1976 = vmatmul.mubr.bf16.gmra.mrb[24].mxu1 %v6568_v37  ;;  %2202 = vmatmul.mubr.bf16.gmra.mrb[24].mxu0 %v6570_v39 }
 0x229   : > { %1985 = vmatprep.mubr.bf16.mxu1 %v965_v52  ;;  %2211 = vmatprep.mubr.bf16.mxu0 %v969_v30 }
 0x230   : > { %1986 = vmatmul.mubr.bf16.gmra.mrb[28].mxu1 %v6571_v62  ;;  %2212 = vmatmul.mubr.bf16.gmra.mrb[28].mxu0 %v6573_v36  ;;  %v982_v62 = vld [vmem:[#allocation2 + $0x60] sm:$0xff] }
 0x2cb   : > { %v1917_v5 = vpop.f32.mrb[0].mxu1  ;;  %v2143_v49 = vpop.f32.mrb[0].mxu0 }
 0x2cc   : > { %v3987_v42 = vadd.f32 %v2143_v49, %v1917_v5  ;;  %v1919_v7 = vpop.f32.mrb[1].mxu1  ;;  %v2145_v34 = vpop.f32.mrb[1].mxu0 }
 0x2cd   : > { %v3988_v33 = vadd.f32 %v2145_v34, %v1919_v7  ;;  %v1921_v51 = vpop.f32.mrb[2].mxu1  ;;  %v2147_v15 = vpop.f32.mrb[2].mxu0 }
 0x2ce   : > { %v2222_v20 = vadd.f32 %v3987_v42, %v970_v43  ;;  %v3989_v25 = vadd.f32 %v2147_v15, %v1921_v51  ;;  %v1923_v26 = vpop.f32.mrb[3].mxu1  ;;  %v2149_v12 = vpop.f32.mrb[3].mxu0  ;;  %v983_v43 = vld [vmem:[#allocation2 + $0x68] sm:$0xff]  ;;  %v985_v15 = vld [vmem:[#allocation2 + $0x78] sm:$0xff] }
 0x2cf   : > { %v2223_v27 = vadd.f32 %v3988_v33, %v971_v28  ;;  %v3990_v22 = vadd.f32 %v2149_v12, %v1923_v26  ;;  %v984_v28 = vld [vmem:[#allocation2 + $0x70] sm:$0xff] }
 0x2d0   : > { %2254 = vst [vmem:[#allocation2] sm:$0xff] %v2222_v20  ;;  %v2224_v23 = vadd.f32 %v3989_v25, %v972_v14 }
 0x2d1   : > { %2255 = vst [vmem:[#allocation2 + $0x8] sm:$0xff] %v2223_v27  ;;  %v2225_v19 = vadd.f32 %v3990_v22, %v973_v54  ;;  %v986_v22 = vld [vmem:[#allocation2 + $0x80] sm:$0xff] }
 0x2d2   : > { %2256 = vst [vmem:[#allocation2 + $0x10] sm:$0xff] %v2224_v23 }
 0x2d3   : > { %2257 = vst [vmem:[#allocation2 + $0x18] sm:$0xff] %v2225_v19  ;;  %v1927_v24 = vpop.f32.mrb[4].mxu1  ;;  %v2153_v0 = vpop.f32.mrb[4].mxu0 }
 0x2d4   : > { %v3991_v63 = vadd.f32 %v2153_v0, %v1927_v24  ;;  %v1929_v46 = vpop.f32.mrb[5].mxu1  ;;  %v2155_v60 = vpop.f32.mrb[5].mxu0 }
 0x2d5   : > { %v3992_v3 = vadd.f32 %v2155_v60, %v1929_v46  ;;  %v1931_v8 = vpop.f32.mrb[6].mxu1  ;;  %v2157_v53 = vpop.f32.mrb[6].mxu0 }
 0x2d6   : > { %v2226_v11 = vadd.f32 %v3991_v63, %v974_v6  ;;  %v3993_v55 = vadd.f32 %v2157_v53, %v1931_v8  ;;  %v1933_v18 = vpop.f32.mrb[7].mxu1  ;;  %v2159_v41 = vpop.f32.mrb[7].mxu0  ;;  %v987_v6 = vld [vmem:[#allocation2 + $0x88] sm:$0xff]  ;;  %v989_v53 = vld [vmem:[#allocation2 + $0x98] sm:$0xff] }
 0x2d7   : > { %v2227_v47 = vadd.f32 %v3992_v3, %v975_v59  ;;  %v3994_v57 = vadd.f32 %v2159_v41, %v1933_v18  ;;  %v988_v59 = vld [vmem:[#allocation2 + $0x90] sm:$0xff] }
 0x2d8   : > { %2258 = vst [vmem:[#allocation2 + $0x20] sm:$0xff] %v2226_v11  ;;  %v2228_v58 = vadd.f32 %v3993_v55, %v976_v9 }
 0x2d9   : > { %2259 = vst [vmem:[#allocation2 + $0x28] sm:$0xff] %v2227_v47  ;;  %v2229_v48 = vadd.f32 %v3994_v57, %v977_v21  ;;  %v990_v57 = vld [vmem:[#allocation2 + $0xa0] sm:$0xff] }
 0x2da   : > { %2260 = vst [vmem:[#allocation2 + $0x30] sm:$0xff] %v2228_v58 }
 0x2db   : > { %2261 = vst [vmem:[#allocation2 + $0x38] sm:$0xff] %v2229_v48  ;;  %v1937_v44 = vpop.f32.mrb[8].mxu1  ;;  %v2163_v40 = vpop.f32.mrb[8].mxu0 }
 0x2dc   : > { %v3995_v16 = vadd.f32 %v2163_v40, %v1937_v44  ;;  %v1939_v29 = vpop.f32.mrb[9].mxu1  ;;  %v2165_v56 = vpop.f32.mrb[9].mxu0 }
 0x2dd   : > { %v3996_v13 = vadd.f32 %v2165_v56, %v1939_v29  ;;  %v1941_v38 = vpop.f32.mrb[10].mxu1  ;;  %v2167_v31 = vpop.f32.mrb[10].mxu0 }
 0x2de   : > { %v2230_v2 = vadd.f32 %v3995_v16, %v978_v45  ;;  %v3997_v50 = vadd.f32 %v2167_v31, %v1941_v38  ;;  %v1943_v4 = vpop.f32.mrb[11].mxu1  ;;  %v2169_v10 = vpop.f32.mrb[11].mxu0  ;;  %v991_v45 = vld [vmem:[#allocation2 + $0xa8] sm:$0xff]  ;;  %v993_v31 = vld [vmem:[#allocation2 + $0xb8] sm:$0xff] }
 0x2df   : > { %v2231_v52 = vadd.f32 %v3996_v13, %v979_v32  ;;  %v3998_v30 = vadd.f32 %v2169_v10, %v1943_v4  ;;  %v992_v32 = vld [vmem:[#allocation2 + $0xb0] sm:$0xff] }
 0x2e0   : > { %2262 = vst [vmem:[#allocation2 + $0x40] sm:$0xff] %v2230_v2  ;;  %v2232_v37 = vadd.f32 %v3997_v50, %v980_v17 }
 0x2e1   : > { %2263 = vst [vmem:[#allocation2 + $0x48] sm:$0xff] %v2231_v52  ;;  %v2233_v61 = vadd.f32 %v3998_v30, %v981_v1  ;;  %v994_v30 = vld [vmem:[#allocation2 + $0xc0] sm:$0xff] }
 0x2e2   : > { %2264 = vst [vmem:[#allocation2 + $0x50] sm:$0xff] %v2232_v37 }
 0x2e3   : > { %2265 = vst [vmem:[#allocation2 + $0x58] sm:$0xff] %v2233_v61  ;;  %v1947_v39 = vpop.f32.mrb[12].mxu1  ;;  %v2173_v35 = vpop.f32.mrb[12].mxu0 }
 0x2e4   : > { %v3999_v36 = vadd.f32 %v2173_v35, %v1947_v39  ;;  %v1949_v5 = vpop.f32.mrb[13].mxu1  ;;  %v2175_v49 = vpop.f32.mrb[13].mxu0 }
 0x2e5   : > { %v4000_v42 = vadd.f32 %v2175_v49, %v1949_v5  ;;  %v1951_v7 = vpop.f32.mrb[14].mxu1  ;;  %v2177_v34 = vpop.f32.mrb[14].mxu0 }
 0x2e6   : > { %v2234_v33 = vadd.f32 %v3999_v36, %v982_v62  ;;  %v4001_v51 = vadd.f32 %v2177_v34, %v1951_v7  ;;  %v1953_v14 = vpop.f32.mrb[15].mxu1  ;;  %v2179_v20 = vpop.f32.mrb[15].mxu0  ;;  %v995_v62 = vld [vmem:[#allocation2 + $0xc8] sm:$0xff]  ;;  %v997_v34 = vld [vmem:[#allocation2 + $0xd8] sm:$0xff] }
 0x2e7   : > { %v2235_v25 = vadd.f32 %v4000_v42, %v983_v43  ;;  %v4002_v26 = vadd.f32 %v2179_v20, %v1953_v14  ;;  %v996_v43 = vld [vmem:[#allocation2 + $0xd0] sm:$0xff] }
 0x2e8   : > { %2266 = vst [vmem:[#allocation2 + $0x60] sm:$0xff] %v2234_v33  ;;  %v2236_v54 = vadd.f32 %v4001_v51, %v984_v28 }
 0x2e9   : > { %2267 = vst [vmem:[#allocation2 + $0x68] sm:$0xff] %v2235_v25  ;;  %v2237_v12 = vadd.f32 %v4002_v26, %v985_v15  ;;  %v998_v26 = vld [vmem:[#allocation2 + $0xe0] sm:$0xff] }
 0x2ea   : > { %2268 = vst [vmem:[#allocation2 + $0x70] sm:$0xff] %v2236_v54 }
 0x2eb   : > { %2269 = vst [vmem:[#allocation2 + $0x78] sm:$0xff] %v2237_v12  ;;  %v1957_v27 = vpop.f32.mrb[16].mxu1  ;;  %v2183_v23 = vpop.f32.mrb[16].mxu0 }
 0x2ec   : > { %v4003_v19 = vadd.f32 %v2183_v23, %v1957_v27  ;;  %v1959_v24 = vpop.f32.mrb[17].mxu1  ;;  %v2185_v0 = vpop.f32.mrb[17].mxu0 }
 0x2ed   : > { %v4004_v63 = vadd.f32 %v2185_v0, %v1959_v24  ;;  %v1961_v46 = vpop.f32.mrb[18].mxu1  ;;  %v2187_v60 = vpop.f32.mrb[18].mxu0 }
 0x2ee   : > { %v2238_v3 = vadd.f32 %v4003_v19, %v986_v22  ;;  %v4005_v8 = vadd.f32 %v2187_v60, %v1961_v46  ;;  %v1963_v9 = vpop.f32.mrb[19].mxu1  ;;  %v2189_v11 = vpop.f32.mrb[19].mxu0  ;;  %v999_v22 = vld [vmem:[#allocation2 + $0xe8] sm:$0xff]  ;;  %v1001_v60 = vld [vmem:[#allocation2 + $0xf8] sm:$0xff] }
 0x2ef   : > { %v2239_v55 = vadd.f32 %v4004_v63, %v987_v6  ;;  %v4006_v18 = vadd.f32 %v2189_v11, %v1963_v9  ;;  %v1000_v6 = vld [vmem:[#allocation2 + $0xf0] sm:$0xff] }
 0x2f0   : > { %2270 = vst [vmem:[#allocation2 + $0x80] sm:$0xff] %v2238_v3  ;;  %v2240_v21 = vadd.f32 %v4005_v8, %v988_v59 }
 0x2f1   : > { %2271 = vst [vmem:[#allocation2 + $0x88] sm:$0xff] %v2239_v55  ;;  %v2241_v41 = vadd.f32 %v4006_v18, %v989_v53  ;;  %v4437_v55 = vld [vmem:[#allocation8 + $0x4] ss:$8 sps:$4 sm:$0xff] (!%p3868_p11)   ;;  %v4439_v18 = vld [vmem:[#allocation8] ss:$8 sps:$4 sm:$0xff] (!%p3868_p11)  }
 0x2f2   : > { %2272 = vst [vmem:[#allocation2 + $0x90] sm:$0xff] %v2240_v21  ;;  %2618 = vmatprep.subr.bf16.mxu0 (!%p3868_p11), %v4437_v55  ;;  %v4440_v21 = vld [vmem:[#allocation8 + $0x14] ss:$8 sps:$4 sm:$0xff] (!%p3868_p11)  }
 0x2f3   : > { %2273 = vst [vmem:[#allocation2 + $0x98] sm:$0xff] %v2241_v41  ;;  %v1967_v47 = vpop.f32.mrb[20].mxu1  ;;  %v2193_v58 = vpop.f32.mrb[20].mxu0  ;;  %2619 = vmatpush1.bf16.msra.mxu0 (!%p3868_p11), %v4439_v18  ;;  %v4442_v41 = vld [vmem:[#allocation8 + $0x10] ss:$8 sps:$4 sm:$0xff] (!%p3868_p11)  }
 0x2f4   : > { %v4007_v48 = vadd.f32 %v2193_v58, %v1967_v47  ;;  %v1969_v44 = vpop.f32.mrb[21].mxu1  ;;  %v2195_v40 = vpop.f32.mrb[21].mxu0  ;;  %2620 = vmatprep.subr.bf16.mxu0 (!%p3868_p11), %v4440_v21  ;;  %v4443_v47 = vld [vmem:[#allocation8 + $0x24] ss:$8 sps:$4 sm:$0xff] (!%p3868_p11)   ;;  %v4446_v58 = vld [vmem:[#allocation8 + $0x34] ss:$8 sps:$4 sm:$0xff] (!%p3868_p11)  }
 0x2f5   : > { %v4008_v16 = vadd.f32 %v2195_v40, %v1969_v44  ;;  %v1971_v29 = vpop.f32.mrb[22].mxu1  ;;  %v2197_v56 = vpop.f32.mrb[22].mxu0  ;;  %v2324_v44 = vlaneseq (!%p3868_p11)  ;;  %v4451_v40 = vld [vmem:[#allocation8 + $0x40] ss:$8 sps:$4 sm:$0xff] (!%p3868_p11)   ;;  %v4484_v21 = vld [vmem:[#allocation8 + $0xf0] ss:$8 sps:$4 sm:$0xff] (!%p3868_p11)  }
 0x2f6   : > { %v2242_v13 = vadd.f32 %v4007_v48, %v990_v57  ;;  %v4009_v38 = vadd.f32 %v2197_v56, %v1971_v29  ;;  %v1973_v17 = vpop.f32.mrb[23].mxu1  ;;  %v2199_v2 = vpop.f32.mrb[23].mxu0  ;;  %v4445_v57 = vld [vmem:[#allocation8 + $0x20] ss:$8 sps:$4 sm:$0xff] (!%p3868_p11)   ;;  %v4448_v48 = vld [vmem:[#allocation8 + $0x30] ss:$8 sps:$4 sm:$0xff] (!%p3868_p11)  }
 0x2f7   : > { %v2243_v50 = vadd.f32 %v4008_v16, %v991_v45  ;;  %v4010_v4 = vadd.f32 %v2199_v2, %v1973_v17  ;;  %2621 = vmatpush1.bf16.msra.mxu0 (!%p3868_p11), %v4442_v41  ;;  %v4449_v45 = vld [vmem:[#allocation8 + $0x44] ss:$8 sps:$4 sm:$0xff] (!%p3868_p11)   ;;  %v5940_v16 = vshrl.u32 (!%p3868_p11), %v2324_v44, 7  ;;  %v4452_v29 = vld [vmem:[#allocation8 + $0x54] ss:$8 sps:$4 sm:$0xff] (!%p3868_p11)  }
 0x2f8   : > { %2274 = vst [vmem:[#allocation2 + $0xa0] sm:$0xff] %v2242_v13  ;;  %v2244_v1 = vadd.f32 %v4009_v38, %v992_v32  ;;  %2622 = vmatprep.subr.bf16.mxu0 (!%p3868_p11), %v4443_v47  ;;  %v4454_v32 = vld [vmem:[#allocation8 + $0x50] ss:$8 sps:$4 sm:$0xff] (!%p3868_p11)   ;;  %v4455_v13 = vld [vmem:[#allocation8 + $0x64] ss:$8 sps:$4 sm:$0xff] (!%p3868_p11)  }
 0x2f9   : > { %2275 = vst [vmem:[#allocation2 + $0xa8] sm:$0xff] %v2243_v50  ;;  %v2245_v10 = vadd.f32 %v4010_v4, %v993_v31  ;;  %v2330_v56 = vsub.s32 (!%p3868_p11), 1, %v5940_v16  ;;  %v2291_v38 = vld [vmem:[#allocation2 + $0x8] sm:$0xff] (!%p3868_p11)  ;;  %v2293_v17 = vld [vmem:[#allocation2 + $0x18] sm:$0xff] (!%p3868_p11)  ;;  %v2322_v31 = vld [vmem:[#allocation7] sm:$0x3] (!%p3868_p11) }
 0x2fa   : > { %2276 = vst [vmem:[#allocation2 + $0xb0] sm:$0xff] %v2244_v1  ;;  %v4457_v2 = vld [vmem:[#allocation8 + $0x60] ss:$8 sps:$4 sm:$0xff] (!%p3868_p11)   ;;  %v4458_v4 = vld [vmem:[#allocation8 + $0x74] ss:$8 sps:$4 sm:$0xff] (!%p3868_p11)  }
 0x2fb   : > { %2277 = vst [vmem:[#allocation2 + $0xb8] sm:$0xff] %v2245_v10  ;;  %v1977_v52 = vpop.f32.mrb[24].mxu1  ;;  %v2203_v37 = vpop.f32.mrb[24].mxu0  ;;  %2623 = vmatpush1.bf16.msra.mxu0 (!%p3868_p11), %v4445_v57  ;;  %v5945_v50 = vrot.slane (!%p3868_p11), %v2322_v31, %v2330_v56  ;;  %v2294_v57 = vld [vmem:[#allocation2 + $0x20] sm:$0xff] (!%p3868_p11)  ;;  %v2301_v44 = vld [vmem:[#allocation2 + $0x58] sm:$0xff] (!%p3868_p11) }
 0x2fc   : > { %v4011_v61 = vadd.f32 %v2203_v37, %v1977_v52  ;;  %v1979_v39 = vpop.f32.mrb[25].mxu1  ;;  %v2205_v35 = vpop.f32.mrb[25].mxu0  ;;  %2624 = vmatprep.subr.bf16.mxu0 (!%p3868_p11), %v4446_v58  ;;  %v4460_v52 = vld [vmem:[#allocation8 + $0x70] ss:$8 sps:$4 sm:$0xff] (!%p3868_p11)  }
 0x2fd   : > { %v4012_v36 = vadd.f32 %v2205_v35, %v1979_v39  ;;  %v1981_v5 = vpop.f32.mrb[26].mxu1  ;;  %v2207_v49 = vpop.f32.mrb[26].mxu0  ;;  %v2335_v1 = vadd.f32 (!%p3868_p11), %v5945_v50, %v2291_v38  ;;  %v2337_v10 = vadd.f32 (!%p3868_p11), %v5945_v50, %v2293_v17  ;;  %v4486_v35 = vld [vmem:[#allocation11] sm:$0xff] (!%p3868_p11)   ;;  %v2296_v58 = vld [vmem:[#allocation2 + $0x30] sm:$0xff] (!%p3868_p11)  ;;  %v2345_v38 = vadd.f32 (!%p3868_p11), %v5945_v50, %v2301_v44 }
 0x2fe   : > { %v2246_v42 = vadd.f32 %v4011_v61, %v994_v30  ;;  %v4013_v7 = vadd.f32 %v2207_v49, %v1981_v5  ;;  %v1983_v28 = vpop.f32.mrb[27].mxu1  ;;  %v2209_v33 = vpop.f32.mrb[27].mxu0  ;;  %v4461_v61 = vld [vmem:[#allocation8 + $0x84] ss:$8 sps:$4 sm:$0xff] (!%p3868_p11)   ;;  %v4464_v5 = vld [vmem:[#allocation8 + $0x94] ss:$8 sps:$4 sm:$0xff] (!%p3868_p11)  }
 0x2ff   : > { %v2247_v51 = vadd.f32 %v4012_v36, %v995_v62  ;;  %v4014_v14 = vadd.f32 %v2209_v33, %v1983_v28  ;;  %2625 = vmatpush1.bf16.msra.mxu0 (!%p3868_p11), %v4448_v48  ;;  %v2367_v30 = vmax.f32 (!%p3868_p11), %v2335_v1, 0.0  ;;  %v2369_v37 = vmax.f32 (!%p3868_p11), %v2337_v10, 0.0  ;;  %v4485_v62 = vld [vmem:[#allocation11 + $0x40] sm:$0xff] (!%p3868_p11)   ;;  %v4488_v49 = vld [vmem:[#allocation11 + $0x8] sm:$0xff] (!%p3868_p11)   ;;  %v4490_v33 = vld [vmem:[#allocation11 + $0x10] sm:$0xff] (!%p3868_p11)  }
 0x300   : > { %2278 = vst [vmem:[#allocation2 + $0xc0] sm:$0xff] %v2246_v42  ;;  %v2248_v15 = vadd.f32 %v4013_v7, %v996_v43  ;;  %2626 = vmatprep.subr.bf16.mxu0 (!%p3868_p11), %v4449_v45  ;;  %v4463_v36 = vld [vmem:[#allocation8 + $0x80] ss:$8 sps:$4 sm:$0xff] (!%p3868_p11)   ;;  %3923 = vmatprep.subr.bf16.mxu1 (!%p3868_p11), %v4485_v62  ;;  %v4489_v42 = vld [vmem:[#allocation11 + $0x50] sm:$0xff] (!%p3868_p11)   ;;  %v4467_v28 = vld [vmem:[#allocation8 + $0xa4] ss:$8 sps:$4 sm:$0xff] (!%p3868_p11)  }
 0x301   : > { %2279 = vst [vmem:[#allocation2 + $0xc8] sm:$0xff] %v2247_v51  ;;  %v2249_v20 = vadd.f32 %v4014_v14, %v997_v34  ;;  %v2399_v39 = vpack.c.bf16 (!%p3868_p11), %v2369_v37, %v2367_v30  ;;  %v4487_v43 = vld [vmem:[#allocation11 + $0x48] sm:$0xff] (!%p3868_p11)   ;;  %3924 = vmatpush3.bf16.msra.mxu1 (!%p3868_p11), %v4486_v35  ;;  %v4491_v51 = vld [vmem:[#allocation11 + $0x58] sm:$0xff] (!%p3868_p11)  }
 0x302   : > { %2280 = vst [vmem:[#allocation2 + $0xd0] sm:$0xff] %v2248_v15  ;;  %3925 = vmatprep.subr.bf16.mxu1 (!%p3868_p11), %v4487_v43  ;;  %v4466_v7 = vld [vmem:[#allocation8 + $0x90] ss:$8 sps:$4 sm:$0xff] (!%p3868_p11)   ;;  %v4469_v34 = vld [vmem:[#allocation8 + $0xa0] ss:$8 sps:$4 sm:$0xff] (!%p3868_p11)  }
 0x303   : > { %2281 = vst [vmem:[#allocation2 + $0xd8] sm:$0xff] %v2249_v20  ;;  %v1987_v25 = vpop.f32.mrb[28].mxu1  ;;  %v2213_v54 = vpop.f32.mrb[28].mxu0  ;;  %2627 = vmatpush1.bf16.msra.mxu0 (!%p3868_p11), %v4451_v40  ;;  %2650 = vmatprep.mubr.bf16.mxu0 (!%p3868_p11), %v2399_v39  ;;  %v4470_v14 = vld [vmem:[#allocation8 + $0xb4] ss:$8 sps:$4 sm:$0xff] (!%p3868_p11)   ;;  %v2299_v48 = vld [vmem:[#allocation2 + $0x48] sm:$0xff] (!%p3868_p11) }
 0x304   : > { %v4015_v12 = vadd.f32 %v2213_v54, %v1987_v25  ;;  %v1989_v27 = vpop.f32.mrb[29].mxu1  ;;  %v2215_v23 = vpop.f32.mrb[29].mxu0  ;;  %2628 = vmatprep.subr.bf16.mxu0 (!%p3868_p11), %v4452_v29  ;;  %v4492_v15 = vld [vmem:[#allocation11 + $0x18] sm:$0xff] (!%p3868_p11)   ;;  %v4493_v25 = vld [vmem:[#allocation11 + $0x60] sm:$0xff] (!%p3868_p11)   ;;  %v2300_v10 = vld [vmem:[#allocation2 + $0x50] sm:$0xff] (!%p3868_p11) }
 0x305   : > { %v4016_v19 = vadd.f32 %v2215_v23, %v1989_v27  ;;  %v1991_v24 = vpop.f32.mrb[30].mxu1  ;;  %v2217_v0 = vpop.f32.mrb[30].mxu0  ;;  %2289 = sbr.rel (%p3868_p11) target bundleno = 2100 (0x834), region = 88  ;;  %3926 = vmatpush3.bf16.msra.mxu1 (!%p3868_p11), %v4488_v49  ;;  %v4472_v20 = vld [vmem:[#allocation8 + $0xb0] ss:$8 sps:$4 sm:$0xff] (!%p3868_p11)   ;;  %v4494_v54 = vld [vmem:[#allocation11 + $0x20] sm:$0xff] (!%p3868_p11)  }
 0x306   : > { %v2250_v63 = vadd.f32 %v4015_v12, %v998_v26  ;;  %v4017_v46 = vadd.f32 %v2217_v0, %v1991_v24  ;;  %v1993_v59 = vpop.f32.mrb[31].mxu1  ;;  %v2219_v3 = vpop.f32.mrb[31].mxu0  ;;  %3927 = vmatprep.subr.bf16.mxu1 (!%p3868_p11), %v4489_v42  ;;  %v4473_v26 = vld [vmem:[#allocation8 + $0xc4] ss:$8 sps:$4 sm:$0xff] (!%p3868_p11)   ;;  %v2326_v12 = vsub.s32 (!%p3868_p11), 0, %v5940_v16  ;;  %v2305_v30 = vld [vmem:[#allocation2 + $0x78] sm:$0xff] (!%p3868_p11) }
 0x307   : > { %v2251_v8 = vadd.f32 %v4016_v19, %v999_v22  ;;  %v4018_v9 = vadd.f32 %v2219_v3, %v1993_v59  ;;  %2629 = vmatpush1.bf16.msra.mxu0 (!%p3868_p11), %v4454_v32  ;;  %v4495_v27 = vld [vmem:[#allocation11 + $0x68] sm:$0xff] (!%p3868_p11)   ;;  %v4476_v23 = vld [vmem:[#allocation8 + $0xd4] ss:$8 sps:$4 sm:$0xff] (!%p3868_p11)  }
 0x308   : > { %2282 = vst [vmem:[#allocation2 + $0xe0] sm:$0xff] %v2250_v63  ;;  %v2252_v53 = vadd.f32 %v4017_v46, %v1000_v6  ;;  %2630 = vmatprep.subr.bf16.mxu0 (!%p3868_p11), %v4455_v13  ;;  %v4475_v22 = vld [vmem:[#allocation8 + $0xc0] ss:$8 sps:$4 sm:$0xff] (!%p3868_p11)   ;;  %v5952_v19 = vrot.slane (!%p3868_p11), %v2322_v31, %v2326_v12  ;;  %v4478_v24 = vld [vmem:[#allocation8 + $0xd0] ss:$8 sps:$4 sm:$0xff] (!%p3868_p11)   ;;  %v2343_v13 = vadd.f32 (!%p3868_p11), %v5945_v50, %v2299_v48 }
 0x309   : > { %2283 = vst [vmem:[#allocation2 + $0xe8] sm:$0xff] %v2251_v8  ;;  %v2253_v11 = vadd.f32 %v4018_v9, %v1001_v60  ;;  %3928 = vmatpush3.bf16.msra.mxu1 (!%p3868_p11), %v4490_v33  ;;  %v2290_v6 = vld [vmem:[#allocation2] sm:$0xff] (!%p3868_p11)  ;;  %v2292_v0 = vld [vmem:[#allocation2 + $0x10] sm:$0xff] (!%p3868_p11)  ;;  %v2295_v46 = vld [vmem:[#allocation2 + $0x28] sm:$0xff] (!%p3868_p11) }
 0x30a   : > { %2284 = vst [vmem:[#allocation2 + $0xf0] sm:$0xff] %v2252_v53  ;;  %3929 = vmatprep.subr.bf16.mxu1 (!%p3868_p11), %v4491_v51  ;;  %v4479_v63 = vld [vmem:[#allocation8 + $0xe4] ss:$8 sps:$4 sm:$0xff] (!%p3868_p11)   ;;  %v2297_v59 = vld [vmem:[#allocation2 + $0x38] sm:$0xff] (!%p3868_p11)  ;;  %v2334_v60 = vadd.f32 (!%p3868_p11), %v5952_v19, %v2290_v6  ;;  %v2336_v3 = vadd.f32 (!%p3868_p11), %v5952_v19, %v2292_v0  ;;  %v4481_v8 = vld [vmem:[#allocation8 + $0xe0] ss:$8 sps:$4 sm:$0xff] (!%p3868_p11)   ;;  %v2339_v9 = vadd.f32 (!%p3868_p11), %v5945_v50, %v2295_v46 }
 0x30b   : > { %2285 = vst [vmem:[#allocation2 + $0xf8] sm:$0xff] %v2253_v11  ;;  %2631 = vmatpush1.bf16.msra.mxu0 (!%p3868_p11), %v4457_v2  ;;  %v2341_v53 = vadd.f32 (!%p3868_p11), %v5945_v50, %v2297_v59  ;;  %v4482_v11 = vld [vmem:[#allocation8 + $0xf4] ss:$8 sps:$4 sm:$0xff] (!%p3868_p11)   ;;  %v2338_v40 = vadd.f32 (!%p3868_p11), %v5952_v19, %v2294_v57  ;;  %v2340_v29 = vadd.f32 (!%p3868_p11), %v5952_v19, %v2296_v58  ;;  %v2375_v2 = vmax.f32 (!%p3868_p11), %v2343_v13, 0.0 }
 0x30c   : > { %2632 = vmatprep.subr.bf16.mxu0 %v4458_v4  ;;  %v2366_v55 = vmax.f32 %v2334_v60, 0.0  ;;  %v2368_v18 = vmax.f32 %v2336_v3, 0.0  ;;  %v2371_v41 = vmax.f32 %v2339_v9, 0.0  ;;  %v2377_v4 = vmax.f32 %v2345_v38, 0.0  ;;  %v2298_v1 = vld [vmem:[#allocation2 + $0x40] sm:$0xff]  ;;  %v2309_v33 = vld [vmem:[#allocation2 + $0x98] sm:$0xff] }
 0x30d   : > { %3930 = vmatpush3.bf16.msra.mxu1 %v4492_v15  ;;  %v2373_v47 = vmax.f32 %v2341_v53, 0.0  ;;  %v2370_v17 = vmax.f32 %v2338_v40, 0.0  ;;  %v2372_v31 = vmax.f32 %v2340_v29, 0.0  ;;  %v2344_v39 = vadd.f32 %v5952_v19, %v2300_v10  ;;  %v2308_v6 = vld [vmem:[#allocation2 + $0x90] sm:$0xff]  ;;  %v2311_v53 = vld [vmem:[#allocation2 + $0xa8] sm:$0xff]  ;;  %v4499_v38 = vld [vmem:[#allocation11 + $0x78] sm:$0xff]  }
 0x30e   : > { %3931 = vmatprep.subr.bf16.mxu1 %v4493_v25  ;;  %v2398_v45 = vpack.c.bf16 %v2368_v18, %v2366_v55  ;;  %v2403_v62 = vpack.c.bf16 %v2377_v4, %v2375_v2  ;;  %v2352_v46 = vadd.f32 %v5952_v19, %v2308_v6  ;;  %v4496_v9 = vld [vmem:[#allocation11 + $0x28] sm:$0xff]   ;;  %v2355_v55 = vadd.f32 %v5945_v50, %v2311_v53  ;;  %v4498_v48 = vld [vmem:[#allocation11 + $0x30] sm:$0xff]   ;;  %v2314_v10 = vld [vmem:[#allocation2 + $0xc0] sm:$0xff] }
 0x30f   : > { %2633 = vmatpush1.bf16.msra.mxu0 %v4460_v52  ;;  %v2401_v32 = vpack.c.bf16 %v2373_v47, %v2371_v41  ;;  %v2303_v52 = vld [vmem:[#allocation2 + $0x68] sm:$0xff]  ;;  %v2400_v37 = vpack.c.bf16 %v2372_v31, %v2370_v17  ;;  %v2376_v43 = vmax.f32 %v2344_v39, 0.0  ;;  %v2312_v41 = vld [vmem:[#allocation2 + $0xb0] sm:$0xff]  ;;  %v4500_v17 = vld [vmem:[#allocation11 + $0x38] sm:$0xff]  }
 0x310   : > { %2634 = vmatprep.subr.bf16.mxu0 %v4461_v61  ;;  %v2342_v61 = vadd.f32 %v5952_v19, %v2298_v1  ;;  %v2347_v35 = vadd.f32 %v5945_v50, %v2303_v52  ;;  %v2384_v3 = vmax.f32 %v2352_v46, 0.0  ;;  %v4497_v47 = vld [vmem:[#allocation11 + $0x70] sm:$0xff]   ;;  %v2356_v58 = vadd.f32 %v5952_v19, %v2312_v41  ;;  %v2315_v31 = vld [vmem:[#allocation2 + $0xc8] sm:$0xff] }
 0x311   : > { %3932 = vmatpush3.bf16.msra.mxu1 %v4494_v54  ;;  %v2387_v44 = vmax.f32 %v2355_v55, 0.0  ;;  %v2317_v2 = vld [vmem:[#allocation2 + $0xd8] sm:$0xff]  ;;  %v2359_v4 = vadd.f32 %v5945_v50, %v2315_v31  ;;  %v2316_v52 = vld [vmem:[#allocation2 + $0xd0] sm:$0xff] }
 0x312   : > { %3933 = vmatprep.subr.bf16.mxu1 %v4495_v27  ;;  %v2379_v49 = vmax.f32 %v2347_v35, 0.0  ;;  %v2388_v29 = vmax.f32 %v2356_v58, 0.0  ;;  %v2361_v1 = vadd.f32 %v5945_v50, %v2317_v2 }
 0x313   : > { %2635 = vmatpush1.bf16.msra.mxu0 %v4463_v36  ;;  %v2349_v36 = vadd.f32 %v5945_v50, %v2305_v30  ;;  %v2358_v30 = vadd.f32 %v5952_v19, %v2314_v10 }
 0x314   : > { %2636 = vmatprep.subr.bf16.mxu0 %v4464_v5  ;;  %v2374_v5 = vmax.f32 %v2342_v61, 0.0  ;;  %v2391_v61 = vmax.f32 %v2359_v4, 0.0  ;;  %v2393_v39 = vmax.f32 %v2361_v1, 0.0 }
 0x315   : > { %v2381_v42 = vmax.f32 %v2349_v36, 0.0  ;;  %3934 = vmatpush3.bf16.msra.mxu1 %v4496_v9 }
 0x316   : > { %v2402_v51 = vpack.c.bf16 %v2376_v43, %v2374_v5  ;;  %3935 = vmatprep.subr.bf16.mxu1 %v4497_v47  ;;  %v2411_v36 = vpack.c.bf16 %v2393_v39, %v2391_v61  ;;  %v2319_v43 = vld [vmem:[#allocation2 + $0xe8] sm:$0xff] }
 0x317   : > { %2637 = vmatpush1.bf16.msra.mxu0 %v4466_v7  ;;  %v2302_v7 = vld [vmem:[#allocation2 + $0x60] sm:$0xff] }
 0x318   : > { %2638 = vmatprep.subr.bf16.mxu0 %v4467_v28  ;;  %v2304_v28 = vld [vmem:[#allocation2 + $0x70] sm:$0xff] }
 0x319   : > { %v2348_v15 = vadd.f32 %v5952_v19, %v2304_v28  ;;  %3936 = vmatpush3.bf16.msra.mxu1 %v4498_v48  ;;  %v2318_v28 = vld [vmem:[#allocation2 + $0xe0] sm:$0xff] }
 0x31a   : > { %3937 = vmatprep.subr.bf16.mxu1 %v4499_v38 }
 0x31b   : > { %2639 = vmatpush1.bf16.msra.mxu0 %v4469_v34  ;;  %v2307_v34 = vld [vmem:[#allocation2 + $0x88] sm:$0xff]  ;;  %v2380_v27 = vmax.f32 %v2348_v15, 0.0 }
 0x31c   : > { %2640 = vmatprep.subr.bf16.mxu0 %v4470_v14  ;;  %v2346_v14 = vadd.f32 %v5952_v19, %v2302_v7  ;;  %v2351_v25 = vadd.f32 %v5945_v50, %v2307_v34  ;;  %v2320_v34 = vld [vmem:[#allocation2 + $0xf0] sm:$0xff] }
 0x31d   : > { %3938 = vmatpush3.bf16.msra.mxu1 %v4500_v17 }
 0x31e   : > { %v2378_v54 = vmax.f32 %v2346_v14, 0.0 }
 0x31f   : > { %2641 = vmatpush1.bf16.msra.mxu0 %v4472_v20  ;;  %v2405_v20 = vpack.c.bf16 %v2381_v42, %v2379_v49  ;;  %v2321_v49 = vld [vmem:[#allocation2 + $0xf8] sm:$0xff]  ;;  %v2363_v42 = vadd.f32 %v5945_v50, %v2319_v43 }
 0x320   : > { %2642 = vmatprep.subr.bf16.mxu0 %v4473_v26  ;;  %v2353_v26 = vadd.f32 %v5945_v50, %v2309_v33  ;;  %v2404_v0 = vpack.c.bf16 %v2380_v27, %v2378_v54  ;;  %v2365_v7 = vadd.f32 %v5945_v50, %v2321_v49  ;;  %v2362_v33 = vadd.f32 %v5952_v19, %v2318_v28  ;;  %v2446_v27 = vld [vmem:[#allocation10] sm:$0x3] }
 0x321   : > { %v2395_v14 = vmax.f32 %v2363_v42, 0.0 }
 0x322   : > { %v2397_v15 = vmax.f32 %v2365_v7, 0.0 }
 0x323   : > { %2643 = vmatpush1.bf16.msra.mxu0 %v4475_v22  ;;  %v2383_v22 = vmax.f32 %v2351_v25, 0.0 }
 0x324   : > { %2644 = vmatprep.subr.bf16.mxu0 %v4476_v23  ;;  %v2385_v23 = vmax.f32 %v2353_v26, 0.0  ;;  %v2413_v26 = vpack.c.bf16 %v2397_v15, %v2395_v14 }
 0x326   : > { %v2407_v59 = vpack.c.bf16 %v2385_v23, %v2383_v22  ;;  %v5986_v22 = vrot.slane %v2446_v27, %v2326_v12 }
 0x327   : > { %2645 = vmatpush1.bf16.msra.mxu0 %v4478_v24  ;;  %v2306_v24 = vld [vmem:[#allocation2 + $0x80] sm:$0xff] }
 0x328   : > { %2646 = vmatprep.subr.bf16.mxu0 %v4479_v63  ;;  %v2350_v63 = vadd.f32 %v5952_v19, %v2306_v24 }
 0x32a   : > { %v2382_v60 = vmax.f32 %v2350_v63, 0.0 }
 0x32b   : > { %2647 = vmatpush1.bf16.msra.mxu0 %v4481_v8 }
 0x32c   : > { %2648 = vmatprep.subr.bf16.mxu0 %v4482_v11  ;;  %v2406_v8 = vpack.c.bf16 %v2384_v3, %v2382_v60  ;;  %v2313_v11 = vld [vmem:[#allocation2 + $0xb8] sm:$0xff] }
 0x32d   : > { %v2357_v18 = vadd.f32 %v5945_v50, %v2313_v11  ;;  %v5990_v50 = vrot.slane %v2446_v27, %v2330_v56 }
 0x32f   : > { %2649 = vmatpush1.bf16.msra.mxu0 %v4484_v21  ;;  %v2310_v21 = vld [vmem:[#allocation2 + $0xa0] sm:$0xff] }
 0x330   : > { %v2354_v57 = vadd.f32 %v5952_v19, %v2310_v21 }
 0x332   : > { %2651 = vmatmul.mubr.bf16.vlgmr.msra.gmra.mrb[0].mxu0 %v2398_v45  ;;  %v2389_v45 = vmax.f32 %v2357_v18, 0.0  ;;  %v2386_v40 = vmax.f32 %v2354_v57, 0.0 }
 0x333   : > { %2660 = vmatprep.mubr.bf16.mxu0 %v2401_v32 }
 0x334   : > { %v2409_v32 = vpack.c.bf16 %v2389_v45, %v2387_v44  ;;  %v2408_v13 = vpack.c.bf16 %v2388_v29, %v2386_v40 }
 0x33a   : > { %2661 = vmatmul.mubr.bf16.gmra.mrb[4].mxu0 %v2400_v37  ;;  %v2360_v37 = vadd.f32 %v5952_v19, %v2316_v52 }
 0x33b   : > { %2670 = vmatprep.mubr.bf16.mxu0 %v2403_v62  ;;  %v2390_v62 = vmax.f32 %v2358_v30, 0.0 }
 0x33c   : > { %v2392_v35 = vmax.f32 %v2360_v37, 0.0 }
 0x33e   : > { %v2410_v5 = vpack.c.bf16 %v2392_v35, %v2390_v62 }
 0x342   : > { %2671 = vmatmul.mubr.bf16.gmra.mrb[8].mxu0 %v2402_v51  ;;  %v2364_v51 = vadd.f32 %v5952_v19, %v2320_v34 }
 0x343   : > { %2680 = vmatprep.mubr.bf16.mxu0 %v2405_v20  ;;  %v2394_v20 = vmax.f32 %v2362_v33, 0.0 }
 0x344   : > { %v2396_v25 = vmax.f32 %v2364_v51, 0.0 }
 0x346   : > { %v2412_v54 = vpack.c.bf16 %v2396_v25, %v2394_v20 }
 0x34a   : > { %2681 = vmatmul.mubr.bf16.gmra.mrb[12].mxu0 %v2404_v0 }
 0x34b   : > { %2690 = vmatprep.mubr.bf16.mxu0 %v2407_v59 }
 0x352   : > { %2691 = vmatmul.mubr.bf16.gmra.mrb[16].mxu0 %v2406_v8 }
 0x353   : > { %2700 = vmatprep.mubr.bf16.mxu0 %v2409_v32 }
 0x35a   : > { %2701 = vmatmul.mubr.bf16.gmra.mrb[20].mxu0 %v2408_v13 }
 0x35b   : > { %2710 = vmatprep.mubr.bf16.mxu0 %v2411_v36 }
 0x362   : > { %2711 = vmatmul.mubr.bf16.gmra.mrb[24].mxu0 %v2410_v5 }
 0x363   : > { %2720 = vmatprep.mubr.bf16.mxu0 %v2413_v26 }
 0x36a   : > { %2721 = vmatmul.mubr.bf16.gmra.mrb[28].mxu0 %v2412_v54 }
 0x405   : > { %v2652_v23 = vpop.f32.mrb[0].mxu0 }
 0x406   : > { %v2653_v19 = vadd.f32 %v2652_v23, %v5986_v22  ;;  %v2654_v24 = vpop.f32.mrb[1].mxu0 }
 0x407   : > { %v2655_v6 = vadd.f32 %v2654_v24, %v5990_v50  ;;  %v2656_v0 = vpop.f32.mrb[2].mxu0 }
 0x408   : > { %v2657_v63 = vadd.f32 %v2656_v0, %v5986_v22  ;;  %v2658_v46 = vpop.f32.mrb[3].mxu0  ;;  %v2731_v60 = vmax.f32 %v2653_v19, 0.0 }
 0x409   : > { %v2659_v59 = vadd.f32 %v2658_v46, %v5990_v50  ;;  %v2732_v12 = vmax.f32 %v2655_v6, 0.0 }
 0x40a   : > { %v2733_v3 = vmax.f32 %v2657_v63, 0.0 }
 0x40b   : > { %v2734_v8 = vmax.f32 %v2659_v59, 0.0 }
 0x40c   : > { %v2763_v9 = vpack.c.bf16 %v2733_v3, %v2731_v60 }
 0x40d   : > { %v2764_v16 = vpack.c.bf16 %v2734_v8, %v2732_v12  ;;  %v2662_v56 = vpop.f32.mrb[4].mxu0 }
 0x40e   : > { %v2663_v53 = vadd.f32 %v2662_v56, %v5986_v22  ;;  %v2664_v11 = vpop.f32.mrb[5].mxu0 }
 0x40f   : > { %2946 = vmatprep.mubr.bf16.mxu1 %v2764_v16  ;;  %v2665_v55 = vadd.f32 %v2664_v11, %v5990_v50  ;;  %v2666_v18 = vpop.f32.mrb[6].mxu0 }
 0x410   : > { %2947 = vmatmul.mubr.bf16.vlgmr.msra.gmra.mrb[0].mxu1 %v2763_v9  ;;  %v2735_v21 = vmax.f32 %v2663_v53, 0.0  ;;  %v2667_v41 = vadd.f32 %v2666_v18, %v5986_v22  ;;  %v2668_v47 = vpop.f32.mrb[7].mxu0 }
 0x411   : > { %v2736_v57 = vmax.f32 %v2665_v55, 0.0  ;;  %v2669_v58 = vadd.f32 %v2668_v47, %v5990_v50 }
 0x412   : > { %v2737_v48 = vmax.f32 %v2667_v41, 0.0 }
 0x413   : > { %v2738_v44 = vmax.f32 %v2669_v58, 0.0 }
 0x414   : > { %v2765_v45 = vpack.c.bf16 %v2737_v48, %v2735_v21 }
 0x415   : > { %v2766_v40 = vpack.c.bf16 %v2738_v44, %v2736_v57  ;;  %v2672_v29 = vpop.f32.mrb[8].mxu0 }
 0x416   : > { %v2673_v32 = vadd.f32 %v2672_v29, %v5986_v22  ;;  %v2674_v13 = vpop.f32.mrb[9].mxu0 }
 0x417   : > { %2954 = vmatprep.mubr.bf16.mxu1 %v2766_v40  ;;  %v2675_v38 = vadd.f32 %v2674_v13, %v5990_v50  ;;  %v2676_v17 = vpop.f32.mrb[10].mxu0 }
 0x418   : > { %2955 = vmatmul.mubr.bf16.gmra.mrb[4].mxu1 %v2765_v45  ;;  %v2739_v31 = vmax.f32 %v2673_v32, 0.0  ;;  %v2677_v2 = vadd.f32 %v2676_v17, %v5986_v22  ;;  %v2678_v4 = vpop.f32.mrb[11].mxu0 }
 0x419   : > { %v2740_v1 = vmax.f32 %v2675_v38, 0.0  ;;  %v2679_v10 = vadd.f32 %v2678_v4, %v5990_v50 }
 0x41a   : > { %v2741_v52 = vmax.f32 %v2677_v2, 0.0 }
 0x41b   : > { %v2742_v30 = vmax.f32 %v2679_v10, 0.0 }
 0x41c   : > { %v2767_v37 = vpack.c.bf16 %v2741_v52, %v2739_v31 }
 0x41d   : > { %v2768_v61 = vpack.c.bf16 %v2742_v30, %v2740_v1  ;;  %v2682_v39 = vpop.f32.mrb[12].mxu0 }
 0x41e   : > { %v2683_v62 = vadd.f32 %v2682_v39, %v5986_v22  ;;  %v2684_v35 = vpop.f32.mrb[13].mxu0 }
 0x41f   : > { %2962 = vmatprep.mubr.bf16.mxu1 %v2768_v61  ;;  %v2685_v36 = vadd.f32 %v2684_v35, %v5990_v50  ;;  %v2686_v5 = vpop.f32.mrb[14].mxu0 }
 0x420   : > { %2963 = vmatmul.mubr.bf16.gmra.mrb[8].mxu1 %v2767_v37  ;;  %v2743_v43 = vmax.f32 %v2683_v62, 0.0  ;;  %v2687_v49 = vadd.f32 %v2686_v5, %v5986_v22  ;;  %v2688_v42 = vpop.f32.mrb[15].mxu0 }
 0x421   : > { %v2744_v7 = vmax.f32 %v2685_v36, 0.0  ;;  %v2689_v28 = vadd.f32 %v2688_v42, %v5990_v50 }
 0x422   : > { %v2745_v34 = vmax.f32 %v2687_v49, 0.0 }
 0x423   : > { %v2746_v33 = vmax.f32 %v2689_v28, 0.0  ;;  %v6024_v28 = vld [vmem:[#allocation13] ss:$0 sm:$0xff] }
 0x424   : > { %v2769_v51 = vpack.c.bf16 %v2745_v34, %v2743_v43 }
 0x425   : > { %v2770_v14 = vpack.c.bf16 %v2746_v33, %v2744_v7  ;;  %v2692_v15 = vpop.f32.mrb[16].mxu0 }
 0x426   : > { %v2693_v20 = vadd.f32 %v2692_v15, %v5986_v22  ;;  %v2694_v25 = vpop.f32.mrb[17].mxu0 }
 0x427   : > { %2970 = vmatprep.mubr.bf16.mxu1 %v2770_v14  ;;  %v2695_v26 = vadd.f32 %v2694_v25, %v5990_v50  ;;  %v2696_v54 = vpop.f32.mrb[18].mxu0 }
 0x428   : > { %2971 = vmatmul.mubr.bf16.gmra.mrb[12].mxu1 %v2769_v51  ;;  %v2747_v27 = vmax.f32 %v2693_v20, 0.0  ;;  %v2697_v23 = vadd.f32 %v2696_v54, %v5986_v22  ;;  %v2698_v19 = vpop.f32.mrb[19].mxu0 }
 0x429   : > { %v2748_v24 = vmax.f32 %v2695_v26, 0.0  ;;  %v2699_v6 = vadd.f32 %v2698_v19, %v5990_v50 }
 0x42a   : > { %v2749_v0 = vmax.f32 %v2697_v23, 0.0 }
 0x42b   : > { %v2750_v63 = vmax.f32 %v2699_v6, 0.0 }
 0x42c   : > { %v2771_v46 = vpack.c.bf16 %v2749_v0, %v2747_v27 }
 0x42d   : > { %v2772_v59 = vpack.c.bf16 %v2750_v63, %v2748_v24  ;;  %v2702_v60 = vpop.f32.mrb[20].mxu0 }
 0x42e   : > { %v2703_v3 = vadd.f32 %v2702_v60, %v5986_v22  ;;  %v2704_v12 = vpop.f32.mrb[21].mxu0 }
 0x42f   : > { %2978 = vmatprep.mubr.bf16.mxu1 %v2772_v59  ;;  %v2705_v8 = vadd.f32 %v2704_v12, %v5990_v50  ;;  %v2706_v9 = vpop.f32.mrb[22].mxu0 }
 0x430   : > { %2979 = vmatmul.mubr.bf16.gmra.mrb[16].mxu1 %v2771_v46  ;;  %v2751_v16 = vmax.f32 %v2703_v3, 0.0  ;;  %v2707_v56 = vadd.f32 %v2706_v9, %v5986_v22  ;;  %v2708_v53 = vpop.f32.mrb[23].mxu0 }
 0x431   : > { %v2752_v11 = vmax.f32 %v2705_v8, 0.0  ;;  %v2709_v55 = vadd.f32 %v2708_v53, %v5990_v50 }
 0x432   : > { %v2753_v18 = vmax.f32 %v2707_v56, 0.0 }
 0x433   : > { %v2754_v21 = vmax.f32 %v2709_v55, 0.0 }
 0x434   : > { %v2773_v41 = vpack.c.bf16 %v2753_v18, %v2751_v16 }
 0x435   : > { %v2774_v47 = vpack.c.bf16 %v2754_v21, %v2752_v11  ;;  %v2712_v57 = vpop.f32.mrb[24].mxu0 }
 0x436   : > { %v2713_v58 = vadd.f32 %v2712_v57, %v5986_v22  ;;  %v2714_v48 = vpop.f32.mrb[25].mxu0 }
 0x437   : > { %2986 = vmatprep.mubr.bf16.mxu1 %v2774_v47  ;;  %v2715_v44 = vadd.f32 %v2714_v48, %v5990_v50  ;;  %v2716_v45 = vpop.f32.mrb[26].mxu0 }
 0x438   : > { %2987 = vmatmul.mubr.bf16.gmra.mrb[20].mxu1 %v2773_v41  ;;  %v2755_v40 = vmax.f32 %v2713_v58, 0.0  ;;  %v2717_v29 = vadd.f32 %v2716_v45, %v5986_v22  ;;  %v2718_v32 = vpop.f32.mrb[27].mxu0 }
 0x439   : > { %v2756_v13 = vmax.f32 %v2715_v44, 0.0  ;;  %v2719_v38 = vadd.f32 %v2718_v32, %v5990_v50 }
 0x43a   : > { %v2757_v17 = vmax.f32 %v2717_v29, 0.0 }
 0x43b   : > { %v2758_v31 = vmax.f32 %v2719_v38, 0.0 }
 0x43c   : > { %v2775_v2 = vpack.c.bf16 %v2757_v17, %v2755_v40 }
 0x43d   : > { %v2776_v4 = vpack.c.bf16 %v2758_v31, %v2756_v13  ;;  %v2722_v1 = vpop.f32.mrb[28].mxu0 }
 0x43e   : > { %v2723_v10 = vadd.f32 %v2722_v1, %v5986_v22  ;;  %v2724_v52 = vpop.f32.mrb[29].mxu0 }
 0x43f   : > { %2994 = vmatprep.mubr.bf16.mxu1 %v2776_v4  ;;  %v2725_v30 = vadd.f32 %v2724_v52, %v5990_v50  ;;  %v2726_v37 = vpop.f32.mrb[30].mxu0 }
 0x440   : > { %2995 = vmatmul.mubr.bf16.gmra.mrb[24].mxu1 %v2775_v2  ;;  %v2759_v61 = vmax.f32 %v2723_v10, 0.0  ;;  %v2727_v39 = vadd.f32 %v2726_v37, %v5986_v22  ;;  %v2728_v62 = vpop.f32.mrb[31].mxu0 }
 0x441   : > { %v2760_v35 = vmax.f32 %v2725_v30, 0.0  ;;  %v2729_v36 = vadd.f32 %v2728_v62, %v5990_v50 }
 0x442   : > { %v2761_v5 = vmax.f32 %v2727_v39, 0.0 }
 0x443   : > { %v2762_v43 = vmax.f32 %v2729_v36, 0.0 }
 0x444   : > { %v2777_v49 = vpack.c.bf16 %v2761_v5, %v2759_v61 }
 0x445   : > { %v2778_v42 = vpack.c.bf16 %v2762_v43, %v2760_v35 }
 0x447   : > { %3002 = vmatprep.mubr.bf16.mxu1 %v2778_v42 }
 0x448   : > { %3003 = vmatmul.mubr.bf16.gmra.mrb[28].mxu1 %v2777_v49 }
 0x4e3   : > { %v3939_v7 = vpop.f32.mrb[0].mxu1 }
 0x4e4   : > { %v3940_v34 = vpop.f32.mrb[1].mxu1 }
 0x4e5   : > { %v3941_v33 = vadd.f32 %v3940_v34, %v3939_v7  ;;  %v3942_v51 = vpop.f32.mrb[2].mxu1 }
 0x4e6   : > { %v3943_v14 = vpop.f32.mrb[3].mxu1 }
 0x4e7   : > { %v6027_v22 = vadd.f32 %v3941_v33, %v6024_v28  ;;  %v3944_v15 = vadd.f32 %v3943_v14, %v3942_v51 }
 0x4e9   : > { %v6030_v50 = vadd.f32 %v3944_v15, %v6024_v28  ;;  %v3317_v20 = vsel %vm3235_vm0, %v6027_v22, -inf  ;;  %v3027_v55 = vmul.f32 %v6027_v22, %v6027_v22 }
 0x4ea   : > { %3318 = vmax.xlane.f32.xlu0 %v3317_v20 }
 0x4eb   : > { %v3320_v25 = vsel %vm3235_vm0, %v6030_v50, -inf  ;;  %v3945_v26 = vpop.f32.mrb[4].mxu1  ;;  %v3028_v41 = vmul.f32 %v6030_v50, %v6030_v50 }
 0x4ec   : > { %3321 = vmax.xlane.f32.xlu1 %v3320_v25  ;;  %v3946_v54 = vpop.f32.mrb[5].mxu1 }
 0x4ed   : > { %v3947_v27 = vadd.f32 %v3946_v54, %v3945_v26  ;;  %v3948_v23 = vpop.f32.mrb[6].mxu1 }
 0x4ee   : > { %v3949_v19 = vpop.f32.mrb[7].mxu1 }
 0x4ef   : > { %v3950_v24 = vadd.f32 %v3949_v19, %v3948_v23  ;;  %v6037_v63 = vadd.f32 %v3947_v27, %v6024_v28 }
 0x4f1   : > { %v6040_v12 = vadd.f32 %v3950_v24, %v6024_v28  ;;  %v3029_v8 = vmul.f32 %v6037_v63, %v6037_v63  ;;  %v3323_v29 = vsel %vm3235_vm0, %v6037_v63, -inf }
 0x4f3   : > { %v3951_v6 = vpop.f32.mrb[8].mxu1  ;;  %v3030_v56 = vmul.f32 %v6040_v12, %v6040_v12  ;;  %v3326_v13 = vsel %vm3235_vm0, %v6040_v12, -inf }
 0x4f4   : > { %v3952_v0 = vpop.f32.mrb[9].mxu1 }
 0x4f5   : > { %v3953_v46 = vadd.f32 %v3952_v0, %v3951_v6  ;;  %v3954_v59 = vpop.f32.mrb[10].mxu1 }
 0x4f6   : > { %v3955_v60 = vpop.f32.mrb[11].mxu1 }
 0x4f7   : > { %v3956_v3 = vadd.f32 %v3955_v60, %v3954_v59  ;;  %v6055_v40 = vadd.f32 %v3953_v46, %v6024_v28 }
 0x4f9   : > { %v3329_v32 = vsel %vm3235_vm0, %v6055_v40, -inf  ;;  %v6064_v38 = vadd.f32 %v3956_v3, %v6024_v28  ;;  %v3031_v31 = vmul.f32 %v6055_v40, %v6055_v40 }
 0x4fb   : > { %v3957_v9 = vpop.f32.mrb[12].mxu1  ;;  %v3032_v17 = vmul.f32 %v6064_v38, %v6064_v38  ;;  %v3332_v39 = vsel %vm3235_vm0, %v6064_v38, -inf }
 0x4fc   : > { %v3958_v16 = vpop.f32.mrb[13].mxu1 }
 0x4fd   : > { %3063 = vrot.lane.b32.xlu1 %v3029_v8, %s4920_s30  ;;  %v3959_v53 = vadd.f32 %v3958_v16, %v3957_v9  ;;  %v3960_v11 = vpop.f32.mrb[14].mxu1 }
 0x4fe   : > { %v3961_v18 = vpop.f32.mrb[15].mxu1 }
 0x4ff   : > { %v3962_v21 = vadd.f32 %v3961_v18, %v3960_v11  ;;  %v6073_v37 = vadd.f32 %v3959_v53, %v6024_v28 }
 0x500   : > { %3059 = vrot.lane.b32.xlu0 %v3027_v55, %s4920_s30 }
 0x501   : > { %3065 = vrot.lane.b32.xlu1 %v3030_v56, %s4920_s30  ;;  %v3335_v61 = vsel %vm3235_vm0, %v6073_v37, -inf  ;;  %v6080_v62 = vadd.f32 %v3962_v21, %v6024_v28  ;;  %v3033_v36 = vmul.f32 %v6073_v37, %v6073_v37 }
 0x503   : > { %v3963_v47 = vpop.f32.mrb[16].mxu1  ;;  %v3034_v35 = vmul.f32 %v6080_v62, %v6080_v62  ;;  %v3338_v14 = vsel %vm3235_vm0, %v6080_v62, -inf }
 0x504   : > { %3061 = vrot.lane.b32.xlu0 %v3028_v41, %s4920_s30  ;;  %v3964_v57 = vpop.f32.mrb[17].mxu1 }
 0x505   : > { %v3965_v58 = vadd.f32 %v3964_v57, %v3963_v47  ;;  %v3966_v48 = vpop.f32.mrb[18].mxu1 }
 0x506   : > { %v3967_v44 = vpop.f32.mrb[19].mxu1 }
 0x507   : > { %v3968_v45 = vadd.f32 %v3967_v44, %v3966_v48  ;;  %v6089_v33 = vadd.f32 %v3965_v58, %v6024_v28  ;;  %v3123_v58 = vmul.f32 1.442695, %v6027_v22 }
 0x509   : > { %v3341_v51 = vsel %vm3235_vm0, %v6089_v33, -inf  ;;  %v6096_v15 = vadd.f32 %v3968_v45, %v6024_v28  ;;  %v3035_v25 = vmul.f32 %v6089_v33, %v6089_v33  ;;  %4501 = vpow2.f32 %v3123_v58 }
 0x50a   : > { %v3127_v45 = vmul.f32 1.442695, %v6037_v63 }
 0x50b   : > { %v3969_v2 = vpop.f32.mrb[20].mxu1  ;;  %v3036_v20 = vmul.f32 %v6096_v15, %v6096_v15  ;;  %v3344_v46 = vsel %vm3235_vm0, %v6096_v15, -inf }
 0x50c   : > { %v3970_v4 = vpop.f32.mrb[21].mxu1  ;;  %4503 = vpow2.f32 %v3127_v45  ;;  %v3131_v45 = vmul.f32 1.442695, %v6055_v40 }
 0x50d   : > { %v3971_v1 = vadd.f32 %v3970_v4, %v3969_v2  ;;  %v3972_v10 = vpop.f32.mrb[22].mxu1 }
 0x50e   : > { %v3973_v52 = vpop.f32.mrb[23].mxu1 }
 0x50f   : > { %v3974_v30 = vadd.f32 %v3973_v52, %v3972_v10  ;;  %v6105_v6 = vadd.f32 %v3971_v1, %v6024_v28  ;;  %v3133_v1 = vmul.f32 1.442695, %v6064_v38  ;;  %v3013_v52 = vadd.f32 1.0, %v6037_v63 }
 0x511   : > { %v3347_v0 = vsel %vm3235_vm0, %v6105_v6, -inf  ;;  %v6112_v59 = vadd.f32 %v3974_v30, %v6024_v28  ;;  %v3037_v3 = vmul.f32 %v6105_v6, %v6105_v6 }
 0x513   : > { %v3975_v5 = vpop.f32.mrb[24].mxu1  ;;  %v3038_v60 = vmul.f32 %v6112_v59, %v6112_v59  ;;  %v3350_v16 = vsel %vm3235_vm0, %v6112_v59, -inf }
 0x514   : > { %v3976_v43 = vpop.f32.mrb[25].mxu1 }
 0x515   : > { %v3977_v49 = vadd.f32 %v3976_v43, %v3975_v5  ;;  %v3978_v42 = vpop.f32.mrb[26].mxu1 }
 0x516   : > { %v3979_v7 = vpop.f32.mrb[27].mxu1 }
 0x517   : > { %v3980_v34 = vadd.f32 %v3979_v7, %v3978_v42  ;;  %v6121_v8 = vadd.f32 %v3977_v49, %v6024_v28  ;;  %v3141_v7 = vmul.f32 1.442695, %v6096_v15 }
 0x519   : > { %v3353_v9 = vsel %vm3235_vm0, %v6121_v8, -inf  ;;  %v6128_v56 = vadd.f32 %v3980_v34, %v6024_v28  ;;  %v3039_v11 = vmul.f32 %v6121_v8, %v6121_v8  ;;  %v3016_v34 = vadd.f32 1.0, %v6064_v38 }
 0x51b   : > { %v3981_v26 = vpop.f32.mrb[28].mxu1  ;;  %v3040_v53 = vmul.f32 %v6128_v56, %v6128_v56  ;;  %v3356_v47 = vsel %vm3235_vm0, %v6128_v56, -inf }
 0x51c   : > { %v3982_v54 = vpop.f32.mrb[29].mxu1 }
 0x51d   : > { %v3983_v27 = vadd.f32 %v3982_v54, %v3981_v26  ;;  %v3984_v23 = vpop.f32.mrb[30].mxu1  ;;  %v3018_v26 = vadd.f32 1.0, %v6080_v62 }
 0x51e   : > { %v3985_v19 = vpop.f32.mrb[31].mxu1 }
 0x51f   : > { %v3986_v24 = vadd.f32 %v3985_v19, %v3984_v23  ;;  %v6139_v18 = vadd.f32 %v3983_v27, %v6024_v28 }
 0x521   : > { %v3359_v41 = vsel %vm3235_vm0, %v6139_v18, -inf  ;;  %v3041_v43 = vmul.f32 %v6139_v18, %v6139_v18 }
 0x523   : > { %3324 = vmax.xlane.f32.xlu0 %v3323_v29  ;;  %v6152_v29 = vadd.f32 %v3986_v24, %v6024_v28  ;;  %v4502_v28 = vpop.eup %4501  ;;  %v3020_v24 = vadd.f32 1.0, %v6096_v15 }
 0x525   : > { %3330 = vmax.xlane.f32.xlu1 %v3329_v32  ;;  %v3042_v2 = vmul.f32 %v6152_v29, %v6152_v29 }
 0x527   : > { %3327 = vmax.xlane.f32.xlu0 %v3326_v13  ;;  %v3129_v13 = vmul.f32 1.442695, %v6040_v12 }
 0x529   : > { %4505 = vpow2.f32 %v3129_v13  ;;  %v3135_v13 = vmul.f32 1.442695, %v6073_v37 }
 0x52a   : > { %4507 = vpow2.f32 %v3133_v1  ;;  %v3015_v1 = vadd.f32 1.0, %v6055_v40 }
 0x536   : > { %3069 = vrot.lane.b32.xlu1 %v3032_v17, %s4920_s30 }
 0x53d   : > { %3067 = vrot.lane.b32.xlu0 %v3031_v31, %s4920_s30  ;;  %v3011_v31 = vadd.f32 1.0, %v6027_v22 }
 0x55a   : > { %3336 = vmax.xlane.f32.xlu1 %v3335_v61 }
 0x55c   : > { %3333 = vmax.xlane.f32.xlu0 %v3332_v39  ;;  %v3137_v39 = vmul.f32 1.442695, %v6080_v62 }
 0x55e   : > { %4509 = vpow2.f32 %v3137_v39 }
 0x55f   : > { %4511 = vpow2.f32 %v3141_v7  ;;  %v3149_v7 = vmul.f32 1.442695, %v6128_v56 }
 0x56b   : > { %3073 = vrot.lane.b32.xlu1 %v3034_v35, %s4920_s30  ;;  %v3014_v35 = vadd.f32 1.0, %v6040_v12 }
 0x572   : > { %3071 = vrot.lane.b32.xlu0 %v3033_v36, %s4920_s30  ;;  %v4504_v36 = vpop.eup %4503 }
 0x577   : > { %v6146_v48 = vpop.xlane.xlu0 %3318 }
 0x579   : > { %v6136_v55 = vpop.xlane.xlu1 %3321 }
 0x57b   : > { %v3060_v32 = vpop.permute.xlu0 %3059 }
 0x57c   : > { %v3107_v4 = vsub.f32 %v3011_v31, %v3060_v32 }
 0x57d   : > { %v3064_v21 = vpop.permute.xlu1 %3063 }
 0x57e   : > { %v3155_v30 = vsub.f32 %v3107_v4, %v4502_v28  ;;  %v3109_v61 = vsub.f32 %v3013_v52, %v3064_v21  ;;  %v3362_v21 = vsel %vm3235_vm0, %v6152_v29, -inf }
 0x580   : > { %v3157_v49 = vsub.f32 %v3109_v61, %v4504_v36 }
 0x581   : > { %v3066_v57 = vpop.permute.xlu1 %3065 }
 0x582   : > { %v3110_v42 = vsub.f32 %v3014_v35, %v3066_v57  ;;  %v3125_v57 = vmul.f32 1.442695, %v6030_v50  ;;  %v3145_v35 = vmul.f32 1.442695, %v6112_v59 }
 0x58f   : > { %3342 = vmax.xlane.f32.xlu1 %v3341_v51  ;;  %v4506_v51 = vpop.eup %4505 }
 0x590   : > { %v4508_v54 = vpop.eup %4507 }
 0x591   : > { %3339 = vmax.xlane.f32.xlu0 %v3338_v14 }
 0x5a0   : > { %3077 = vrot.lane.b32.xlu1 %v3036_v20, %s4920_s30  ;;  %v3158_v20 = vsub.f32 %v3110_v42, %v4506_v51 }
 0x5a7   : > { %3075 = vrot.lane.b32.xlu0 %v3035_v25, %s4920_s30 }
 0x5b2   : > { %v6148_v44 = vpop.xlane.xlu1 %3330 }
 0x5b6   : > { %v3070_v17 = vpop.permute.xlu1 %3069 }
 0x5b7   : > { %v3112_v25 = vsub.f32 %v3016_v34, %v3070_v17  ;;  %v3012_v17 = vadd.f32 1.0, %v6030_v50  ;;  %v3019_v34 = vadd.f32 1.0, %v6089_v33 }
 0x5b9   : > { %v3160_v27 = vsub.f32 %v3112_v25, %v4508_v54 }
 0x5c4   : > { %3348 = vmax.xlane.f32.xlu1 %v3347_v0  ;;  %v4510_v0 = vpop.eup %4509 }
 0x5c6   : > { %3345 = vmax.xlane.f32.xlu0 %v3344_v46 }
 0x5d5   : > { %3081 = vrot.lane.b32.xlu1 %v3038_v60, %s4920_s30 }
 0x5dc   : > { %3079 = vrot.lane.b32.xlu0 %v3037_v3, %s4920_s30  ;;  %v4512_v3 = vpop.eup %4511 }
 0x5e7   : > { %v6159_v10 = vpop.xlane.xlu1 %3336 }
 0x5eb   : > { %v3074_v5 = vpop.permute.xlu1 %3073 }
 0x5ec   : > { %v3114_v23 = vsub.f32 %v3018_v26, %v3074_v5 }
 0x5ee   : > { %v3162_v46 = vsub.f32 %v3114_v23, %v4510_v0 }
 0x5f9   : > { %3354 = vmax.xlane.f32.xlu1 %v3353_v9 }
 0x5fb   : > { %3351 = vmax.xlane.f32.xlu0 %v3350_v16  ;;  %v3062_v16 = vpop.permute.xlu0 %3061 }
 0x60a   : > { %3085 = vrot.lane.b32.xlu1 %v3040_v53, %s4920_s30  ;;  %v6180_v53 = vpop.xlane.xlu0 %3324 }
 0x611   : > { %3083 = vrot.lane.b32.xlu0 %v3039_v11, %s4920_s30  ;;  %v6182_v11 = vpop.xlane.xlu0 %3327 }
 0x615   : > { %v3068_v58 = vpop.permute.xlu0 %3067 }
 0x616   : > { %v3111_v61 = vsub.f32 %v3015_v1, %v3068_v58 }
 0x619   : > { %v6190_v32 = vpop.xlane.xlu0 %3333 }
 0x61c   : > { %v6172_v14 = vpop.xlane.xlu1 %3342 }
 0x61d   : > { %v3072_v31 = vpop.permute.xlu0 %3071 }
 0x620   : > { %v3078_v19 = vpop.permute.xlu1 %3077 }
 0x621   : > { %v3116_v60 = vsub.f32 %v3020_v24, %v3078_v19  ;;  %v6198_v28 = vpop.xlane.xlu0 %3339 }
 0x623   : > { %v3164_v9 = vsub.f32 %v3116_v60, %v4512_v3 }
 0x625   : > { %v3076_v42 = vpop.permute.xlu0 %3075 }
 0x626   : > { %v3115_v25 = vsub.f32 %v3019_v34, %v3076_v42  ;;  %v3371_v42 = vsub.f32 %v6073_v37, %v6159_v10  ;;  %v3147_v10 = vmul.f32 1.442695, %v6121_v8 }
 0x628   : > { %v3393_v34 = vmul.f32 1.442695, %v3371_v42 }
 0x62e   : > { %3360 = vmax.xlane.f32.xlu1 %v3359_v41  ;;  %v3366_v41 = vsub.f32 %v6030_v50, %v6136_v55  ;;  %v3139_v55 = vmul.f32 1.442695, %v6089_v33  ;;  %v3017_v50 = vadd.f32 1.0, %v6073_v37 }
 0x630   : > { %3357 = vmax.xlane.f32.xlu0 %v3356_v47  ;;  %v3383_v47 = vmul.f32 1.442695, %v3366_v41  ;;  %v3365_v41 = vsub.f32 %v6027_v22, %v6146_v48 }
 0x632   : > { %4513 = vpow2.f32 %v3383_v47  ;;  %v3381_v47 = vmul.f32 1.442695, %v3365_v41 }
 0x633   : > { %4515 = vpow2.f32 %v3125_v57  ;;  %v3369_v57 = vsub.f32 %v6055_v40, %v6148_v44  ;;  %v3153_v40 = vmul.f32 1.442695, %v6152_v29  ;;  %v3021_v44 = vadd.f32 1.0, %v6105_v6 }
 0x634   : > { %4517 = vpow2.f32 %v3131_v45 }
 0x635   : > { %4519 = vpow2.f32 %v3135_v13  ;;  %v3389_v45 = vmul.f32 1.442695, %v3369_v57 }
 0x636   : > { %4521 = vpow2.f32 %v3139_v55 }
 0x637   : > { %4523 = vpow2.f32 %v3145_v35 }
 0x638   : > { %4525 = vpow2.f32 %v3149_v7 }
 0x639   : > { %4527 = vpow2.f32 %v3381_v47 }
 0x63a   : > { %4529 = vpow2.f32 %v3389_v45 }
 0x63c   : > { %v6195_v4 = vpop.eup %4513 }
 0x63d   : > { %v4516_v52 = vpop.eup %4515  ;;  %v3416_v39 = vsel %vm3235_vm0, %v6195_v4, 0.0 }
 0x63e   : > { %v4518_v36 = vpop.eup %4517 }
 0x63f   : > { %3089 = vrot.lane.b32.xlu1 %v3042_v2, %s4920_s30  ;;  %v3108_v2 = vsub.f32 %v3012_v17, %v3062_v16  ;;  %v4520_v51 = vpop.eup %4519  ;;  %v3143_v17 = vmul.f32 1.442695, %v6105_v6 }
 0x640   : > { %v4522_v54 = vpop.eup %4521 }
 0x641   : > { %v3163_v23 = vsub.f32 %v3115_v25, %v4522_v54  ;;  %v4524_v0 = vpop.eup %4523  ;;  %4531 = vpow2.f32 %v3143_v17 }
 0x642   : > { %v4526_v16 = vpop.eup %4525  ;;  %4533 = vpow2.f32 %v3153_v40 }
 0x643   : > { %3187 = vrot.lane.b32.xlu1 %v3155_v30, %s4920_s30  ;;  %v3156_v30 = vsub.f32 %v3108_v2, %v4516_v52  ;;  %v6220_v58 = vpop.eup %4527 }
 0x644   : > { %v3413_v13 = vsel %vm3235_vm0, %v6220_v58, 0.0  ;;  %v6227_v22 = vpop.eup %4529 }
 0x645   : > { %v3425_v2 = vsel %vm3235_vm0, %v6227_v22, 0.0 }
 0x646   : > { %3087 = vrot.lane.b32.xlu0 %v3041_v43, %s4920_s30  ;;  %v3159_v43 = vsub.f32 %v3111_v61, %v4518_v36  ;;  %v3026_v61 = vadd.f32 1.0, %v6152_v29 }
 0x647   : > { %3191 = vrot.lane.b32.xlu1 %v3157_v49, %s4920_s30  ;;  %v3113_v49 = vsub.f32 %v3017_v50, %v3072_v31 }
 0x64b   : > { %3193 = vrot.lane.b32.xlu1 %v3158_v20, %s4920_s30  ;;  %v3161_v20 = vsub.f32 %v3113_v49, %v4520_v51  ;;  %v4532_v1 = vpop.eup %4531  ;;  %v3373_v51 = vsub.f32 %v6089_v33, %v6172_v14 }
 0x64c   : > { %v4534_v35 = vpop.eup %4533 }
 0x64d   : > { %v3397_v25 = vmul.f32 1.442695, %v3373_v51 }
 0x64f   : > { %3197 = vrot.lane.b32.xlu1 %v3160_v27, %s4920_s30  ;;  %v3022_v27 = vadd.f32 1.0, %v6112_v59 }
 0x651   : > { %v6205_v5 = vpop.xlane.xlu1 %3348 }
 0x653   : > { %3201 = vrot.lane.b32.xlu1 %v3162_v46, %s4920_s30  ;;  %v3024_v46 = vadd.f32 1.0, %v6128_v56  ;;  %v6225_v31 = vpop.xlane.xlu0 %3345 }
 0x655   : > { %v3082_v26 = vpop.permute.xlu1 %3081 }
 0x656   : > { %v3118_v19 = vsub.f32 %v3022_v27, %v3082_v26 }
 0x657   : > { %3205 = vrot.lane.b32.xlu1 %v3164_v9, %s4920_s30  ;;  %v3080_v48 = vpop.permute.xlu0 %3079 }
 0x658   : > { %v3166_v60 = vsub.f32 %v3118_v19, %v4524_v0  ;;  %v3117_v55 = vsub.f32 %v3021_v44, %v3080_v48  ;;  %v3368_v44 = vsub.f32 %v6040_v12, %v6182_v11 }
 0x65a   : > { %v3165_v52 = vsub.f32 %v3117_v55, %v4532_v1 }
 0x665   : > { %3363 = vmax.xlane.f32.xlu0 %v3362_v21 }
 0x67b   : > { %3189 = vrot.lane.b32.xlu0 %v3156_v30, %s4920_s30  ;;  %3417 = vadd.xlane.f32.xlu1 %v3416_v39 }
 0x67f   : > { %3195 = vrot.lane.b32.xlu0 %v3159_v43, %s4920_s30  ;;  %v3367_v43 = vsub.f32 %v6037_v63, %v6180_v53  ;;  %v3375_v63 = vsub.f32 %v6105_v6, %v6205_v5 }
 0x681   : > { %v3385_v49 = vmul.f32 1.442695, %v3367_v43  ;;  %v3401_v26 = vmul.f32 1.442695, %v3375_v63 }
 0x683   : > { %3199 = vrot.lane.b32.xlu0 %v3161_v20, %s4920_s30  ;;  %4535 = vpow2.f32 %v3385_v49 }
 0x684   : > { %4537 = vpow2.f32 %v3393_v34 }
 0x685   : > { %4539 = vpow2.f32 %v3397_v25  ;;  %v3025_v25 = vadd.f32 1.0, %v6139_v18 }
 0x686   : > { %v3355_v24 = vpop.xlane.xlu1 %3354  ;;  %4541 = vpow2.f32 %v3401_v26 }
 0x687   : > { %3203 = vrot.lane.b32.xlu0 %v3163_v23, %s4920_s30  ;;  %v3377_v37 = vsub.f32 %v6121_v8, %v3355_v24  ;;  %4543 = vpow2.f32 %v3147_v10  ;;  %v3023_v24 = vadd.f32 1.0, %v6121_v8  ;;  %v3370_v10 = vsub.f32 %v6064_v38, %v6190_v32 }
 0x688   : > { %v6248_v53 = vpop.xlane.xlu0 %3351 }
 0x689   : > { %v3405_v54 = vmul.f32 1.442695, %v3377_v37  ;;  %v3376_v38 = vsub.f32 %v6112_v59, %v6248_v53 }
 0x68a   : > { %v3086_v3 = vpop.permute.xlu1 %3085 }
 0x68b   : > { %v3120_v9 = vsub.f32 %v3024_v46, %v3086_v3  ;;  %4545 = vpow2.f32 %v3405_v54  ;;  %v3391_v54 = vmul.f32 1.442695, %v3370_v10 }
 0x68c   : > { %3209 = vrot.lane.b32.xlu1 %v3166_v60, %s4920_s30  ;;  %v3084_v14 = vpop.permute.xlu0 %3083 }
 0x68d   : > { %v3168_v21 = vsub.f32 %v3120_v9, %v4526_v16  ;;  %v6240_v7 = vpop.eup %4535  ;;  %v3119_v46 = vsub.f32 %v3023_v24, %v3084_v14 }
 0x68e   : > { %v3419_v20 = vsel %vm3235_vm0, %v6240_v7, 0.0  ;;  %v6253_v27 = vpop.eup %4537 }
 0x68f   : > { %v3431_v19 = vsel %vm3235_vm0, %v6253_v27, 0.0  ;;  %v6259_v0 = vpop.eup %4539 }
 0x690   : > { %3213 = vrot.lane.b32.xlu1 %v3168_v21, %s4920_s30  ;;  %v3437_v3 = vsel %vm3235_vm0, %v6259_v0, 0.0  ;;  %v6264_v9 = vpop.eup %4541 }
 0x691   : > { %v4544_v16 = vpop.eup %4543  ;;  %v3443_v47 = vsel %vm3235_vm0, %v6264_v9, 0.0 }
 0x692   : > { %v3167_v41 = vsub.f32 %v3119_v46, %v4544_v16 }
 0x695   : > { %v6268_v57 = vpop.eup %4545 }
 0x6a6   : > { %3414 = vadd.xlane.f32.xlu0 %v3413_v13  ;;  %v3449_v13 = vsel %vm3235_vm0, %v6268_v57, 0.0 }
 0x6b4   : > { %3426 = vadd.xlane.f32.xlu1 %v3425_v2 }
 0x6bb   : > { %v3361_v30 = vpop.xlane.xlu1 %3360 }
 0x6bc   : > { %3207 = vrot.lane.b32.xlu0 %v3165_v52, %s4920_s30  ;;  %v3379_v33 = vsub.f32 %v6139_v18, %v3361_v30  ;;  %v3387_v52 = vmul.f32 1.442695, %v3368_v44 }
 0x6bd   : > { %v6255_v5 = vpop.xlane.xlu0 %3357 }
 0x6be   : > { %v3409_v6 = vmul.f32 1.442695, %v3379_v33  ;;  %v3372_v33 = vsub.f32 %v6080_v62, %v6198_v28  ;;  %v3403_v28 = vmul.f32 1.442695, %v3376_v38  ;;  %v3378_v46 = vsub.f32 %v6128_v56, %v6255_v5 }
 0x6bf   : > { %v3090_v39 = vpop.permute.xlu1 %3089 }
 0x6c0   : > { %v3122_v50 = vsub.f32 %v3026_v61, %v3090_v39  ;;  %4547 = vpow2.f32 %v3409_v6  ;;  %v3395_v14 = vmul.f32 1.442695, %v3372_v33 }
 0x6c1   : > { %v3088_v21 = vpop.permute.xlu0 %3087  ;;  %4549 = vpow2.f32 %v3387_v52 }
 0x6c2   : > { %v3170_v36 = vsub.f32 %v3122_v50, %v4534_v35  ;;  %v3121_v63 = vsub.f32 %v3025_v25, %v3088_v21 }
 0x6c3   : > { %v3188_v23 = vpop.permute.xlu1 %3187 }
 0x6c4   : > { %v3236_v55 = vsel %vm3235_vm0, %v3188_v23, 0.0 }
 0x6c5   : > { %3217 = vrot.lane.b32.xlu1 %v3170_v36, %s4920_s30 }
 0x6c7   : > { %v3192_v60 = vpop.permute.xlu1 %3191 }
 0x6c8   : > { %v3242_v61 = vsel %vm3235_vm0, %v3192_v60, 0.0 }
 0x6ca   : > { %v6277_v17 = vpop.eup %4547 }
 0x6cb   : > { %v6271_v8 = vpop.permute.xlu1 %3193  ;;  %v3455_v40 = vsel %vm3235_vm0, %v6277_v17, 0.0  ;;  %v6295_v43 = vpop.eup %4549 }
 0x6cc   : > { %v3422_v42 = vsel %vm3235_vm0, %v6295_v43, 0.0 }
 0x6cf   : > { %v6281_v2 = vpop.permute.xlu1 %3197 }
 0x6d0   : > { %v3251_v52 = vsel %vm3235_vm0, %v6281_v2, 0.0 }
 0x6d3   : > { %v6288_v30 = vpop.permute.xlu1 %3201 }
 0x6d7   : > { %v6291_v50 = vpop.permute.xlu1 %3205 }
 0x6db   : > { %3420 = vadd.xlane.f32.xlu0 %v3419_v20  ;;  %v3151_v20 = vmul.f32 1.442695, %v6139_v18  ;;  %v3374_v18 = vsub.f32 %v6096_v15, %v6225_v31 }
 0x6dd   : > { %v3399_v24 = vmul.f32 1.442695, %v3374_v18 }
 0x6e9   : > { %3432 = vadd.xlane.f32.xlu1 %v3431_v19 }
 0x6ed   : > { %3438 = vadd.xlane.f32.xlu1 %v3437_v3  ;;  %v3407_v3 = vmul.f32 1.442695, %v3378_v46 }
 0x6f1   : > { %3211 = vrot.lane.b32.xlu0 %v3167_v41, %s4920_s30  ;;  %3444 = vadd.xlane.f32.xlu1 %v3443_v47 }
 0x6f2   : > { %v6273_v45 = vpop.xlane.xlu0 %3363 }
 0x6f3   : > { %v3380_v59 = vsub.f32 %v6152_v29, %v6273_v45 }
 0x6f5   : > { %3450 = vadd.xlane.f32.xlu1 %v3449_v13  ;;  %v3411_v56 = vmul.f32 1.442695, %v3380_v59 }
 0x6f6   : > { %v6279_v48 = vpop.permute.xlu0 %3189 }
 0x6f9   : > { %3456 = vadd.xlane.f32.xlu1 %v3455_v40 }
 0x6fa   : > { %v3196_v1 = vpop.permute.xlu0 %3195 }
 0x6fb   : > { %v3248_v35 = vsel %vm3235_vm0, %v3196_v1, 0.0  ;;  %v3245_v1 = vsel %vm3235_vm0, %v6271_v8, 0.0 }
 0x6fd   : > { %3237 = vadd.xlane.f32.xlu1 %v3236_v55 }
 0x6fe   : > { %v3200_v39 = vpop.permute.xlu0 %3199 }
 0x6ff   : > { %v3254_v12 = vsel %vm3235_vm0, %v3200_v39, 0.0  ;;  %v3257_v39 = vsel %vm3235_vm0, %v6288_v30, 0.0 }
 0x701   : > { %3243 = vadd.xlane.f32.xlu1 %v3242_v61 }
 0x702   : > { %v3204_v11 = vpop.permute.xlu0 %3203 }
 0x703   : > { %v3260_v49 = vsel %vm3235_vm0, %v3204_v11, 0.0 }
 0x705   : > { %3249 = vadd.xlane.f32.xlu1 %v3248_v35 }
 0x708   : > { %v3418_v36 = vpop.xlane.xlu1 %3417 }
 0x709   : > { %4551 = vrcp.f32 %v3418_v36  ;;  %3255 = vadd.xlane.f32.xlu1 %v3254_v12 }
 0x70a   : > { %4553 = vpow2.f32 %v3151_v20 }
 0x70c   : > { %v3210_v23 = vpop.permute.xlu1 %3209 }
 0x70d   : > { %3261 = vadd.xlane.f32.xlu1 %v3260_v49  ;;  %v3269_v8 = vsel %vm3235_vm0, %v3210_v23, 0.0 }
 0x710   : > { %3423 = vadd.xlane.f32.xlu0 %v3422_v42  ;;  %v3214_v32 = vpop.permute.xlu1 %3213 }
 0x711   : > { %v3275_v30 = vsel %vm3235_vm0, %v3214_v32, 0.0 }
 0x713   : > { %v4552_v34 = vpop.eup %4551 }
 0x714   : > { %v3478_v51 = vmul.f32 %v4552_v34, %v6195_v4  ;;  %v4554_v26 = vpop.eup %4553 }
 0x715   : > { %v3169_v37 = vsub.f32 %v3121_v63, %v4554_v26 }
 0x716   : > { %3494 = vst.msk [vmem:[%s5346_s29 + $0x8] sm:$0xff] %vm3235_vm0, %v3478_v51 }
 0x726   : > { %3215 = vrot.lane.b32.xlu0 %v3169_v37, %s4920_s30 }
 0x733   : > { %v3415_v4 = vpop.xlane.xlu0 %3414 }
 0x734   : > { %4555 = vrcp.f32 %v3415_v4 }
 0x735   : > { %4557 = vpow2.f32 %v3391_v54 }
 0x736   : > { %4559 = vpow2.f32 %v3395_v14 }
 0x737   : > { %v3208_v6 = vpop.permute.xlu0 %3207  ;;  %4561 = vpow2.f32 %v3399_v24 }
 0x738   : > { %v3266_v19 = vsel %vm3235_vm0, %v3208_v6, 0.0 }
 0x739   : > { %3267 = vadd.xlane.f32.xlu1 %v3266_v19 }
 0x73e   : > { %v4556_v62 = vpop.eup %4555 }
 0x73f   : > { %v3477_v60 = vmul.f32 %v4556_v62, %v6220_v58  ;;  %v6318_v15 = vpop.eup %4557 }
 0x740   : > { %v3428_v53 = vsel %vm3235_vm0, %v6318_v15, 0.0  ;;  %v6326_v16 = vpop.eup %4559 }
 0x741   : > { %3493 = vst.msk [vmem:[%s5346_s29] sm:$0xff] %vm3235_vm0, %v3477_v60  ;;  %v3427_v31 = vpop.xlane.xlu1 %3426  ;;  %v3434_v58 = vsel %vm3235_vm0, %v6326_v16, 0.0  ;;  %v6330_v5 = vpop.eup %4561 }
 0x742   : > { %4563 = vrcp.f32 %v3427_v31  ;;  %v3440_v41 = vsel %vm3235_vm0, %v6330_v5, 0.0 }
 0x743   : > { %4565 = vpow2.f32 %v3403_v28 }
 0x744   : > { %4567 = vpow2.f32 %v3407_v3 }
 0x745   : > { %3429 = vadd.xlane.f32.xlu0 %v3428_v53  ;;  %4569 = vpow2.f32 %v3411_v56  ;;  %v3218_v2 = vpop.permute.xlu1 %3217 }
 0x749   : > { %3435 = vadd.xlane.f32.xlu0 %v3434_v58 }
 0x74c   : > { %v4564_v21 = vpop.eup %4563 }
 0x74d   : > { %v6334_v29 = vpop.eup %4565  ;;  %v3481_v47 = vmul.f32 %v4564_v21, %v6227_v22  ;;  %3441 = vadd.xlane.f32.xlu0 %v3440_v41  ;;  %v3239_v22 = vsel %vm3235_vm0, %v6279_v48, 0.0  ;;  %v3263_v48 = vsel %vm3235_vm0, %v6291_v50, 0.0  ;;  %v3281_v50 = vsel %vm3235_vm0, %v3218_v2, 0.0 }
 0x74e   : > { %v3446_v45 = vsel %vm3235_vm0, %v6334_v29, 0.0  ;;  %v6341_v13 = vpop.eup %4567 }
 0x74f   : > { %3497 = vst.msk [vmem:[%s5346_s29 + $0x20] sm:$0xff] %vm3235_vm0, %v3481_v47  ;;  %v3452_v40 = vsel %vm3235_vm0, %v6341_v13, 0.0  ;;  %v6345_v44 = vpop.eup %4569 }
 0x750   : > { %v3458_v55 = vsel %vm3235_vm0, %v6345_v44, 0.0 }
 0x751   : > { %3447 = vadd.xlane.f32.xlu0 %v3446_v45 }
 0x755   : > { %3453 = vadd.xlane.f32.xlu0 %v3452_v40 }
 0x759   : > { %3459 = vadd.xlane.f32.xlu0 %v3458_v55 }
 0x75d   : > { %3240 = vadd.xlane.f32.xlu0 %v3239_v22 }
 0x761   : > { %3246 = vadd.xlane.f32.xlu0 %v3245_v1 }
 0x765   : > { %3252 = vadd.xlane.f32.xlu0 %v3251_v52 }
 0x768   : > { %v3421_v61 = vpop.xlane.xlu0 %3420 }
 0x769   : > { %4571 = vrcp.f32 %v3421_v61  ;;  %3258 = vadd.xlane.f32.xlu0 %v3257_v39 }
 0x76c   : > { %v3212_v35 = vpop.permute.xlu0 %3211 }
 0x76d   : > { %3264 = vadd.xlane.f32.xlu0 %v3263_v48  ;;  %v3272_v36 = vsel %vm3235_vm0, %v3212_v35, 0.0 }
 0x76e   : > { %3273 = vadd.xlane.f32.xlu1 %v3272_v36 }
 0x771   : > { %3270 = vadd.xlane.f32.xlu0 %v3269_v8 }
 0x773   : > { %v4572_v12 = vpop.eup %4571 }
 0x774   : > { %v3479_v11 = vmul.f32 %v4572_v12, %v6240_v7 }
 0x775   : > { %3276 = vadd.xlane.f32.xlu0 %v3275_v30 }
 0x776   : > { %3495 = vst.msk [vmem:[%s5346_s29 + $0x10] sm:$0xff] %vm3235_vm0, %v3479_v11  ;;  %v3433_v49 = vpop.xlane.xlu1 %3432 }
 0x777   : > { %4573 = vrcp.f32 %v3433_v49 }
 0x779   : > { %3282 = vadd.xlane.f32.xlu0 %v3281_v50 }
 0x77a   : > { %v3439_v42 = vpop.xlane.xlu1 %3438 }
 0x77b   : > { %4575 = vrcp.f32 %v3439_v42 }
 0x77e   : > { %v3445_v34 = vpop.xlane.xlu1 %3444 }
 0x77f   : > { %4577 = vrcp.f32 %v3445_v34 }
 0x781   : > { %v4574_v51 = vpop.eup %4573 }
 0x782   : > { %v3483_v7 = vmul.f32 %v4574_v51, %v6253_v27  ;;  %v3451_v20 = vpop.xlane.xlu1 %3450 }
 0x783   : > { %4579 = vrcp.f32 %v3451_v20 }
 0x784   : > { %3499 = vst.msk [vmem:[%s5346_s29 + $0x30] sm:$0xff] %vm3235_vm0, %v3483_v7 }
 0x785   : > { %v4576_v25 = vpop.eup %4575 }
 0x786   : > { %v3485_v63 = vmul.f32 %v4576_v25, %v6259_v0  ;;  %v3457_v26 = vpop.xlane.xlu1 %3456 }
 0x787   : > { %4581 = vrcp.f32 %v3457_v26 }
 0x788   : > { %3501 = vst.msk [vmem:[%s5346_s29 + $0x40] sm:$0xff] %vm3235_vm0, %v3485_v63 }
 0x789   : > { %v4578_v37 = vpop.eup %4577 }
 0x78a   : > { %v3487_v10 = vmul.f32 %v4578_v37, %v6264_v9  ;;  %v3238_v27 = vpop.xlane.xlu1 %3237 }
 0x78b   : > { %v3284_v54 = vmul.f32 -0.5, %v3238_v27 }
 0x78c   : > { %3503 = vst.msk [vmem:[%s5346_s29 + $0x50] sm:$0xff] %vm3235_vm0, %v3487_v10 }
 0x78d   : > { %v4580_v33 = vpop.eup %4579  ;;  %3301 = vst.msk [vmem:[%s5351_s21] sm:$0xff] %vm3300_vm1, %v3284_v54 }
 0x78e   : > { %v3489_v0 = vmul.f32 %v4580_v33, %v6268_v57  ;;  %v3244_v4 = vpop.xlane.xlu1 %3243 }
 0x78f   : > { %v3286_v14 = vmul.f32 -0.5, %v3244_v4 }
 0x790   : > { %3505 = vst.msk [vmem:[%s5346_s29 + $0x60] sm:$0xff] %vm3235_vm0, %v3489_v0 }
 0x791   : > { %v4582_v18 = vpop.eup %4581  ;;  %3303 = vst.msk [vmem:[%s5351_s21 + $0x10] sm:$0xff] %vm3300_vm1, %v3286_v14 }
 0x792   : > { %v3491_v9 = vmul.f32 %v4582_v18, %v6277_v17  ;;  %v3250_v23 = vpop.xlane.xlu1 %3249 }
 0x793   : > { %v3288_v6 = vmul.f32 -0.5, %v3250_v23 }
 0x794   : > { %3507 = vst.msk [vmem:[%s5346_s29 + $0x70] sm:$0xff] %vm3235_vm0, %v3491_v9 }
 0x795   : > { %3305 = vst.msk [vmem:[%s5351_s21 + $0x20] sm:$0xff] %vm3300_vm1, %v3288_v6 }
 0x796   : > { %v3256_v19 = vpop.xlane.xlu1 %3255 }
 0x797   : > { %v3290_v57 = vmul.f32 -0.5, %v3256_v19 }
 0x799   : > { %3307 = vst.msk [vmem:[%s5351_s21 + $0x30] sm:$0xff] %vm3300_vm1, %v3290_v57 }
 0x79a   : > { %v3262_v24 = vpop.xlane.xlu1 %3261 }
 0x79b   : > { %v3292_v38 = vmul.f32 -0.5, %v3262_v24 }
 0x79d   : > { %3309 = vst.msk [vmem:[%s5351_s21 + $0x40] sm:$0xff] %vm3300_vm1, %v3292_v38  ;;  %v3424_v32 = vpop.xlane.xlu0 %3423 }
 0x79e   : > { %4583 = vrcp.f32 %v3424_v32 }
 0x7a1   : > { %v3216_v62 = vpop.permute.xlu0 %3215 }
 0x7a2   : > { %v3278_v17 = vsel %vm3235_vm0, %v3216_v62, 0.0 }
 0x7a3   : > { %3279 = vadd.xlane.f32.xlu1 %v3278_v17 }
 0x7a8   : > { %v4584_v28 = vpop.eup %4583 }
 0x7a9   : > { %v3480_v46 = vmul.f32 %v4584_v28, %v6295_v43 }
 0x7ab   : > { %3496 = vst.msk [vmem:[%s5346_s29 + $0x18] sm:$0xff] %vm3235_vm0, %v3480_v46 }
 0x7c6   : > { %v3268_v60 = vpop.xlane.xlu1 %3267 }
 0x7c7   : > { %v3294_v31 = vmul.f32 -0.5, %v3268_v60 }
 0x7c9   : > { %3311 = vst.msk [vmem:[%s5351_s21 + $0x50] sm:$0xff] %vm3300_vm1, %v3294_v31 }
 0x7d2   : > { %v3430_v3 = vpop.xlane.xlu0 %3429 }
 0x7d3   : > { %4585 = vrcp.f32 %v3430_v3 }
 0x7d6   : > { %v3436_v59 = vpop.xlane.xlu0 %3435 }
 0x7d7   : > { %4587 = vrcp.f32 %v3436_v59 }
 0x7da   : > { %v3442_v53 = vpop.xlane.xlu0 %3441 }
 0x7db   : > { %4589 = vrcp.f32 %v3442_v53 }
 0x7dd   : > { %v4586_v56 = vpop.eup %4585 }
 0x7de   : > { %v3482_v58 = vmul.f32 %v4586_v56, %v6318_v15  ;;  %v3448_v21 = vpop.xlane.xlu0 %3447 }
 0x7df   : > { %4591 = vrcp.f32 %v3448_v21 }
 0x7e0   : > { %3498 = vst.msk [vmem:[%s5346_s29 + $0x28] sm:$0xff] %vm3235_vm0, %v3482_v58 }
 0x7e1   : > { %v4588_v43 = vpop.eup %4587 }
 0x7e2   : > { %v3484_v41 = vmul.f32 %v4588_v43, %v6326_v16  ;;  %v3454_v47 = vpop.xlane.xlu0 %3453 }
 0x7e3   : > { %4593 = vrcp.f32 %v3454_v47 }
 0x7e4   : > { %3500 = vst.msk [vmem:[%s5346_s29 + $0x38] sm:$0xff] %vm3235_vm0, %v3484_v41 }
 0x7e5   : > { %v4590_v45 = vpop.eup %4589 }
 0x7e6   : > { %v3486_v40 = vmul.f32 %v4590_v45, %v6330_v5  ;;  %v3460_v55 = vpop.xlane.xlu0 %3459 }
 0x7e7   : > { %4595 = vrcp.f32 %v3460_v55 }
 0x7e8   : > { %3502 = vst.msk [vmem:[%s5346_s29 + $0x48] sm:$0xff] %vm3235_vm0, %v3486_v40 }
 0x7e9   : > { %v4592_v15 = vpop.eup %4591 }
 0x7ea   : > { %v3488_v22 = vmul.f32 %v4592_v15, %v6334_v29  ;;  %v3241_v1 = vpop.xlane.xlu0 %3240 }
 0x7eb   : > { %v3285_v16 = vmul.f32 -0.5, %v3241_v1 }
 0x7ec   : > { %3504 = vst.msk [vmem:[%s5346_s29 + $0x58] sm:$0xff] %vm3235_vm0, %v3488_v22 }
 0x7ed   : > { %v4594_v52 = vpop.eup %4593  ;;  %3302 = vst.msk [vmem:[%s5351_s21 + $0x8] sm:$0xff] %vm3300_vm1, %v3285_v16 }
 0x7ee   : > { %v3490_v5 = vmul.f32 %v4594_v52, %v6341_v13  ;;  %v3247_v61 = vpop.xlane.xlu0 %3246 }
 0x7ef   : > { %v3287_v39 = vmul.f32 -0.5, %v3247_v61 }
 0x7f0   : > { %3506 = vst.msk [vmem:[%s5346_s29 + $0x68] sm:$0xff] %vm3235_vm0, %v3490_v5 }
 0x7f1   : > { %v4596_v35 = vpop.eup %4595  ;;  %3304 = vst.msk [vmem:[%s5351_s21 + $0x18] sm:$0xff] %vm3300_vm1, %v3287_v39 }
 0x7f2   : > { %v3492_v29 = vmul.f32 %v4596_v35, %v6345_v44  ;;  %v3253_v48 = vpop.xlane.xlu0 %3252 }
 0x7f3   : > { %v3289_v36 = vmul.f32 -0.5, %v3253_v48 }
 0x7f4   : > { %3508 = vst.msk [vmem:[%s5346_s29 + $0x78] sm:$0xff] %vm3235_vm0, %v3492_v29 }
 0x7f5   : > { %3306 = vst.msk [vmem:[%s5351_s21 + $0x28] sm:$0xff] %vm3300_vm1, %v3289_v36 }
 0x7f6   : > { %v3259_v13 = vpop.xlane.xlu0 %3258 }
 0x7f7   : > { %v3291_v8 = vmul.f32 -0.5, %v3259_v13 }
 0x7f9   : > { %3308 = vst.msk [vmem:[%s5351_s21 + $0x38] sm:$0xff] %vm3300_vm1, %v3291_v8 }
 0x7fa   : > { %v3265_v2 = vpop.xlane.xlu0 %3264 }
 0x7fb   : > { %v3293_v12 = vmul.f32 -0.5, %v3265_v2  ;;  %v3274_v11 = vpop.xlane.xlu1 %3273 }
 0x7fc   : > { %v3296_v30 = vmul.f32 -0.5, %v3274_v11 }
 0x7fd   : > { %3310 = vst.msk [vmem:[%s5351_s21 + $0x48] sm:$0xff] %vm3300_vm1, %v3293_v12 }
 0x7fe   : > { %3313 = vst.msk [vmem:[%s5351_s21 + $0x60] sm:$0xff] %vm3300_vm1, %v3296_v30  ;;  %v3271_v44 = vpop.xlane.xlu0 %3270 }
 0x7ff   : > { %v3295_v49 = vmul.f32 -0.5, %v3271_v44 }
 0x801   : > { %3312 = vst.msk [vmem:[%s5351_s21 + $0x58] sm:$0xff] %vm3300_vm1, %v3295_v49 }
 0x802   : > { %v3277_v50 = vpop.xlane.xlu0 %3276 }
 0x803   : > { %v3297_v42 = vmul.f32 -0.5, %v3277_v50 }
 0x805   : > { %3314 = vst.msk [vmem:[%s5351_s21 + $0x68] sm:$0xff] %vm3300_vm1, %v3297_v42 }
 0x806   : > { %v3283_v34 = vpop.xlane.xlu0 %3282 }
 0x807   : > { %v3299_v51 = vmul.f32 -0.5, %v3283_v34 }
 0x809   : > { %3316 = vst.msk [vmem:[%s5351_s21 + $0x78] sm:$0xff] %vm3300_vm1, %v3299_v51 }
 0x830   : > { %v3280_v7 = vpop.xlane.xlu1 %3279 }
 0x831   : > { %v3298_v20 = vmul.f32 -0.5, %v3280_v7 }
 0x833   : > { %3315 = vst.msk [vmem:[%s5351_s21 + $0x70] sm:$0xff] %vm3300_vm1, %v3298_v20 }
 0x834 PF: > { %s28_s19 = sadd.s32 1, %s4903_s19   ;;  %s6575_s30 = smov %s4867_s10 }
 0x835   : > { %p25_p12 = scmp.ge.s32.totalorder %s28_s19, 10   ;;  %s6576_s10 = smov %s4871_s11 }
 0x836   : > { %s6577_s11 = smov %s5248_s20  ;;  %s6578_s12 = smov %s4879_s13 }
 0x837   : > { %s6579_s13 = smov %s4883_s14  ;;  %s6580_s14 = smov %s5195_s3 }
 0x838   : > { %s6581_s15 = smov %s4895_s17  ;;  %s6582_s16 = smov %s4899_s18 }
 0x839   : > { %s6583_s17 = smov %s6586_s25  ;;  %s6584_s18 = smov %s6590_s27 }
 0x83a   :  { %27 = sbr.rel (!%p25_p12) target bundleno = 21 (0x15), region = 148 }
 0x841   :  { %3548 = vsyncpa [#allocation4], 1 }
 0x842   :  { %3550 = vsyncpa [#allocation4 + $0x1], 1 }
 0x843   :  { %3551 = vsyncpa [#allocation6], 1 }
 0x844   :  { %3553 = vsyncpa [#allocation6 + $0x1], 1 }
 0x845   :  { %3554 = vsyncpa [#allocation9], 1 }
 0x846   :  { %3555 = vsyncpa [#allocation12], 1 }

</bundles_post_ra>
